<compile_context>
chip_gen: v7x
topology: tpu7x:2x2x1
jax: 0.10.0
libtpu: 0.0.40
codegen_flags: <defaults>
</compile_context>

<pallas_src>
import functools

import jax
import jax.numpy as jnp
from jax.experimental import pallas as pl
from jax.experimental.pallas import tpu as pltpu


def transformer_block_kernel(
    x_ref, mask_ref,
    ln1_w_ref, ln1_b_ref,
    wqkv_ref, wproj_ref, bproj_ref,
    ln2_w_ref, ln2_b_ref,
    w1_ref, b1_ref, w2_ref, b2_ref,
    out_ref,
    *, n_heads,
):
    xb = x_ref[...].astype(jnp.float32)                  # [Bc, T, D]
    Bc, T, D = xb.shape
    hs = D // n_heads
    M = Bc * T
    eps = 1e-5

    x = xb.reshape(M, D)                                  # (batch, seq) -> matmul M dim

    def layernorm(v, w_ref, b_ref):
        mu = jnp.mean(v, axis=-1, keepdims=True)
        var = jnp.mean((v - mu) ** 2, axis=-1, keepdims=True)
        return (v - mu) * jax.lax.rsqrt(var + eps) * w_ref[...] + b_ref[...]

    # ---------------- LayerNorm 1 + causal MHA + residual ----------------
    xn1 = layernorm(x, ln1_w_ref, ln1_b_ref)

    # Fused QKV: one [M, D] @ [D, 3D] bf16 matmul, f32 accumulation.  The
    # reference's n_embed**-0.5 score scale is pre-folded into Wq columns.
    qkv = jnp.dot(xn1.astype(jnp.bfloat16), wqkv_ref[...],
                  preferred_element_type=jnp.float32)     # [M, 3D] f32

    # Head split: [M, D] -> [nh*Bc, T, hs]; all (head, batch) attention
    # matmuls run batched in this single step.  Kept f32 (tiny tensors).
    def split_heads(m):                                   # m: [M, nh*hs]
        return jnp.stack(
            [m[:, h * hs:(h + 1) * hs].reshape(Bc, T, hs) for h in range(n_heads)],
            axis=0).reshape(n_heads * Bc, T, hs)

    qh = split_heads(qkv[:, 0 * D:1 * D])
    kh = split_heads(qkv[:, 1 * D:2 * D])
    vh = split_heads(qkv[:, 2 * D:3 * D])

    s = jnp.einsum('gqh,gkh->gqk', qh, kh,
                   preferred_element_type=jnp.float32)    # [G, T, T]
    s = s + mask_ref[...]                                 # additive causal bias (precomputed)
    s = s - jnp.max(s, axis=-1, keepdims=True)
    p = jnp.exp(s)
    denom = jnp.sum(p, axis=-1, keepdims=True)            # [G, T, 1]
    # attention dropout (eval mode) -> identity
    o = jnp.einsum('gqk,gkh->gqh', p, vh,
                   preferred_element_type=jnp.float32)    # [G, T, hs]
    # Deferred (flash-style) normalization: scale o, not the TxT score tensor.
    o = o * pl.reciprocal(denom, approx=True)

    # Head merge back to [M, D] -> single K=128 MXU pass through Wproj.
    o3 = o.reshape(n_heads, M, hs)
    o_cat = jnp.concatenate([o3[h] for h in range(n_heads)], axis=-1)   # [M, D]
    attn = jnp.dot(o_cat.astype(jnp.bfloat16), wproj_ref[...],
                   preferred_element_type=jnp.float32) + bproj_ref[...]
    x = x + attn                                          # proj dropout (eval) = identity

    # ---------------- LayerNorm 2 + FeedForward + residual ----------------
    xn2 = layernorm(x, ln2_w_ref, ln2_b_ref)
    h1 = jnp.dot(xn2.astype(jnp.bfloat16), w1_ref[...],
                 preferred_element_type=jnp.float32) + b1_ref[...]
    h1 = jnp.maximum(h1, 0.0)
    ff = jnp.dot(h1.astype(jnp.bfloat16), w2_ref[...],
                 preferred_element_type=jnp.float32) + b2_ref[...]
    x = x + ff                                            # ffn dropout (eval) = identity

    out_ref[...] = x.reshape(Bc, T, D).astype(out_ref.dtype)


def prepare_params(params, *, n_heads, block_size):
    """One-time fusion (NOT in the per-call path): QKV concat, scale fold,
    bf16 weight casts, 2-D bias layouts, additive causal mask."""
    (ln1_w, ln1_b, wq, wk, wv, wproj, bproj,
     ln2_w, ln2_b, w1, b1, w2, b2) = params
    D = ln1_w.shape[0]
    H = 4 * D
    # Reference scales scores by C**-0.5 with C = n_embed; fold into Wq.
    scale = jnp.float32(D) ** -0.5
    wqkv = jnp.concatenate([wq * scale, wk, wv], axis=1).astype(jnp.bfloat16)   # [D, 3D]
    wproj_bf = wproj.astype(jnp.bfloat16)                                       # [D, D]
    w1_bf = w1.astype(jnp.bfloat16)                                             # [D, H]
    w2_bf = w2.astype(jnp.bfloat16)                                             # [H, D]
    tril = jnp.tril(jnp.ones((block_size, block_size), dtype=bool))
    mask = jnp.where(tril, 0.0, -1e30).astype(jnp.float32)                      # additive bias
    return (mask,
            ln1_w.reshape(1, D), ln1_b.reshape(1, D),
            wqkv, wproj_bf, bproj.reshape(1, D),
            ln2_w.reshape(1, D), ln2_b.reshape(1, D),
            w1_bf, b1.reshape(1, H), w2_bf, b2.reshape(1, D))


def transformer_block(x, fused, *, n_heads, num_batch_blocks=1):
    B, T, D = x.shape
    H = 4 * D
    assert B % num_batch_blocks == 0
    Bc = B // num_batch_blocks

    (mask, ln1_w2, ln1_b2, wqkv, wproj_bf, bproj2,
     ln2_w2, ln2_b2, w1_bf, b1_2, w2_bf, b2_2) = fused

    def rep(shape):
        zeros = (0,) * len(shape)
        return pl.BlockSpec(shape, lambda i: zeros)   # resident across all grid steps

    in_specs = [
        pl.BlockSpec((Bc, T, D), lambda i: (i, 0, 0)),     # x (batch chunk)
        rep((T, T)),                                       # additive causal mask
        rep((1, D)), rep((1, D)),                          # ln1 w, b
        rep((D, 3 * D)),                                   # fused Wqkv (bf16, Wq pre-scaled)
        rep((D, D)), rep((1, D)),                          # Wproj (bf16), bproj
        rep((1, D)), rep((1, D)),                          # ln2 w, b
        rep((D, H)), rep((1, H)),                          # W1 (bf16), b1
        rep((H, D)), rep((1, D)),                          # W2 (bf16), b2
    ]

    kernel = functools.partial(transformer_block_kernel, n_heads=n_heads)

    # TODO(synk): for long sequences / large D, add a query-tile grid axis with
    # streamed KV + online softmax and K-tile the FFN hidden axis (single-buffer
    # the resident weights) so VMEM stays within v7x's 64 MiB.
    return pl.pallas_call(
        kernel,
        out_shape=jax.ShapeDtypeStruct((B, T, D), x.dtype),
        grid=(num_batch_blocks,),
        in_specs=in_specs,
        out_specs=pl.BlockSpec((Bc, T, D), lambda i: (i, 0, 0)),
        compiler_params=pltpu.CompilerParams(
            dimension_semantics=("parallel",),
            vmem_limit_bytes=32 * 1024 * 1024,
        ),
    )(x, mask, ln1_w2, ln1_b2, wqkv, wproj_bf, bproj2,
      ln2_w2, ln2_b2, w1_bf, b1_2, w2_bf, b2_2)


def transformer_block_ref(x, params, *, n_heads):
    """Pure-JAX f32 reference matching the PyTorch module (eval mode)."""
    (ln1_w, ln1_b, wq, wk, wv, wproj, bproj,
     ln2_w, ln2_b, w1, b1, w2, b2) = params
    B, T, D = x.shape
    hs = D // n_heads

    def ln(v, w, b):
        mu = v.mean(-1, keepdims=True)
        var = ((v - mu) ** 2).mean(-1, keepdims=True)
        return (v - mu) / jnp.sqrt(var + 1e-5) * w + b

    xn1 = ln(x, ln1_w, ln1_b)
    q = xn1 @ wq
    k = xn1 @ wk
    v = xn1 @ wv
    tril = jnp.tril(jnp.ones((T, T), dtype=bool))
    outs = []
    for h in range(n_heads):
        sl = slice(h * hs, (h + 1) * hs)
        s = jnp.einsum('btd,bsd->bts', q[..., sl], k[..., sl]) * (D ** -0.5)
        s = jnp.where(tril, s, -jnp.inf)
        p = jax.nn.softmax(s, axis=-1)
        outs.append(jnp.einsum('bts,bsd->btd', p, v[..., sl]))
    o = jnp.concatenate(outs, axis=-1)
    x = x + (o @ wproj + bproj)
    xn2 = ln(x, ln2_w, ln2_b)
    ff = jnp.maximum(xn2 @ w1 + b1, 0.0) @ w2 + b2
    return x + ff


def init_params(key, n_embed):
    D = n_embed
    H = 4 * D
    keys = jax.random.split(key, 8)
    s = 0.02
    ln1_w = jnp.ones((D,), jnp.float32)
    ln1_b = jnp.zeros((D,), jnp.float32)
    wq = s * jax.random.normal(keys[0], (D, D), jnp.float32)
    wk = s * jax.random.normal(keys[1], (D, D), jnp.float32)
    wv = s * jax.random.normal(keys[2], (D, D), jnp.float32)
    wproj = s * jax.random.normal(keys[3], (D, D), jnp.float32)
    bproj = jnp.zeros((D,), jnp.float32)
    ln2_w = jnp.ones((D,), jnp.float32)
    ln2_b = jnp.zeros((D,), jnp.float32)
    w1 = s * jax.random.normal(keys[4], (D, H), jnp.float32)
    b1 = 0.01 * jax.random.normal(keys[5], (H,), jnp.float32)
    w2 = s * jax.random.normal(keys[6], (H, D), jnp.float32)
    b2 = 0.01 * jax.random.normal(keys[7], (D,), jnp.float32)
    return (ln1_w, ln1_b, wq, wk, wv, wproj, bproj,
            ln2_w, ln2_b, w1, b1, w2, b2)


if __name__ == "__main__":
    # config: n_embed=128, n_heads=4 (head_size=32), block_size=16, batch=4.
    # D=128 keeps activation I/O lane-dense; B*T=64 rows per grid step.
    B, T, D, n_heads = 4, 16, 128, 4

    key = jax.random.PRNGKey(0)
    k_x, k_p = jax.random.split(key)
    x = jax.random.normal(k_x, (B, T, D), jnp.float32)
    params = init_params(k_p, D)

    # One-time weight fusion / bf16 cast / mask build (outside per-call path).
    fused = prepare_params(params, n_heads=n_heads, block_size=T)

    # TODO(synk): on v7x (2 TensorCores) pass num_batch_blocks=2 so the
    # 'parallel' batch axis shards across both cores.
    fn = jax.jit(functools.partial(transformer_block, n_heads=n_heads))
    out = fn(x, fused)
    jax.block_until_ready(out)

    assert out.shape == (B, T, D)
    ref = transformer_block_ref(x, params, n_heads=n_heads)
    err = float(jnp.max(jnp.abs(out - ref)))
    assert err < 5e-2, f"max abs error vs reference: {err}"
    print("KERNEL_OK")
</pallas_src>

<mosaic_0001>
module attributes {stable_mosaic.version = 11 : i64} {
  func.func @transformer_block_kernel(%arg0: i32, %arg1: memref<4x16x128xf32, #tpu.memory_space<vmem>>, %arg2: memref<16x16xf32, #tpu.memory_space<vmem>>, %arg3: memref<1x128xf32, #tpu.memory_space<vmem>>, %arg4: memref<1x128xf32, #tpu.memory_space<vmem>>, %arg5: memref<128x384xbf16, #tpu.memory_space<vmem>>, %arg6: memref<128x128xbf16, #tpu.memory_space<vmem>>, %arg7: memref<1x128xf32, #tpu.memory_space<vmem>>, %arg8: memref<1x128xf32, #tpu.memory_space<vmem>>, %arg9: memref<1x128xf32, #tpu.memory_space<vmem>>, %arg10: memref<128x512xbf16, #tpu.memory_space<vmem>>, %arg11: memref<1x512xf32, #tpu.memory_space<vmem>>, %arg12: memref<512x128xbf16, #tpu.memory_space<vmem>>, %arg13: memref<1x128xf32, #tpu.memory_space<vmem>>, %arg14: memref<4x16x128xf32, #tpu.memory_space<vmem>>) attributes {dimension_semantics = [#tpu.dimension_semantics<parallel>], iteration_bounds = array<i64: 1>, scalar_prefetch = 0 : i64, scratch_operands = 0 : i64, tpu.core_type = #tpu.core_type<tc>, window_params = [{transform_indices = @transform_0, window_bounds = array<i64: 4, 16, 128>}, {pipeline_mode = #tpu.pipeline_mode<synchronous>, transform_indices = @transform_1, window_bounds = array<i64: 16, 16>}, {pipeline_mode = #tpu.pipeline_mode<synchronous>, transform_indices = @transform_2, window_bounds = array<i64: 1, 128>}, {pipeline_mode = #tpu.pipeline_mode<synchronous>, transform_indices = @transform_3, window_bounds = array<i64: 1, 128>}, {pipeline_mode = #tpu.pipeline_mode<synchronous>, transform_indices = @transform_4, window_bounds = array<i64: 128, 384>}, {pipeline_mode = #tpu.pipeline_mode<synchronous>, transform_indices = @transform_5, window_bounds = array<i64: 128, 128>}, {pipeline_mode = #tpu.pipeline_mode<synchronous>, transform_indices = @transform_6, window_bounds = array<i64: 1, 128>}, {pipeline_mode = #tpu.pipeline_mode<synchronous>, transform_indices = @transform_7, window_bounds = array<i64: 1, 128>}, {pipeline_mode = #tpu.pipeline_mode<synchronous>, transform_indices = @transform_8, window_bounds = array<i64: 1, 128>}, {pipeline_mode = #tpu.pipeline_mode<synchronous>, transform_indices = @transform_9, window_bounds = array<i64: 128, 512>}, {pipeline_mode = #tpu.pipeline_mode<synchronous>, transform_indices = @transform_10, window_bounds = array<i64: 1, 512>}, {pipeline_mode = #tpu.pipeline_mode<synchronous>, transform_indices = @transform_11, window_bounds = array<i64: 512, 128>}, {pipeline_mode = #tpu.pipeline_mode<synchronous>, transform_indices = @transform_12, window_bounds = array<i64: 1, 128>}, {transform_indices = @transform_13, window_bounds = array<i64: 4, 16, 128>}]} {
    %c0 = arith.constant 0 : index
    %c0_0 = arith.constant 0 : index
    %c0_1 = arith.constant 0 : index
    %0 = vector.load %arg1[%c0, %c0_0, %c0_1] : memref<4x16x128xf32, #tpu.memory_space<vmem>>, vector<4x16x128xf32>
    %1 = vector.shape_cast %0 : vector<4x16x128xf32> to vector<64x128xf32>
    %cst = arith.constant dense<0.000000e+00> : vector<64xf32>
    %2 = vector.multi_reduction <add>, %1, %cst [1] : vector<64x128xf32> to vector<64xf32>
    %3 = vector.shape_cast %2 : vector<64xf32> to vector<64x1xf32>
    %cst_2 = arith.constant 1.280000e+02 : f32
    %4 = vector.broadcast %cst_2 : f32 to vector<64x1xf32>
    %5 = arith.divf %3, %4 : vector<64x1xf32>
    %6 = vector.broadcast %5 : vector<64x1xf32> to vector<64x128xf32>
    %7 = arith.subf %1, %6 : vector<64x128xf32>
    %8 = arith.mulf %7, %7 : vector<64x128xf32>
    %cst_3 = arith.constant dense<0.000000e+00> : vector<64xf32>
    %9 = vector.multi_reduction <add>, %8, %cst_3 [1] : vector<64x128xf32> to vector<64xf32>
    %10 = vector.shape_cast %9 : vector<64xf32> to vector<64x1xf32>
    %cst_4 = arith.constant 1.280000e+02 : f32
    %11 = vector.broadcast %cst_4 : f32 to vector<64x1xf32>
    %12 = arith.divf %10, %11 : vector<64x1xf32>
    %13 = vector.broadcast %5 : vector<64x1xf32> to vector<64x128xf32>
    %14 = arith.subf %1, %13 : vector<64x128xf32>
    %cst_5 = arith.constant 9.99999974E-6 : f32
    %15 = vector.broadcast %cst_5 : f32 to vector<64x1xf32>
    %16 = arith.addf %12, %15 : vector<64x1xf32>
    %17 = math.rsqrt %16 : vector<64x1xf32>
    %18 = vector.broadcast %17 : vector<64x1xf32> to vector<64x128xf32>
    %19 = arith.mulf %14, %18 : vector<64x128xf32>
    %c0_6 = arith.constant 0 : index
    %c0_7 = arith.constant 0 : index
    %20 = vector.load %arg3[%c0_6, %c0_7] : memref<1x128xf32, #tpu.memory_space<vmem>>, vector<1x128xf32>
    %21 = vector.broadcast %20 : vector<1x128xf32> to vector<64x128xf32>
    %22 = arith.mulf %19, %21 : vector<64x128xf32>
    %c0_8 = arith.constant 0 : index
    %c0_9 = arith.constant 0 : index
    %23 = vector.load %arg4[%c0_8, %c0_9] : memref<1x128xf32, #tpu.memory_space<vmem>>, vector<1x128xf32>
    %24 = vector.broadcast %23 : vector<1x128xf32> to vector<64x128xf32>
    %25 = arith.addf %22, %24 : vector<64x128xf32>
    %26 = arith.truncf %25 : vector<64x128xf32> to vector<64x128xbf16>
    %c0_10 = arith.constant 0 : index
    %c0_11 = arith.constant 0 : index
    %27 = vector.load %arg5[%c0_10, %c0_11] : memref<128x384xbf16, #tpu.memory_space<vmem>>, vector<128x384xbf16>
    %cst_12 = arith.constant dense<0.000000e+00> : vector<64x384xf32>
    %28 = tpu.matmul %26, %27, %cst_12 {dimension_numbers = #tpu.dot_dimension_numbers<[1], [0], [0], [1], [0, 0, 1, 1], [], []>} : vector<64x128xbf16>, vector<128x384xbf16>, vector<64x384xf32> -> vector<64x384xf32>
    %29 = vector.extract_strided_slice %28 {offsets = [0, 0], sizes = [64, 128], strides = [1, 1]} : vector<64x384xf32> to vector<64x128xf32>
    %30 = vector.extract_strided_slice %29 {offsets = [0, 0], sizes = [64, 32], strides = [1, 1]} : vector<64x128xf32> to vector<64x32xf32>
    %31 = vector.shape_cast %30 : vector<64x32xf32> to vector<4x16x32xf32>
    %32 = vector.extract_strided_slice %29 {offsets = [0, 32], sizes = [64, 32], strides = [1, 1]} : vector<64x128xf32> to vector<64x32xf32>
    %33 = vector.shape_cast %32 : vector<64x32xf32> to vector<4x16x32xf32>
    %34 = vector.extract_strided_slice %29 {offsets = [0, 64], sizes = [64, 32], strides = [1, 1]} : vector<64x128xf32> to vector<64x32xf32>
    %35 = vector.shape_cast %34 : vector<64x32xf32> to vector<4x16x32xf32>
    %36 = vector.extract_strided_slice %29 {offsets = [0, 96], sizes = [64, 32], strides = [1, 1]} : vector<64x128xf32> to vector<64x32xf32>
    %37 = vector.shape_cast %36 : vector<64x32xf32> to vector<4x16x32xf32>
    %38 = vector.shape_cast %31 : vector<4x16x32xf32> to vector<1x4x16x32xf32>
    %39 = vector.shape_cast %33 : vector<4x16x32xf32> to vector<1x4x16x32xf32>
    %40 = vector.shape_cast %35 : vector<4x16x32xf32> to vector<1x4x16x32xf32>
    %41 = vector.shape_cast %37 : vector<4x16x32xf32> to vector<1x4x16x32xf32>
    %42 = tpu.concatenate %38, %39, %40, %41 in 0 : vector<1x4x16x32xf32>, vector<1x4x16x32xf32>, vector<1x4x16x32xf32>, vector<1x4x16x32xf32> -> vector<4x4x16x32xf32>
    %43 = vector.shape_cast %42 : vector<4x4x16x32xf32> to vector<16x16x32xf32>
    %44 = vector.extract_strided_slice %28 {offsets = [0, 128], sizes = [64, 128], strides = [1, 1]} : vector<64x384xf32> to vector<64x128xf32>
    %45 = vector.extract_strided_slice %44 {offsets = [0, 0], sizes = [64, 32], strides = [1, 1]} : vector<64x128xf32> to vector<64x32xf32>
    %46 = vector.shape_cast %45 : vector<64x32xf32> to vector<4x16x32xf32>
    %47 = vector.extract_strided_slice %44 {offsets = [0, 32], sizes = [64, 32], strides = [1, 1]} : vector<64x128xf32> to vector<64x32xf32>
    %48 = vector.shape_cast %47 : vector<64x32xf32> to vector<4x16x32xf32>
    %49 = vector.extract_strided_slice %44 {offsets = [0, 64], sizes = [64, 32], strides = [1, 1]} : vector<64x128xf32> to vector<64x32xf32>
    %50 = vector.shape_cast %49 : vector<64x32xf32> to vector<4x16x32xf32>
    %51 = vector.extract_strided_slice %44 {offsets = [0, 96], sizes = [64, 32], strides = [1, 1]} : vector<64x128xf32> to vector<64x32xf32>
    %52 = vector.shape_cast %51 : vector<64x32xf32> to vector<4x16x32xf32>
    %53 = vector.shape_cast %46 : vector<4x16x32xf32> to vector<1x4x16x32xf32>
    %54 = vector.shape_cast %48 : vector<4x16x32xf32> to vector<1x4x16x32xf32>
    %55 = vector.shape_cast %50 : vector<4x16x32xf32> to vector<1x4x16x32xf32>
    %56 = vector.shape_cast %52 : vector<4x16x32xf32> to vector<1x4x16x32xf32>
    %57 = tpu.concatenate %53, %54, %55, %56 in 0 : vector<1x4x16x32xf32>, vector<1x4x16x32xf32>, vector<1x4x16x32xf32>, vector<1x4x16x32xf32> -> vector<4x4x16x32xf32>
    %58 = vector.shape_cast %57 : vector<4x4x16x32xf32> to vector<16x16x32xf32>
    %59 = vector.extract_strided_slice %28 {offsets = [0, 256], sizes = [64, 128], strides = [1, 1]} : vector<64x384xf32> to vector<64x128xf32>
    %60 = vector.extract_strided_slice %59 {offsets = [0, 0], sizes = [64, 32], strides = [1, 1]} : vector<64x128xf32> to vector<64x32xf32>
    %61 = vector.shape_cast %60 : vector<64x32xf32> to vector<4x16x32xf32>
    %62 = vector.extract_strided_slice %59 {offsets = [0, 32], sizes = [64, 32], strides = [1, 1]} : vector<64x128xf32> to vector<64x32xf32>
    %63 = vector.shape_cast %62 : vector<64x32xf32> to vector<4x16x32xf32>
    %64 = vector.extract_strided_slice %59 {offsets = [0, 64], sizes = [64, 32], strides = [1, 1]} : vector<64x128xf32> to vector<64x32xf32>
    %65 = vector.shape_cast %64 : vector<64x32xf32> to vector<4x16x32xf32>
    %66 = vector.extract_strided_slice %59 {offsets = [0, 96], sizes = [64, 32], strides = [1, 1]} : vector<64x128xf32> to vector<64x32xf32>
    %67 = vector.shape_cast %66 : vector<64x32xf32> to vector<4x16x32xf32>
    %68 = vector.shape_cast %61 : vector<4x16x32xf32> to vector<1x4x16x32xf32>
    %69 = vector.shape_cast %63 : vector<4x16x32xf32> to vector<1x4x16x32xf32>
    %70 = vector.shape_cast %65 : vector<4x16x32xf32> to vector<1x4x16x32xf32>
    %71 = vector.shape_cast %67 : vector<4x16x32xf32> to vector<1x4x16x32xf32>
    %72 = tpu.concatenate %68, %69, %70, %71 in 0 : vector<1x4x16x32xf32>, vector<1x4x16x32xf32>, vector<1x4x16x32xf32>, vector<1x4x16x32xf32> -> vector<4x4x16x32xf32>
    %73 = vector.shape_cast %72 : vector<4x4x16x32xf32> to vector<16x16x32xf32>
    "tpu.trace_start"() <{level = 10 : i32, message = "gqh,gkh->gqk"}> : () -> ()
    %cst_13 = arith.constant dense<0.000000e+00> : vector<16x16x16xf32>
    %74 = tpu.matmul %43, %58, %cst_13 {dimension_numbers = #tpu.dot_dimension_numbers<[2], [2], [1], [1], [0, 0, 0, 1, 1, 1], [0], [0]>} : vector<16x16x32xf32>, vector<16x16x32xf32>, vector<16x16x16xf32> -> vector<16x16x16xf32>
    "tpu.trace_stop"() : () -> ()
    %c0_14 = arith.constant 0 : index
    %c0_15 = arith.constant 0 : index
    %75 = vector.load %arg2[%c0_14, %c0_15] : memref<16x16xf32, #tpu.memory_space<vmem>>, vector<16x16xf32>
    %76 = vector.shape_cast %75 : vector<16x16xf32> to vector<1x16x16xf32>
    %77 = vector.broadcast %76 : vector<1x16x16xf32> to vector<16x16x16xf32>
    %78 = arith.addf %74, %77 : vector<16x16x16xf32>
    %cst_16 = arith.constant dense<0xFF800000> : vector<16x16xf32>
    %79 = vector.multi_reduction <maximumf>, %78, %cst_16 [2] : vector<16x16x16xf32> to vector<16x16xf32>
    %80 = vector.shape_cast %79 : vector<16x16xf32> to vector<16x16x1xf32>
    %81 = vector.broadcast %80 : vector<16x16x1xf32> to vector<16x16x16xf32>
    %82 = arith.subf %78, %81 : vector<16x16x16xf32>
    %83 = math.exp %82 : vector<16x16x16xf32>
    %cst_17 = arith.constant dense<0.000000e+00> : vector<16x16xf32>
    %84 = vector.multi_reduction <add>, %83, %cst_17 [2] : vector<16x16x16xf32> to vector<16x16xf32>
    %85 = vector.shape_cast %84 : vector<16x16xf32> to vector<16x16x1xf32>
    "tpu.trace_start"() <{level = 10 : i32, message = "gqk,gkh->gqh"}> : () -> ()
    %cst_18 = arith.constant dense<0.000000e+00> : vector<16x16x32xf32>
    %86 = tpu.matmul %83, %73, %cst_18 {dimension_numbers = #tpu.dot_dimension_numbers<[2], [1], [1], [2], [0, 0, 0, 1, 1, 2], [0], [0]>} : vector<16x16x16xf32>, vector<16x16x32xf32>, vector<16x16x32xf32> -> vector<16x16x32xf32>
    "tpu.trace_stop"() : () -> ()
    %87 = tpu.reciprocal %85 {approx = true} : vector<16x16x1xf32> -> vector<16x16x1xf32>
    %88 = vector.broadcast %87 : vector<16x16x1xf32> to vector<16x16x32xf32>
    %89 = arith.mulf %86, %88 : vector<16x16x32xf32>
    %90 = vector.shape_cast %89 : vector<16x16x32xf32> to vector<4x64x32xf32>
    %91 = vector.extract_strided_slice %90 {offsets = [0, 0, 0], sizes = [1, 64, 32], strides = [1, 1, 1]} : vector<4x64x32xf32> to vector<1x64x32xf32>
    %92 = vector.shape_cast %91 : vector<1x64x32xf32> to vector<64x32xf32>
    %93 = vector.extract_strided_slice %90 {offsets = [1, 0, 0], sizes = [1, 64, 32], strides = [1, 1, 1]} : vector<4x64x32xf32> to vector<1x64x32xf32>
    %94 = vector.shape_cast %93 : vector<1x64x32xf32> to vector<64x32xf32>
    %95 = vector.extract_strided_slice %90 {offsets = [2, 0, 0], sizes = [1, 64, 32], strides = [1, 1, 1]} : vector<4x64x32xf32> to vector<1x64x32xf32>
    %96 = vector.shape_cast %95 : vector<1x64x32xf32> to vector<64x32xf32>
    %97 = vector.extract_strided_slice %90 {offsets = [3, 0, 0], sizes = [1, 64, 32], strides = [1, 1, 1]} : vector<4x64x32xf32> to vector<1x64x32xf32>
    %98 = vector.shape_cast %97 : vector<1x64x32xf32> to vector<64x32xf32>
    %99 = tpu.concatenate %92, %94, %96, %98 in 1 : vector<64x32xf32>, vector<64x32xf32>, vector<64x32xf32>, vector<64x32xf32> -> vector<64x128xf32>
    %100 = arith.truncf %99 : vector<64x128xf32> to vector<64x128xbf16>
    %c0_19 = arith.constant 0 : index
    %c0_20 = arith.constant 0 : index
    %101 = vector.load %arg6[%c0_19, %c0_20] : memref<128x128xbf16, #tpu.memory_space<vmem>>, vector<128x128xbf16>
    %cst_21 = arith.constant dense<0.000000e+00> : vector<64x128xf32>
    %102 = tpu.matmul %100, %101, %cst_21 {dimension_numbers = #tpu.dot_dimension_numbers<[1], [0], [0], [1], [0, 0, 1, 1], [], []>} : vector<64x128xbf16>, vector<128x128xbf16>, vector<64x128xf32> -> vector<64x128xf32>
    %c0_22 = arith.constant 0 : index
    %c0_23 = arith.constant 0 : index
    %103 = vector.load %arg7[%c0_22, %c0_23] : memref<1x128xf32, #tpu.memory_space<vmem>>, vector<1x128xf32>
    %104 = vector.broadcast %103 : vector<1x128xf32> to vector<64x128xf32>
    %105 = arith.addf %102, %104 : vector<64x128xf32>
    %106 = arith.addf %1, %105 : vector<64x128xf32>
    %cst_24 = arith.constant dense<0.000000e+00> : vector<64xf32>
    %107 = vector.multi_reduction <add>, %106, %cst_24 [1] : vector<64x128xf32> to vector<64xf32>
    %108 = vector.shape_cast %107 : vector<64xf32> to vector<64x1xf32>
    %cst_25 = arith.constant 1.280000e+02 : f32
    %109 = vector.broadcast %cst_25 : f32 to vector<64x1xf32>
    %110 = arith.divf %108, %109 : vector<64x1xf32>
    %111 = vector.broadcast %110 : vector<64x1xf32> to vector<64x128xf32>
    %112 = arith.subf %106, %111 : vector<64x128xf32>
    %113 = arith.mulf %112, %112 : vector<64x128xf32>
    %cst_26 = arith.constant dense<0.000000e+00> : vector<64xf32>
    %114 = vector.multi_reduction <add>, %113, %cst_26 [1] : vector<64x128xf32> to vector<64xf32>
    %115 = vector.shape_cast %114 : vector<64xf32> to vector<64x1xf32>
    %cst_27 = arith.constant 1.280000e+02 : f32
    %116 = vector.broadcast %cst_27 : f32 to vector<64x1xf32>
    %117 = arith.divf %115, %116 : vector<64x1xf32>
    %118 = vector.broadcast %110 : vector<64x1xf32> to vector<64x128xf32>
    %119 = arith.subf %106, %118 : vector<64x128xf32>
    %cst_28 = arith.constant 9.99999974E-6 : f32
    %120 = vector.broadcast %cst_28 : f32 to vector<64x1xf32>
    %121 = arith.addf %117, %120 : vector<64x1xf32>
    %122 = math.rsqrt %121 : vector<64x1xf32>
    %123 = vector.broadcast %122 : vector<64x1xf32> to vector<64x128xf32>
    %124 = arith.mulf %119, %123 : vector<64x128xf32>
    %c0_29 = arith.constant 0 : index
    %c0_30 = arith.constant 0 : index
    %125 = vector.load %arg8[%c0_29, %c0_30] : memref<1x128xf32, #tpu.memory_space<vmem>>, vector<1x128xf32>
    %126 = vector.broadcast %125 : vector<1x128xf32> to vector<64x128xf32>
    %127 = arith.mulf %124, %126 : vector<64x128xf32>
    %c0_31 = arith.constant 0 : index
    %c0_32 = arith.constant 0 : index
    %128 = vector.load %arg9[%c0_31, %c0_32] : memref<1x128xf32, #tpu.memory_space<vmem>>, vector<1x128xf32>
    %129 = vector.broadcast %128 : vector<1x128xf32> to vector<64x128xf32>
    %130 = arith.addf %127, %129 : vector<64x128xf32>
    %131 = arith.truncf %130 : vector<64x128xf32> to vector<64x128xbf16>
    %c0_33 = arith.constant 0 : index
    %c0_34 = arith.constant 0 : index
    %132 = vector.load %arg10[%c0_33, %c0_34] : memref<128x512xbf16, #tpu.memory_space<vmem>>, vector<128x512xbf16>
    %cst_35 = arith.constant dense<0.000000e+00> : vector<64x512xf32>
    %133 = tpu.matmul %131, %132, %cst_35 {dimension_numbers = #tpu.dot_dimension_numbers<[1], [0], [0], [1], [0, 0, 1, 1], [], []>} : vector<64x128xbf16>, vector<128x512xbf16>, vector<64x512xf32> -> vector<64x512xf32>
    %c0_36 = arith.constant 0 : index
    %c0_37 = arith.constant 0 : index
    %134 = vector.load %arg11[%c0_36, %c0_37] : memref<1x512xf32, #tpu.memory_space<vmem>>, vector<1x512xf32>
    %135 = vector.broadcast %134 : vector<1x512xf32> to vector<64x512xf32>
    %136 = arith.addf %133, %135 : vector<64x512xf32>
    %cst_38 = arith.constant 0.000000e+00 : f32
    %137 = vector.broadcast %cst_38 : f32 to vector<64x512xf32>
    %138 = arith.maximumf %136, %137 : vector<64x512xf32>
    %139 = arith.truncf %138 : vector<64x512xf32> to vector<64x512xbf16>
    %c0_39 = arith.constant 0 : index
    %c0_40 = arith.constant 0 : index
    %140 = vector.load %arg12[%c0_39, %c0_40] : memref<512x128xbf16, #tpu.memory_space<vmem>>, vector<512x128xbf16>
    %cst_41 = arith.constant dense<0.000000e+00> : vector<64x128xf32>
    %141 = tpu.matmul %139, %140, %cst_41 {dimension_numbers = #tpu.dot_dimension_numbers<[1], [0], [0], [1], [0, 0, 1, 1], [], []>} : vector<64x512xbf16>, vector<512x128xbf16>, vector<64x128xf32> -> vector<64x128xf32>
    %c0_42 = arith.constant 0 : index
    %c0_43 = arith.constant 0 : index
    %142 = vector.load %arg13[%c0_42, %c0_43] : memref<1x128xf32, #tpu.memory_space<vmem>>, vector<1x128xf32>
    %143 = vector.broadcast %142 : vector<1x128xf32> to vector<64x128xf32>
    %144 = arith.addf %141, %143 : vector<64x128xf32>
    %145 = arith.addf %106, %144 : vector<64x128xf32>
    %146 = vector.shape_cast %145 : vector<64x128xf32> to vector<4x16x128xf32>
    %c0_44 = arith.constant 0 : index
    %c0_45 = arith.constant 0 : index
    %c0_46 = arith.constant 0 : index
    %147 = vector.load %arg14[%c0_44, %c0_45, %c0_46] : memref<4x16x128xf32, #tpu.memory_space<vmem>>, vector<4x16x128xf32>
    tpu.vector_store %arg14[%c0_44, %c0_45, %c0_46], %146 {strides = array<i32>} : memref<4x16x128xf32, #tpu.memory_space<vmem>>, vector<4x16x128xf32>,
    return
  }
  func.func @transform_0(%arg0: i32) -> (i32, i32, i32) {
    %c0_i32 = arith.constant 0 : i32
    %c0_i32_0 = arith.constant 0 : i32
    %c0_i32_1 = arith.constant 0 : i32
    return %arg0, %c0_i32, %c0_i32_0 : i32, i32, i32
  }
  func.func @transform_1(%arg0: i32) -> (i32, i32) {
    %c0_i32 = arith.constant 0 : i32
    %c0_i32_0 = arith.constant 0 : i32
    %c0_i32_1 = arith.constant 0 : i32
    return %c0_i32, %c0_i32_0 : i32, i32
  }
  func.func @transform_2(%arg0: i32) -> (i32, i32) {
    %c0_i32 = arith.constant 0 : i32
    %c0_i32_0 = arith.constant 0 : i32
    %c0_i32_1 = arith.constant 0 : i32
    return %c0_i32, %c0_i32_0 : i32, i32
  }
  func.func @transform_3(%arg0: i32) -> (i32, i32) {
    %c0_i32 = arith.constant 0 : i32
    %c0_i32_0 = arith.constant 0 : i32
    %c0_i32_1 = arith.constant 0 : i32
    return %c0_i32, %c0_i32_0 : i32, i32
  }
  func.func @transform_4(%arg0: i32) -> (i32, i32) {
    %c0_i32 = arith.constant 0 : i32
    %c0_i32_0 = arith.constant 0 : i32
    %c0_i32_1 = arith.constant 0 : i32
    return %c0_i32, %c0_i32_0 : i32, i32
  }
  func.func @transform_5(%arg0: i32) -> (i32, i32) {
    %c0_i32 = arith.constant 0 : i32
    %c0_i32_0 = arith.constant 0 : i32
    %c0_i32_1 = arith.constant 0 : i32
    return %c0_i32, %c0_i32_0 : i32, i32
  }
  func.func @transform_6(%arg0: i32) -> (i32, i32) {
    %c0_i32 = arith.constant 0 : i32
    %c0_i32_0 = arith.constant 0 : i32
    %c0_i32_1 = arith.constant 0 : i32
    return %c0_i32, %c0_i32_0 : i32, i32
  }
  func.func @transform_7(%arg0: i32) -> (i32, i32) {
    %c0_i32 = arith.constant 0 : i32
    %c0_i32_0 = arith.constant 0 : i32
    %c0_i32_1 = arith.constant 0 : i32
    return %c0_i32, %c0_i32_0 : i32, i32
  }
  func.func @transform_8(%arg0: i32) -> (i32, i32) {
    %c0_i32 = arith.constant 0 : i32
    %c0_i32_0 = arith.constant 0 : i32
    %c0_i32_1 = arith.constant 0 : i32
    return %c0_i32, %c0_i32_0 : i32, i32
  }
  func.func @transform_9(%arg0: i32) -> (i32, i32) {
    %c0_i32 = arith.constant 0 : i32
    %c0_i32_0 = arith.constant 0 : i32
    %c0_i32_1 = arith.constant 0 : i32
    return %c0_i32, %c0_i32_0 : i32, i32
  }
  func.func @transform_10(%arg0: i32) -> (i32, i32) {
    %c0_i32 = arith.constant 0 : i32
    %c0_i32_0 = arith.constant 0 : i32
    %c0_i32_1 = arith.constant 0 : i32
    return %c0_i32, %c0_i32_0 : i32, i32
  }
  func.func @transform_11(%arg0: i32) -> (i32, i32) {
    %c0_i32 = arith.constant 0 : i32
    %c0_i32_0 = arith.constant 0 : i32
    %c0_i32_1 = arith.constant 0 : i32
    return %c0_i32, %c0_i32_0 : i32, i32
  }
  func.func @transform_12(%arg0: i32) -> (i32, i32) {
    %c0_i32 = arith.constant 0 : i32
    %c0_i32_0 = arith.constant 0 : i32
    %c0_i32_1 = arith.constant 0 : i32
    return %c0_i32, %c0_i32_0 : i32, i32
  }
  func.func @transform_13(%arg0: i32) -> (i32, i32, i32) {
    %c0_i32 = arith.constant 0 : i32
    %c0_i32_0 = arith.constant 0 : i32
    %c0_i32_1 = arith.constant 0 : i32
    return %arg0, %c0_i32, %c0_i32_0 : i32, i32, i32
  }
}

</mosaic_0001>

<bundles_post_ra>
// kernel: transformer_block.1
= control target key start
LH: loop header
LB: loop body
LE: loop exit
PB: predicated region body
PF: predicated region fallthrough
CT: control target
= control target key end

     0   :  { %18 = vsyncpa [#allocation3], 0  ;;  %s7593_s0 = inlined_call_operand.hbm [shape: f32[4,16,128], index: 0, kind: input, shape index: {}]   ;;  %s7594_s1 = inlined_call_operand.hbm [shape: f32[16,16], index: 1, kind: input, shape index: {}]   ;;  %s7595_s2 = inlined_call_operand.vmem [shape: f32[1,128], index: 2, kind: input, shape index: {}]   ;;  %s7596_s3 = inlined_call_operand.vmem [shape: f32[1,128], index: 3, kind: input, shape index: {}]   ;;  %s7597_s4 = inlined_call_operand.hbm [shape: bf16[128,384], index: 4, kind: input, shape index: {}]   ;;  %s7598_s5 = inlined_call_operand.hbm [shape: bf16[128,128], index: 5, kind: input, shape index: {}]   ;;  %s7599_s6 = inlined_call_operand.vmem [shape: f32[1,128], index: 6, kind: input, shape index: {}]   ;;  %s7600_s7 = inlined_call_operand.vmem [shape: f32[1,128], index: 7, kind: input, shape index: {}]   ;;  %s7601_s8 = inlined_call_operand.vmem [shape: f32[1,128], index: 8, kind: input, shape index: {}]   ;;  %s7602_s9 = inlined_call_operand.hbm [shape: bf16[128,512], index: 9, kind: input, shape index: {}]   ;;  %s7603_s10 = inlined_call_operand.vmem [shape: f32[1,512], index: 10, kind: input, shape index: {}]   ;;  %s7604_s11 = inlined_call_operand.hbm [shape: bf16[512,128], index: 11, kind: input, shape index: {}]   ;;  %s7605_s12 = inlined_call_operand.vmem [shape: f32[1,128], index: 12, kind: input, shape index: {}]   ;;  %s7606_s13 = inlined_call_operand.hbm [shape: f32[4,16,128], index: 13, kind: output, shape index: {}]  }
   0x1   :  { %19 = vsyncpa [#allocation6], 0 }
   0x2   :  { %20 = vsyncpa [#allocation9], 0 }
   0x3   :  { %21 = vsyncpa [#allocation12], 0 }
   0x4   :  { %22 = vsyncpa [#allocation4], 0  ;;  %s6486_s25 = smov [#allocation5]   ;;  %s6487_s27 = smov [#allocation8]  }
   0x5   :  { %s40_s26 = sshll.u32 %s6486_s25, 4  ;;  %s68_s28 = sshll.u32 %s6487_s27, 4  ;;  %s41_s26 = int_to_ptr.vmem [resolvable:$true] %s40_s26  ;;  %s6574_s28 = int_to_ptr.vmem [resolvable:$true] %s68_s28 }
   0x6   :  { %s6322_s14 = scalar_lea.hbm %s7594_s1, 256 }
   0x7   :  { %p6323_p0 = scmp.ne.s32.totalorder %s7594_s1, %s6322_s14  ;;  %p6326_p1 = scmp.lt.u32.totalorder %s6322_s14, %s7594_s1 }
   0x9   :  { %p6328_p2 = pnand %p6326_p1, %p6323_p0 }
   0xb   :  { %6331 = shalt.err (!%p6328_p2)
}
   0xc   :  { %s6332_s19 = scalar_lea.vmem %s41_s26, 256  ;;  %p6337_p4 = scmp.lt.s32.totalorder %s41_s26, %s41_s26 }
   0xd   :  { %p6333_p3 = scmp.ne.s32.totalorder %s41_s26, %s6332_s19  ;;  %p6338_p5 = scmp.lt.s32.totalorder %s6332_s19, %s6332_s19 }
   0xf   :  { %p6339_p6 = por %p6338_p5, %p6337_p4 }
  0x11   :  { %p6340_p7 = pnand %p6339_p6, %p6333_p3 }
  0x13   :  { %6343 = shalt.err (!%p6340_p7)
}
  0x14   :  { %s6488_s20 = smov 128   ;;  %s6489_s21 = smov 8  }
  0x15   :  { %46 = dma.hbm_to_vmem [thread:$0]  %s7594_s1, 256, %s41_s26, [#allocation6], %s6488_s20, %s6488_s20, %s6489_s21  }
  0x16   :  { %s6344_s27 = scalar_lea.hbm %s7598_s5, 1024 }
  0x17   :  { %p6345_p8 = scmp.ne.s32.totalorder %s7598_s5, %s6344_s27  ;;  %p6348_p9 = scmp.lt.u32.totalorder %s6344_s27, %s7598_s5 }
  0x19   :  { %p6350_p10 = pnand %p6348_p9, %p6345_p8 }
  0x1b   :  { %6353 = shalt.err (!%p6350_p10)
}
  0x1c   :  { %s6354_s16 = scalar_lea.vmem %s6574_s28, 1024  ;;  %p6359_p12 = scmp.lt.s32.totalorder %s6574_s28, %s6574_s28 }
  0x1d   :  { %p6355_p11 = scmp.ne.s32.totalorder %s6574_s28, %s6354_s16  ;;  %p6360_p13 = scmp.lt.s32.totalorder %s6354_s16, %s6354_s16 }
  0x1f   :  { %p6361_p0 = por %p6360_p13, %p6359_p12 }
  0x21   :  { %p6362_p1 = pnand %p6361_p0, %p6355_p11 }
  0x23   :  { %6365 = shalt.err (!%p6362_p1)
}
  0x24   :  { %s6490_s1 = smov 64   ;;  %s6491_s26 = smov 4  }
  0x25   :  { %74 = dma.hbm_to_vmem [thread:$0]  %s7598_s5, 1024, %s6574_s28, [#allocation9], %s6490_s1, %s6490_s1, %s6491_s26  }
  0x26   :  { %s6492_s19 = smov [#allocation2]   ;;  %s6493_s23 = smov [#allocation7]  }
  0x27   :  { %s28_s22 = sshll.u32 %s6492_s19, 4  ;;  %s56_s24 = sshll.u32 %s6493_s23, 4  ;;  %s29_s22 = int_to_ptr.vmem [resolvable:$true] %s28_s22  ;;  %s6611_s24 = int_to_ptr.vmem [resolvable:$true] %s56_s24 }
  0x28   :  { %s6366_s29 = scalar_lea.hbm %s7593_s0, 1024 }
  0x29   :  { %p6367_p2 = scmp.ne.s32.totalorder %s7593_s0, %s6366_s29  ;;  %p6370_p3 = scmp.lt.u32.totalorder %s6366_s29, %s7593_s0 }
  0x2b   :  { %p6372_p4 = pnand %p6370_p3, %p6367_p2 }
  0x2d   :  { %6375 = shalt.err (!%p6372_p4)
}
  0x2e   :  { %s6376_s5 = scalar_lea.vmem %s29_s22, 1024  ;;  %p6381_p6 = scmp.lt.s32.totalorder %s29_s22, %s29_s22 }
  0x2f   :  { %p6377_p5 = scmp.ne.s32.totalorder %s29_s22, %s6376_s5  ;;  %p6382_p7 = scmp.lt.s32.totalorder %s6376_s5, %s6376_s5 }
  0x31   :  { %p6383_p8 = por %p6382_p7, %p6381_p6 }
  0x33   :  { %p6384_p9 = pnand %p6383_p8, %p6377_p5 }
  0x35   :  { %6387 = shalt.err (!%p6384_p9)
}
  0x36   :  { %34 = dma.hbm_to_vmem [thread:$0]  %s7593_s0, 1024, %s29_s22, [#allocation3], %s6488_s20, %s6488_s20, %s6489_s21  }
  0x37   :  { %s6388_s23 = scalar_lea.hbm %s7597_s4, 3072 }
  0x38   :  { %p6389_p10 = scmp.ne.s32.totalorder %s7597_s4, %s6388_s23  ;;  %p6392_p11 = scmp.lt.u32.totalorder %s6388_s23, %s7597_s4 }
  0x3a   :  { %p6394_p12 = pnand %p6392_p11, %p6389_p10 }
  0x3c   :  { %6397 = shalt.err (!%p6394_p12)
}
  0x3d   :  { %s6398_s14 = scalar_lea.vmem %s6611_s24, 3072  ;;  %p6403_p0 = scmp.lt.s32.totalorder %s6611_s24, %s6611_s24 }
  0x3e   :  { %p6399_p13 = scmp.ne.s32.totalorder %s6611_s24, %s6398_s14  ;;  %p6404_p1 = scmp.lt.s32.totalorder %s6398_s14, %s6398_s14 }
  0x40   :  { %p6405_p2 = por %p6404_p1, %p6403_p0 }
  0x42   :  { %p6406_p3 = pnand %p6405_p2, %p6399_p13 }
  0x44   :  { %6409 = shalt.err (!%p6406_p3)
}
  0x45   :  { %s6494_s0 = smov 192   ;;  %s6495_s22 = smov 12  }
  0x46   :  { %62 = dma.hbm_to_vmem [thread:$0]  %s7597_s4, 3072, %s6611_s24, [#allocation6], %s6494_s0, %s6494_s0, %s6495_s22  }
  0x47   :  { %s6496_s5 = smov [#allocation10]   ;;  %s6410_s19 = scalar_lea.hbm %s7602_s9, 4096 }
  0x48   :  { %s86_s28 = sshll.u32 %s6496_s5, 4  ;;  %p6411_p4 = scmp.ne.s32.totalorder %s7602_s9, %s6410_s19  ;;  %s87_s28 = int_to_ptr.vmem [resolvable:$true] %s86_s28 }
  0x49   :  { %p6414_p5 = scmp.lt.u32.totalorder %s6410_s19, %s7602_s9 }
  0x4b   :  { %p6416_p6 = pnand %p6414_p5, %p6411_p4 }
  0x4d   :  { %6419 = shalt.err (!%p6416_p6)
}
  0x4e   :  { %s6420_s30 = scalar_lea.vmem %s87_s28, 4096  ;;  %p6425_p8 = scmp.lt.s32.totalorder %s87_s28, %s87_s28 }
  0x4f   :  { %p6421_p7 = scmp.ne.s32.totalorder %s87_s28, %s6420_s30  ;;  %p6426_p9 = scmp.lt.s32.totalorder %s6420_s30, %s6420_s30 }
  0x51   :  { %p6427_p10 = por %p6426_p9, %p6425_p8 }
  0x53   :  { %p6428_p11 = pnand %p6427_p10, %p6421_p7 }
  0x55   :  { %6431 = shalt.err (!%p6428_p11)
}
  0x56   :  { %s6497_s4 = smov 256   ;;  %s6498_s24 = smov 16  }
  0x57   :  { %92 = dma.hbm_to_vmem [thread:$0]  %s7602_s9, 4096, %s87_s28, [#allocation9], %s6497_s4, %s6497_s4, %s6498_s24  }
  0x58   :  { %s6499_s22 = smov [#allocation11]   ;;  %s6432_s17 = scalar_lea.hbm %s7604_s11, 4096 }
  0x59   :  { %s100_s15 = sshll.u32 %s6499_s22, 4  ;;  %p6433_p12 = scmp.ne.s32.totalorder %s7604_s11, %s6432_s17  ;;  %s101_s15 = int_to_ptr.vmem [resolvable:$true] %s100_s15 }
  0x5a   :  { %p6436_p13 = scmp.lt.u32.totalorder %s6432_s17, %s7604_s11 }
  0x5c   :  { %p6438_p0 = pnand %p6436_p13, %p6433_p12 }
  0x5e   :  { %6441 = shalt.err (!%p6438_p0)
}
  0x5f   :  { %s6442_s27 = scalar_lea.vmem %s101_s15, 4096  ;;  %p6447_p2 = scmp.lt.s32.totalorder %s101_s15, %s101_s15 }
  0x60   :  { %p6443_p1 = scmp.ne.s32.totalorder %s101_s15, %s6442_s27  ;;  %p6448_p3 = scmp.lt.s32.totalorder %s6442_s27, %s6442_s27 }
  0x62   :  { %p6449_p4 = por %p6448_p3, %p6447_p2 }
  0x64   :  { %p6450_p5 = pnand %p6449_p4, %p6443_p1 }
  0x66   :  { %6453 = shalt.err (!%p6450_p5)
}
  0x67   :  { %106 = dma.hbm_to_vmem [thread:$0]  %s7604_s11, 4096, %s101_s15, [#allocation12], %s6490_s1, %s6490_s1, %s6491_s26  }
  0x68   :  { %6476 = dma.done.wait [#allocation3], 1024  }
  0x69   :  { %6477 = vsyncadd [#allocation3], 4294966272 }
  0x6a   :  { %6478 = dma.done.wait [#allocation6], 3328  }
  0x6b   :  { %6479 = vsyncadd [#allocation6], 4294963968 }
  0x6c   :  { %6480 = dma.done.wait [#allocation9], 5120  }
  0x6d   :  { %6481 = vsyncadd [#allocation9], 4294962176 }
  0x6e   :  { %6482 = dma.done.wait [#allocation12], 4096  }
  0x6f   :  { %6483 = vsyncadd [#allocation12], 4294963200  ;;  %v128_v0 = vld [vmem:[#allocation2] sm:$0xff]  ;;  %v130_v1 = vld [vmem:[#allocation2 + $0x10] sm:$0xff]  ;;  %v6500_v63 = vmov 0   ;;  %vm751_vm0 = vcmask 261120  }
  0x70   :  { %136 = vadd.xlane.f32.xlu0 %v128_v0  ;;  %140 = vadd.xlane.f32.xlu1 %v130_v1  ;;  %v129_v2 = vld [vmem:[#allocation2 + $0x8] sm:$0xff]  ;;  %v131_v3 = vld [vmem:[#allocation2 + $0x18] sm:$0xff]  ;;  %v132_v4 = vld [vmem:[#allocation2 + $0x20] sm:$0xff]  ;;  %vm2080_vm2 = vcmask 130048   ;;  %vm3833_vm3 = vcmask 523264   ;;  %vm3842_vm4 = vcmask 785408  }
  0x71   :  { %v133_v5 = vld [vmem:[#allocation2 + $0x28] sm:$0xff]  ;;  %v134_v6 = vld [vmem:[#allocation2 + $0x30] sm:$0xff]  ;;  %v135_v7 = vld [vmem:[#allocation2 + $0x38] sm:$0xff]  ;;  %451 = vmatprep.mubr.bf16.mxu0 %v6500_v63 }
  0x72   :  { %v6034_v8 = vld [vmem:[#allocation7 + $0x4] ss:$12 sps:$4 sm:$0xff]   ;;  %v6036_v9 = vld [vmem:[#allocation7] ss:$12 sps:$4 sm:$0xff]   ;;  %v6037_v10 = vld [vmem:[#allocation7 + $0x1c] ss:$12 sps:$4 sm:$0xff]  }
  0x73   :  { %v6039_v11 = vld [vmem:[#allocation7 + $0x8] ss:$12 sps:$4 sm:$0xff]   ;;  %419 = vmatprep.subr.bf16.mxu0 %v6034_v8  ;;  %v6040_v44 = vld [vmem:[#allocation7 + $0x18] ss:$12 sps:$4 sm:$0xff]   ;;  %v6043_v46 = vld [vmem:[#allocation7 + $0x20] ss:$12 sps:$4 sm:$0xff]  }
  0x74   :  { %138 = vadd.xlane.f32.xlu0 %v129_v2  ;;  %142 = vadd.xlane.f32.xlu1 %v131_v3  ;;  %v6041_v45 = vld [vmem:[#allocation7 + $0x34] ss:$12 sps:$4 sm:$0xff]   ;;  %v6044_v47 = vld [vmem:[#allocation7 + $0x30] ss:$12 sps:$4 sm:$0xff]   ;;  %v6045_v48 = vld [vmem:[#allocation7 + $0x4c] ss:$12 sps:$4 sm:$0xff]  }
  0x75   :  { %420 = vmatpush1.bf16.msra.mxu0 %v6036_v9  ;;  %5388 = vmatprep.subr.bf16.mxu1 %v6039_v11  ;;  %v6047_v49 = vld [vmem:[#allocation7 + $0x38] ss:$12 sps:$4 sm:$0xff]   ;;  %v6048_v50 = vld [vmem:[#allocation7 + $0x48] ss:$12 sps:$4 sm:$0xff]   ;;  %v6051_v52 = vld [vmem:[#allocation7 + $0x50] ss:$12 sps:$4 sm:$0xff]  }
  0x76   :  { %421 = vmatprep.subr.bf16.mxu0 %v6037_v10  ;;  %5389 = vmatpush3.bf16.msra.mxu1 %v6039_v11  ;;  %v6049_v51 = vld [vmem:[#allocation7 + $0x64] ss:$12 sps:$4 sm:$0xff]   ;;  %v6052_v53 = vld [vmem:[#allocation7 + $0x60] ss:$12 sps:$4 sm:$0xff]   ;;  %v6053_v54 = vld [vmem:[#allocation7 + $0x7c] ss:$12 sps:$4 sm:$0xff]  }
  0x77   :  { %5390 = vmatprep.subr.bf16.mxu1 %v6043_v46  ;;  %v6055_v55 = vld [vmem:[#allocation7 + $0x68] ss:$12 sps:$4 sm:$0xff]   ;;  %v6056_v56 = vld [vmem:[#allocation7 + $0x78] ss:$12 sps:$4 sm:$0xff]   ;;  %v6059_v58 = vld [vmem:[#allocation7 + $0x80] ss:$12 sps:$4 sm:$0xff]  }
  0x78   :  { %144 = vadd.xlane.f32.xlu0 %v132_v4  ;;  %146 = vadd.xlane.f32.xlu1 %v133_v5  ;;  %v6057_v57 = vld [vmem:[#allocation7 + $0x94] ss:$12 sps:$4 sm:$0xff]   ;;  %v6060_v59 = vld [vmem:[#allocation7 + $0x90] ss:$12 sps:$4 sm:$0xff]   ;;  %v6061_v60 = vld [vmem:[#allocation7 + $0xac] ss:$12 sps:$4 sm:$0xff]  }
  0x79   :  { %422 = vmatpush1.bf16.msra.mxu0 %v6040_v44  ;;  %v6063_v61 = vld [vmem:[#allocation7 + $0x98] ss:$12 sps:$4 sm:$0xff]   ;;  %v6064_v62 = vld [vmem:[#allocation7 + $0xa8] ss:$12 sps:$4 sm:$0xff]   ;;  %vm6734_vm1 = vmpackc.low %vm751_vm0, %vm751_vm0 }
  0x7a   :  { %423 = vmatprep.subr.bf16.mxu0 %v6041_v45  ;;  %5391 = vmatpush3.bf16.msra.mxu1 %v6043_v46 }
  0x7b   :  { %5392 = vmatprep.subr.bf16.mxu1 %v6047_v49 }
  0x7c   :  { %148 = vadd.xlane.f32.xlu0 %v134_v6  ;;  %150 = vadd.xlane.f32.xlu1 %v135_v7 }
  0x7d   :  { %424 = vmatpush1.bf16.msra.mxu0 %v6044_v47 }
  0x7e   :  { %425 = vmatprep.subr.bf16.mxu0 %v6045_v48  ;;  %5393 = vmatpush3.bf16.msra.mxu1 %v6047_v49 }
  0x7f   :  { %5394 = vmatprep.subr.bf16.mxu1 %v6051_v52 }
  0x81   :  { %426 = vmatpush1.bf16.msra.mxu0 %v6048_v50 }
  0x82   :  { %427 = vmatprep.subr.bf16.mxu0 %v6049_v51  ;;  %5395 = vmatpush3.bf16.msra.mxu1 %v6051_v52 }
  0x83   :  { %5396 = vmatprep.subr.bf16.mxu1 %v6055_v55 }
  0x85   :  { %428 = vmatpush1.bf16.msra.mxu0 %v6052_v53 }
  0x86   :  { %429 = vmatprep.subr.bf16.mxu0 %v6053_v54  ;;  %5397 = vmatpush3.bf16.msra.mxu1 %v6055_v55 }
  0x87   :  { %5398 = vmatprep.subr.bf16.mxu1 %v6059_v58 }
  0x89   :  { %430 = vmatpush1.bf16.msra.mxu0 %v6056_v56 }
  0x8a   :  { %431 = vmatprep.subr.bf16.mxu0 %v6057_v57  ;;  %5399 = vmatpush3.bf16.msra.mxu1 %v6059_v58 }
  0x8b   :  { %5400 = vmatprep.subr.bf16.mxu1 %v6063_v61 }
  0x8d   :  { %432 = vmatpush1.bf16.msra.mxu0 %v6060_v59 }
  0x8e   :  { %433 = vmatprep.subr.bf16.mxu0 %v6061_v60  ;;  %5401 = vmatpush3.bf16.msra.mxu1 %v6063_v61 }
  0x91   :  { %434 = vmatpush1.bf16.msra.mxu0 %v6064_v62 }
  0xfd   :  { %v137_v12 = vpop.xlane.xlu0 %136  ;;  %v141_v13 = vpop.xlane.xlu1 %140 }
  0xfe   :  { %v153_v14 = vmul.f32 0.0078125, %v137_v12  ;;  %v155_v15 = vmul.f32 0.0078125, %v141_v13 }
 0x100   :  { %v6672_v16 = vsub.f32 %v128_v0, %v153_v14  ;;  %v6674_v17 = vsub.f32 %v130_v1, %v155_v15  ;;  %v6065_v0 = vld [vmem:[#allocation7 + $0xb0] ss:$12 sps:$4 sm:$0xff]  }
 0x101   :  { %v139_v18 = vpop.xlane.xlu0 %138  ;;  %v143_v19 = vpop.xlane.xlu1 %142  ;;  %5402 = vmatprep.subr.bf16.mxu1 %v6065_v0 }
 0x102   :  { %v154_v20 = vmul.f32 0.0078125, %v139_v18  ;;  %v169_v21 = vmul.f32 %v6672_v16, %v6672_v16  ;;  %v156_v22 = vmul.f32 0.0078125, %v143_v19  ;;  %v171_v23 = vmul.f32 %v6674_v17, %v6674_v17  ;;  %5403 = vmatpush3.bf16.msra.mxu1 %v6065_v0 }
 0x104   :  { %177 = vadd.xlane.f32.xlu0 %v169_v21  ;;  %v6680_v24 = vsub.f32 %v129_v2, %v154_v20  ;;  %v6682_v25 = vsub.f32 %v131_v3, %v156_v22 }
 0x105   :  { %v145_v26 = vpop.xlane.xlu0 %144  ;;  %v147_v27 = vpop.xlane.xlu1 %146 }
 0x106   :  { %v157_v28 = vmul.f32 0.0078125, %v145_v26  ;;  %v170_v29 = vmul.f32 %v6680_v24, %v6680_v24  ;;  %v158_v30 = vmul.f32 0.0078125, %v147_v27  ;;  %v172_v31 = vmul.f32 %v6682_v25, %v6682_v25 }
 0x108   :  { %181 = vadd.xlane.f32.xlu0 %v171_v23  ;;  %179 = vadd.xlane.f32.xlu1 %v170_v29  ;;  %v6688_v32 = vsub.f32 %v132_v4, %v157_v28  ;;  %v6690_v33 = vsub.f32 %v133_v5, %v158_v30  ;;  %v4958_v30 = vld [vmem:[%s7595_s2] ss:$0 sm:$0xff]  ;;  %s6501_s2 = smov 96  }
 0x109   :  { %v149_v34 = vpop.xlane.xlu0 %148  ;;  %v151_v35 = vpop.xlane.xlu1 %150 }
 0x10a   :  { %v159_v36 = vmul.f32 0.0078125, %v149_v34  ;;  %v173_v37 = vmul.f32 %v6688_v32, %v6688_v32  ;;  %v160_v38 = vmul.f32 0.0078125, %v151_v35  ;;  %v174_v39 = vmul.f32 %v6690_v33, %v6690_v33 }
 0x10c   :  { %183 = vadd.xlane.f32.xlu1 %v172_v31  ;;  %185 = vadd.xlane.f32.xlu0 %v173_v37  ;;  %v6696_v40 = vsub.f32 %v134_v6, %v159_v36  ;;  %v6698_v41 = vsub.f32 %v135_v7, %v160_v38  ;;  %v4959_v38 = vld [vmem:[%s7596_s3] ss:$0 sm:$0xff]  ;;  %s6502_s3 = smov 32  }
 0x10e   :  { %v175_v42 = vmul.f32 %v6696_v40, %v6696_v40  ;;  %v176_v43 = vmul.f32 %v6698_v41, %v6698_v41 }
 0x110   :  { %187 = vadd.xlane.f32.xlu1 %v174_v39  ;;  %189 = vadd.xlane.f32.xlu0 %v175_v42 }
 0x114   :  { %191 = vadd.xlane.f32.xlu1 %v176_v43 }
 0x191   :  { %v178_v1 = vpop.xlane.xlu0 %177 }
 0x192   :  { %v193_v2 = vmul.f32 0.0078125, %v178_v1 }
 0x194   :  { %v201_v3 = vadd.f32 1e-05, %v193_v2 }
 0x195   :  { %v180_v4 = vpop.xlane.xlu1 %179  ;;  %v182_v5 = vpop.xlane.xlu0 %181 }
 0x196   :  { %6154 = vrsqrt.f32 %v201_v3  ;;  %v194_v6 = vmul.f32 0.0078125, %v180_v4  ;;  %v195_v7 = vmul.f32 0.0078125, %v182_v5 }
 0x198   :  { %v202_v8 = vadd.f32 1e-05, %v194_v6  ;;  %v203_v9 = vadd.f32 1e-05, %v195_v7 }
 0x199   :  { %v184_v10 = vpop.xlane.xlu1 %183  ;;  %v186_v11 = vpop.xlane.xlu0 %185 }
 0x19a   :  { %6156 = vrsqrt.f32 %v202_v8  ;;  %v196_v12 = vmul.f32 0.0078125, %v184_v10  ;;  %v197_v13 = vmul.f32 0.0078125, %v186_v11 }
 0x19b   :  { %6158 = vrsqrt.f32 %v203_v9 }
 0x19c   :  { %v204_v14 = vadd.f32 1e-05, %v196_v12  ;;  %v205_v15 = vadd.f32 1e-05, %v197_v13 }
 0x19d   :  { %v188_v18 = vpop.xlane.xlu1 %187  ;;  %v190_v19 = vpop.xlane.xlu0 %189 }
 0x19e   :  { %6160 = vrsqrt.f32 %v204_v14  ;;  %v198_v20 = vmul.f32 0.0078125, %v188_v18  ;;  %v199_v21 = vmul.f32 0.0078125, %v190_v19 }
 0x19f   :  { %6162 = vrsqrt.f32 %v205_v15 }
 0x1a0   :  { %v6155_v22 = vpop.eup %6154  ;;  %v206_v23 = vadd.f32 1e-05, %v198_v20  ;;  %v207_v26 = vadd.f32 1e-05, %v199_v21 }
 0x1a1   :  { %v192_v27 = vpop.xlane.xlu1 %191  ;;  %v217_v28 = vmul.f32 %v6155_v22, %v6672_v16 }
 0x1a2   :  { %6164 = vrsqrt.f32 %v206_v23  ;;  %v200_v29 = vmul.f32 0.0078125, %v192_v27 }
 0x1a3   :  { %6166 = vrsqrt.f32 %v207_v26  ;;  %v232_v37 = vmul.f32 %v4958_v30, %v217_v28 }
 0x1a4   :  { %v6157_v31 = vpop.eup %6156  ;;  %v208_v34 = vadd.f32 1e-05, %v200_v29 }
 0x1a5   :  { %v6159_v35 = vpop.eup %6158  ;;  %v218_v36 = vmul.f32 %v6157_v31, %v6680_v24  ;;  %v247_v45 = vadd.f32 %v4959_v38, %v232_v37 }
 0x1a6   :  { %6168 = vrsqrt.f32 %v208_v34  ;;  %v219_v16 = vmul.f32 %v6159_v35, %v6674_v17 }
 0x1a7   :  { %v233_v39 = vmul.f32 %v4958_v30, %v218_v36 }
 0x1a8   :  { %v6161_v42 = vpop.eup %6160  ;;  %v234_v43 = vmul.f32 %v4958_v30, %v219_v16 }
 0x1a9   :  { %v6163_v44 = vpop.eup %6162  ;;  %v248_v46 = vadd.f32 %v4959_v38, %v233_v39  ;;  %v220_v47 = vmul.f32 %v6161_v42, %v6682_v25 }
 0x1aa   :  { %v221_v48 = vmul.f32 %v6163_v44, %v6688_v32  ;;  %v249_v51 = vadd.f32 %v4959_v38, %v234_v43 }
 0x1ab   :  { %v255_v49 = vpack.c.bf16 %v248_v46, %v247_v45  ;;  %v235_v24 = vmul.f32 %v4958_v30, %v220_v47 }
 0x1ac   :  { %v6165_v50 = vpop.eup %6164  ;;  %v236_v54 = vmul.f32 %v4958_v30, %v221_v48 }
 0x1ad   :  { %v6167_v52 = vpop.eup %6166  ;;  %452 = vmatmul.mubr.bf16.vlgmr.msra.gmra.mrb[0].mxu0 %v255_v49  ;;  %5404 = vmatprep.mubr.bf16.mxu1 %v255_v49  ;;  %v250_v53 = vadd.f32 %v4959_v38, %v235_v24  ;;  %v222_v17 = vmul.f32 %v6165_v50, %v6690_v33 }
 0x1ae   :  { %461 = vmatprep.mubr.bf16.mxu0 %v6500_v63  ;;  %v223_v55 = vmul.f32 %v6167_v52, %v6696_v40  ;;  %v251_v32 = vadd.f32 %v4959_v38, %v236_v54 }
 0x1af   :  { %v256_v56 = vpack.c.bf16 %v250_v53, %v249_v51  ;;  %v237_v57 = vmul.f32 %v4958_v30, %v222_v17 }
 0x1b0   :  { %v6169_v25 = vpop.eup %6168  ;;  %v238_v60 = vmul.f32 %v4958_v30, %v223_v55 }
 0x1b1   :  { %5405 = vmatmul.mubr.bf16.vlgmr.msra.gmra.mrb[0].mxu1 %v256_v56  ;;  %v252_v58 = vadd.f32 %v4959_v38, %v237_v57  ;;  %v224_v59 = vmul.f32 %v6169_v25, %v6698_v41 }
 0x1b2   :  { %v253_v0 = vadd.f32 %v4959_v38, %v238_v60 }
 0x1b3   :  { %v257_v61 = vpack.c.bf16 %v252_v58, %v251_v32  ;;  %v239_v62 = vmul.f32 %v4958_v30, %v224_v59 }
 0x1b5   :  { %462 = vmatmul.mubr.bf16.gmra.mrb[4].mxu0 %v256_v56  ;;  %5408 = vmatprep.mubr.bf16.mxu1 %v257_v61  ;;  %v254_v33 = vadd.f32 %v4959_v38, %v239_v62 }
 0x1b6   :  { %471 = vmatprep.mubr.bf16.mxu0 %v6500_v63 }
 0x1b7   :  { %v258_v1 = vpack.c.bf16 %v254_v33, %v253_v0 }
 0x1b9   :  { %5409 = vmatmul.mubr.bf16.gmra.mrb[4].mxu1 %v258_v1 }
 0x1bd   :  { %472 = vmatmul.mubr.bf16.gmra.mrb[8].mxu0 %v257_v61 }
 0x1be   :  { %481 = vmatprep.mubr.bf16.mxu0 %v6500_v63 }
 0x1c5   :  { %482 = vmatmul.mubr.bf16.gmra.mrb[12].mxu0 %v258_v1 }
 0x280   :  { %v6722_v40 = vpop.f32.mrb[0].mxu0 }
 0x281   :  { %565 = vrot.lane.b32.xlu0 %v6722_v40, %s6501_s2  ;;  %v455_v41 = vpop.f32.mrb[1].mxu0  ;;  %5416 = vmatprep.mubr.msk.f32.mxu1 %vm751_vm0, %v6722_v40 }
 0x282   :  { %v6728_v2 = vpop.f32.mrb[2].mxu0 }
 0x283   :  { %567 = vrot.lane.b32.xlu1 %v6728_v2, %s6501_s2  ;;  %v459_v3 = vpop.f32.mrb[3].mxu0 }
 0x284   :  { %v5660_v5 = vpack.c.bf16 %v459_v3, %v455_v41  ;;  %v5406_v6 = vpop.f32.mrb[0].mxu1  ;;  %v6738_v7 = vpack.i.bf16 %v459_v3, %v455_v41 }
 0x285   :  { %v526_v8 = vpop.f32.mrb[1].mxu1 }
 0x286   :  { %5855 = vrot.lane.b32.xlu0 %v6738_v7, %s6501_s2  ;;  %v5407_v9 = vpop.f32.mrb[2].mxu1  ;;  %5662 = vmatprep.subr.msk.bf16.mxu1 %vm6734_vm1, %v5660_v5 }
 0x287   :  { %v529_v10 = vpop.f32.mrb[3].mxu1  ;;  %5665 = vmatpush3.bf16.xpose.msk.msra.mxu1 %vm6734_vm1, %v5660_v5  ;;  %v6746_v11 = vpack.i.bf16 %v5407_v9, %v5406_v6  ;;  %v6748_v12 = vpack.c.bf16 %v5407_v9, %v5406_v6 }
 0x288   :  { %v6750_v13 = vpop.f32.mrb[4].mxu0  ;;  %v6752_v14 = vpack.i.bf16 %v529_v10, %v526_v8  ;;  %v6754_v15 = vpack.c.bf16 %v529_v10, %v526_v8 }
 0x289   :  { %v465_v18 = vpop.f32.mrb[5].mxu0 }
 0x28a   :  { %5860 = vrot.lane.b32.xlu0 %v6738_v7, %s6490_s1  ;;  %v6758_v19 = vpop.f32.mrb[6].mxu0 }
 0x28b   :  { %571 = vrot.lane.b32.xlu1 %v6758_v19, %s6501_s2  ;;  %v469_v20 = vpop.f32.mrb[7].mxu0 }
 0x28c   :  { %v5666_v21 = vpack.c.bf16 %v469_v20, %v465_v18  ;;  %v5410_v22 = vpop.f32.mrb[4].mxu1  ;;  %v5864_v23 = vpack.i.bf16 %v469_v20, %v465_v18 }
 0x28d   :  { %v542_v26 = vpop.f32.mrb[5].mxu1 }
 0x28e   :  { %569 = vrot.lane.b32.xlu0 %v6750_v13, %s6501_s2  ;;  %v5411_v27 = vpop.f32.mrb[6].mxu1  ;;  %5417 = vmatmul.mubr.msk.f32.vlgmr.msra.gmra.mrb[8].mxu1 %vm751_vm0, %v6728_v2 }
 0x28f   :  { %5668 = vmatprep.subr.msk.bf16.mxu1 %vm6734_vm1, %v5666_v21  ;;  %5865 = vrot.lane.b32.xlu1 %v5864_v23, %s6501_s2  ;;  %v545_v28 = vpop.f32.mrb[7].mxu1  ;;  %v6769_v29 = vpack.i.bf16 %v5411_v27, %v5410_v22  ;;  %v6771_v30 = vpack.c.bf16 %v5411_v27, %v5410_v22 }
 0x290   :  { %5671 = vmatpush3.bf16.xpose.msk.msra.mxu1 %vm6734_vm1, %v5666_v21  ;;  %5423 = vmatprep.mubr.msk.f32.mxu1 %vm751_vm0, %v6750_v13  ;;  %v473_v31 = vpop.f32.mrb[8].mxu0  ;;  %v6777_v34 = vpack.i.bf16 %v545_v28, %v542_v26  ;;  %v6779_v35 = vpack.c.bf16 %v545_v28, %v542_v26 }
 0x291   :  { %v475_v36 = vpop.f32.mrb[9].mxu0  ;;  %5430 = vmatprep.mubr.msk.f32.mxu0 %vm751_vm0, %v473_v31 }
 0x292   :  { %573 = vrot.lane.b32.xlu0 %v473_v31, %s6501_s2  ;;  %v477_v37 = vpop.f32.mrb[10].mxu0 }
 0x293   :  { %5870 = vrot.lane.b32.xlu1 %v5864_v23, %s6490_s1  ;;  %v479_v38 = vpop.f32.mrb[11].mxu0 }
 0x294   :  { %v5672_v16 = vpack.c.bf16 %v479_v38, %v475_v36  ;;  %v5874_v39 = vpack.i.bf16 %v479_v38, %v475_v36 }
 0x296   :  { %5674 = vmatprep.subr.msk.bf16.mxu0 %vm6734_vm1, %v5672_v16 }
 0x297   :  { %5424 = vmatmul.mubr.msk.f32.vlgmr.msra.gmra.mrb[10].mxu1 %vm751_vm0, %v6758_v19  ;;  %575 = vrot.lane.b32.xlu1 %v477_v37, %s6501_s2 }
 0x298   :  { %5677 = vmatpush3.bf16.xpose.msk.msra.mxu0 %vm6734_vm1, %v5672_v16  ;;  %v483_v42 = vpop.f32.mrb[12].mxu0 }
 0x299   :  { %577 = vrot.lane.b32.xlu0 %v483_v42, %s6501_s2  ;;  %v485_v43 = vpop.f32.mrb[13].mxu0  ;;  %5437 = vmatprep.mubr.msk.f32.mxu1 %vm751_vm0, %v483_v42 }
 0x29a   :  { %v487_v44 = vpop.f32.mrb[14].mxu0 }
 0x29b   :  { %5875 = vrot.lane.b32.xlu1 %v5874_v39, %s6501_s2  ;;  %v489_v45 = vpop.f32.mrb[15].mxu0 }
 0x29c   :  { %v5678_v46 = vpack.c.bf16 %v489_v45, %v485_v43  ;;  %v5879_v47 = vpack.i.bf16 %v489_v45, %v485_v43 }
 0x29d   :  { %5885 = vrot.lane.b32.xlu0 %v5874_v39, %s6490_s1 }
 0x29e   :  { %5680 = vmatprep.subr.msk.bf16.mxu1 %vm6734_vm1, %v5678_v46 }
 0x29f   :  { %5431 = vmatmul.mubr.msk.f32.vlgmr.msra.gmra.mrb[16].mxu0 %vm751_vm0, %v477_v37  ;;  %5880 = vrot.lane.b32.xlu1 %v5879_v47, %s6501_s2 }
 0x2a0   :  { %5683 = vmatpush3.bf16.xpose.msk.msra.mxu1 %vm6734_vm1, %v5678_v46 }
 0x2a1   :  { %581 = vrot.lane.b32.xlu0 %v6722_v40, %s6490_s1 }
 0x2a3   :  { %579 = vrot.lane.b32.xlu1 %v487_v44, %s6501_s2 }
 0x2a5   :  { %585 = vrot.lane.b32.xlu0 %v6750_v13, %s6490_s1 }
 0x2a7   :  { %5438 = vmatmul.mubr.msk.f32.vlgmr.msra.gmra.mrb[12].mxu1 %vm751_vm0, %v487_v44  ;;  %583 = vrot.lane.b32.xlu1 %v6728_v2, %s6490_s1 }
 0x2a9   :  { %5890 = vrot.lane.b32.xlu0 %v6738_v7, %s6502_s3 }
 0x2ab   :  { %587 = vrot.lane.b32.xlu1 %v6758_v19, %s6490_s1 }
 0x2ad   :  { %589 = vrot.lane.b32.xlu0 %v473_v31, %s6490_s1 }
 0x2af   :  { %5895 = vrot.lane.b32.xlu1 %v5879_v47, %s6490_s1 }
 0x2b1   :  { %593 = vrot.lane.b32.xlu0 %v483_v42, %s6490_s1 }
 0x2b3   :  { %5900 = vrot.lane.b32.xlu1 %v5864_v23, %s6502_s3 }
 0x2b5   :  { %597 = vrot.lane.b32.xlu0 %v6722_v40, %s6502_s3 }
 0x2b7   :  { %591 = vrot.lane.b32.xlu1 %v477_v37, %s6490_s1 }
 0x2b9   :  { %601 = vrot.lane.b32.xlu0 %v6750_v13, %s6502_s3 }
 0x2bb   :  { %595 = vrot.lane.b32.xlu1 %v487_v44, %s6490_s1 }
 0x2bd   :  { %5905 = vrot.lane.b32.xlu0 %v5874_v39, %s6502_s3 }
 0x2bf   :  { %599 = vrot.lane.b32.xlu1 %v6728_v2, %s6502_s3 }
 0x2c1   :  { %605 = vrot.lane.b32.xlu0 %v473_v31, %s6502_s3 }
 0x2c3   :  { %603 = vrot.lane.b32.xlu1 %v6758_v19, %s6502_s3 }
 0x2c5   :  { %609 = vrot.lane.b32.xlu0 %v483_v42, %s6502_s3 }
 0x2c7   :  { %5910 = vrot.lane.b32.xlu1 %v5879_v47, %s6502_s3 }
 0x2c9   :  { %5915 = vrot.lane.b32.xlu0 %v6752_v14, %s6501_s2 }
 0x2cb   :  { %607 = vrot.lane.b32.xlu1 %v477_v37, %s6502_s3 }
 0x2cd   :  { %5935 = vrot.lane.b32.xlu0 %v6752_v14, %s6490_s1 }
 0x2cf   :  { %611 = vrot.lane.b32.xlu1 %v487_v44, %s6502_s3 }
 0x2d1   :  { %5940 = vrot.lane.b32.xlu0 %v6746_v11, %s6490_s1 }
 0x2d3   :  { %5920 = vrot.lane.b32.xlu1 %v6746_v11, %s6501_s2 }
 0x2d7   :  { %5925 = vrot.lane.b32.xlu1 %v6777_v34, %s6501_s2 }
 0x2db   :  { %5930 = vrot.lane.b32.xlu1 %v6769_v29, %s6501_s2 }
 0x2f3   :  { %v566_v48 = vpop.permute.xlu0 %565 }
 0x2f4   :  { %5444 = vmatprep.mubr.msk.f32.mxu0 %vm751_vm0, %v566_v48 }
 0x2f5   :  { %v568_v24 = vpop.permute.xlu1 %567 }
 0x2f8   :  { %v5856_v49 = vpop.permute.xlu0 %5855 }
 0x2f9   :  { %v5858_v50 = vunpack.i.h.bf16 %v5856_v49  ;;  %v5857_v51 = vunpack.i.l.bf16 %v5856_v49 }
 0x2fb   :  { %v5684_v52 = vpack.c.bf16 %v5858_v50, %v5857_v51 }
 0x2fc   :  { %v5861_v53 = vpop.permute.xlu0 %5860 }
 0x2fd   :  { %v572_v17 = vpop.permute.xlu1 %571  ;;  %5686 = vmatprep.subr.msk.bf16.mxu0 %vm6734_vm1, %v5684_v52  ;;  %v5863_v61 = vunpack.i.h.bf16 %v5861_v53  ;;  %v5862_v62 = vunpack.i.l.bf16 %v5861_v53 }
 0x2fe   :  { %5689 = vmatpush3.bf16.xpose.msk.msra.mxu0 %vm6734_vm1, %v5684_v52 }
 0x2ff   :  { %v5708_v2 = vpack.c.bf16 %v5863_v61, %v5862_v62  ;;  %v6923_v62 = vld [vmem:[#allocation5 + $0x8] sm:$0xff] }
 0x300   :  { %v570_v54 = vpop.permute.xlu0 %569 }
 0x301   :  { %v5866_v55 = vpop.permute.xlu1 %5865  ;;  %5451 = vmatprep.mubr.msk.f32.mxu1 %vm751_vm0, %v570_v54 }
 0x302   :  { %v5868_v56 = vunpack.i.h.bf16 %v5866_v55  ;;  %v5867_v57 = vunpack.i.l.bf16 %v5866_v55 }
 0x304   :  { %v5690_v25 = vpack.c.bf16 %v5868_v56, %v5867_v57  ;;  %v574_v32 = vpop.permute.xlu0 %573 }
 0x305   :  { %v5871_v58 = vpop.permute.xlu1 %5870  ;;  %5445 = vmatmul.mubr.msk.f32.vlgmr.msra.gmra.mrb[18].mxu0 %vm751_vm0, %v568_v24 }
 0x306   :  { %5692 = vmatprep.subr.msk.bf16.mxu1 %vm6734_vm1, %v5690_v25  ;;  %5458 = vmatprep.mubr.msk.f32.mxu0 %vm751_vm0, %v574_v32  ;;  %v5873_v5 = vunpack.i.h.bf16 %v5871_v58  ;;  %v5872_v6 = vunpack.i.l.bf16 %v5871_v58 }
 0x307   :  { %5695 = vmatpush3.bf16.xpose.msk.msra.mxu1 %vm6734_vm1, %v5690_v25 }
 0x308   :  { %v5714_v18 = vpack.c.bf16 %v5873_v5, %v5872_v6 }
 0x309   :  { %v576_v59 = vpop.permute.xlu1 %575 }
 0x30b   :  { %v578_v60 = vpop.permute.xlu0 %577 }
 0x30d   :  { %v5876_v0 = vpop.permute.xlu1 %5875 }
 0x30e   :  { %v5878_v33 = vunpack.i.h.bf16 %v5876_v0  ;;  %v5877_v1 = vunpack.i.l.bf16 %v5876_v0  ;;  %5452 = vmatmul.mubr.msk.f32.vlgmr.msra.gmra.mrb[14].mxu1 %vm751_vm0, %v572_v17  ;;  %v6925_v0 = vld [vmem:[#allocation5] sm:$0xff] }
 0x30f   :  { %5465 = vmatprep.mubr.msk.f32.mxu1 %vm751_vm0, %v578_v60  ;;  %v5886_v40 = vpop.permute.xlu0 %5885 }
 0x310   :  { %v5696_v41 = vpack.c.bf16 %v5878_v33, %v5877_v1  ;;  %v5888_v19 = vunpack.i.h.bf16 %v5886_v40  ;;  %v5887_v20 = vunpack.i.l.bf16 %v5886_v40 }
 0x311   :  { %v5881_v3 = vpop.permute.xlu1 %5880 }
 0x312   :  { %v5883_v7 = vunpack.i.h.bf16 %v5881_v3  ;;  %v5882_v8 = vunpack.i.l.bf16 %v5881_v3  ;;  %5698 = vmatprep.subr.msk.bf16.mxu0 %vm6734_vm1, %v5696_v41  ;;  %v5720_v23 = vpack.c.bf16 %v5888_v19, %v5887_v20 }
 0x313   :  { %v582_v9 = vpop.permute.xlu0 %581  ;;  %5701 = vmatpush3.bf16.xpose.msk.msra.mxu0 %vm6734_vm1, %v5696_v41 }
 0x314   :  { %v5702_v10 = vpack.c.bf16 %v5883_v7, %v5882_v8  ;;  %5710 = vmatprep.subr.msk.bf16.mxu0 %vm6734_vm1, %v5708_v2 }
 0x315   :  { %v580_v13 = vpop.permute.xlu1 %579 }
 0x316   :  { %5704 = vmatprep.subr.msk.bf16.mxu1 %vm6734_vm1, %v5702_v10 }
 0x317   :  { %5707 = vmatpush3.bf16.xpose.msk.msra.mxu1 %vm6734_vm1, %v5702_v10  ;;  %v586_v21 = vpop.permute.xlu0 %585 }
 0x318   :  { %5716 = vmatprep.subr.msk.bf16.mxu1 %vm6734_vm1, %v5714_v18 }
 0x319   :  { %v584_v22 = vpop.permute.xlu1 %583 }
 0x31a   :  { %5459 = vmatmul.mubr.msk.f32.vlgmr.msra.gmra.mrb[20].mxu0 %vm751_vm0, %v576_v59 }
 0x31b   :  { %v5891_v26 = vpop.permute.xlu0 %5890  ;;  %5713 = vmatpush3.bf16.xpose.msk.msra.mxu0 %vm6734_vm1, %v5708_v2  ;;  %5472 = vmatprep.mubr.msk.f32.mxu0 %vm751_vm0, %v582_v9 }
 0x31c   :  { %5722 = vmatprep.subr.msk.bf16.mxu0 %vm6734_vm1, %v5720_v23  ;;  %v5893_v28 = vunpack.i.h.bf16 %v5891_v26  ;;  %v5892_v31 = vunpack.i.l.bf16 %v5891_v26 }
 0x31d   :  { %v588_v27 = vpop.permute.xlu1 %587 }
 0x31e   :  { %5466 = vmatmul.mubr.msk.f32.vlgmr.msra.gmra.mrb[16].mxu1 %vm751_vm0, %v580_v13  ;;  %v5732_v38 = vpack.c.bf16 %v5893_v28, %v5892_v31 }
 0x31f   :  { %5719 = vmatpush3.bf16.xpose.msk.msra.mxu1 %vm6734_vm1, %v5714_v18  ;;  %5479 = vmatprep.mubr.msk.f32.mxu1 %vm751_vm0, %v586_v21  ;;  %v590_v36 = vpop.permute.xlu0 %589 }
 0x321   :  { %v5896_v37 = vpop.permute.xlu1 %5895 }
 0x322   :  { %v5898_v16 = vunpack.i.h.bf16 %v5896_v37  ;;  %v5897_v39 = vunpack.i.l.bf16 %v5896_v37  ;;  %5473 = vmatmul.mubr.msk.f32.vlgmr.msra.gmra.mrb[22].mxu0 %vm751_vm0, %v584_v22 }
 0x323   :  { %v594_v42 = vpop.permute.xlu0 %593  ;;  %5725 = vmatpush3.bf16.xpose.msk.msra.mxu0 %vm6734_vm1, %v5720_v23  ;;  %5486 = vmatprep.mubr.msk.f32.mxu0 %vm751_vm0, %v590_v36 }
 0x324   :  { %v5726_v43 = vpack.c.bf16 %v5898_v16, %v5897_v39  ;;  %5734 = vmatprep.subr.msk.bf16.mxu0 %vm6734_vm1, %v5732_v38 }
 0x325   :  { %v5901_v44 = vpop.permute.xlu1 %5900 }
 0x326   :  { %v5903_v45 = vunpack.i.h.bf16 %v5901_v44  ;;  %v5902_v46 = vunpack.i.l.bf16 %v5901_v44  ;;  %5480 = vmatmul.mubr.msk.f32.vlgmr.msra.gmra.mrb[18].mxu1 %vm751_vm0, %v588_v27  ;;  %5728 = vmatprep.subr.msk.bf16.mxu1 %vm6734_vm1, %v5726_v43 }
 0x327   :  { %5731 = vmatpush3.bf16.xpose.msk.msra.mxu1 %vm6734_vm1, %v5726_v43  ;;  %5493 = vmatprep.mubr.msk.f32.mxu1 %vm751_vm0, %v594_v42  ;;  %v598_v47 = vpop.permute.xlu0 %597 }
 0x328   :  { %v5738_v48 = vpack.c.bf16 %v5903_v45, %v5902_v46 }
 0x329   :  { %v592_v49 = vpop.permute.xlu1 %591 }
 0x32a   :  { %5487 = vmatmul.mubr.msk.f32.vlgmr.msra.gmra.mrb[24].mxu0 %vm751_vm0, %v592_v49  ;;  %5740 = vmatprep.subr.msk.bf16.mxu1 %vm6734_vm1, %v5738_v48 }
 0x32b   :  { %v602_v24 = vpop.permute.xlu0 %601  ;;  %5737 = vmatpush3.bf16.xpose.msk.msra.mxu0 %vm6734_vm1, %v5732_v38  ;;  %5500 = vmatprep.mubr.msk.f32.mxu0 %vm751_vm0, %v598_v47 }
 0x32d   :  { %v596_v50 = vpop.permute.xlu1 %595 }
 0x32e   :  { %5494 = vmatmul.mubr.msk.f32.vlgmr.msra.gmra.mrb[20].mxu1 %vm751_vm0, %v596_v50 }
 0x32f   :  { %5743 = vmatpush3.bf16.xpose.msk.msra.mxu1 %vm6734_vm1, %v5738_v48  ;;  %5507 = vmatprep.mubr.msk.f32.mxu1 %vm751_vm0, %v602_v24  ;;  %v5906_v51 = vpop.permute.xlu0 %5905 }
 0x330   :  { %v5908_v52 = vunpack.i.h.bf16 %v5906_v51  ;;  %v5907_v53 = vunpack.i.l.bf16 %v5906_v51 }
 0x331   :  { %v600_v17 = vpop.permute.xlu1 %599 }
 0x332   :  { %v5744_v54 = vpack.c.bf16 %v5908_v52, %v5907_v53  ;;  %5501 = vmatmul.mubr.msk.f32.vlgmr.msra.gmra.mrb[26].mxu0 %vm751_vm0, %v600_v17 }
 0x333   :  { %v606_v55 = vpop.permute.xlu0 %605 }
 0x334   :  { %5746 = vmatprep.subr.msk.bf16.mxu0 %vm6734_vm1, %v5744_v54  ;;  %5514 = vmatprep.mubr.msk.f32.mxu0 %vm751_vm0, %v606_v55 }
 0x335   :  { %v604_v56 = vpop.permute.xlu1 %603  ;;  %5749 = vmatpush3.bf16.xpose.msk.msra.mxu0 %vm6734_vm1, %v5744_v54 }
 0x336   :  { %5508 = vmatmul.mubr.msk.f32.vlgmr.msra.gmra.mrb[22].mxu1 %vm751_vm0, %v604_v56  ;;  %5757 = vmatprep.subr.bf16.mxu0 %v6754_v15 }
 0x337   :  { %v610_v57 = vpop.permute.xlu0 %609 }
 0x338   :  { %5521 = vmatprep.mubr.msk.f32.mxu1 %vm751_vm0, %v610_v57 }
 0x339   :  { %v5911_v25 = vpop.permute.xlu1 %5910 }
 0x33a   :  { %v5913_v32 = vunpack.i.h.bf16 %v5911_v25  ;;  %v5912_v58 = vunpack.i.l.bf16 %v5911_v25 }
 0x33b   :  { %v6982_v45 = vpop.permute.xlu0 %5915 }
 0x33c   :  { %v5750_v59 = vpack.c.bf16 %v5913_v32, %v5912_v58 }
 0x33d   :  { %v608_v60 = vpop.permute.xlu1 %607 }
 0x33e   :  { %5515 = vmatmul.mubr.msk.f32.vlgmr.msra.gmra.mrb[28].mxu0 %vm751_vm0, %v608_v60  ;;  %5752 = vmatprep.subr.msk.bf16.mxu1 %vm6734_vm1, %v5750_v59 }
 0x33f   :  { %5759 = vmatpush3.bf16.msra.mxu0 %v6754_v15  ;;  %5755 = vmatpush3.bf16.xpose.msk.msra.mxu1 %vm6734_vm1, %v5750_v59  ;;  %v6993_v24 = vpop.permute.xlu0 %5935 }
 0x340   :  { %5765 = vmatprep.subr.bf16.mxu0 %v6779_v35  ;;  %5761 = vmatprep.subr.bf16.mxu1 %v6748_v12 }
 0x341   :  { %v612_v61 = vpop.permute.xlu1 %611 }
 0x343   :  { %v7000_v17 = vpop.permute.xlu0 %5940 }
 0x345   :  { %v6977_v42 = vpop.permute.xlu1 %5920 }
 0x346   :  { %5522 = vmatmul.mubr.msk.f32.vlgmr.msra.gmra.mrb[24].mxu1 %vm751_vm0, %v612_v61 }
 0x347   :  { %5763 = vmatpush3.bf16.msra.mxu1 %v6748_v12 }
 0x348   :  { %5769 = vmatprep.subr.bf16.mxu1 %v6771_v30 }
 0x349   :  { %v6991_v49 = vpop.permute.xlu1 %5925 }
 0x34d   :  { %v6995_v51 = vpop.permute.xlu1 %5930 }
 0x361   :  { %v5418_v33 = vpop.f32.mrb[8].mxu1 }
 0x362   :  { %v6928_v4 = vadd.f32 %v5418_v33, %v6923_v62  ;;  %v826_v15 = vpop.f32.mrb[9].mxu1 }
 0x363   :  { %v6931_v1 = vadd.f32 %v826_v15, %v6925_v0 }
 0x364   :  { %v2084_v40 = vsel %vm2080_vm2, %v6928_v4, -inf }
 0x365   :  { %2085 = vmax.xlane.f32.xlu1 %v2084_v40  ;;  %v2081_v12 = vsel %vm2080_vm2, %v6931_v1, -inf }
 0x366   :  { %2082 = vmax.xlane.f32.xlu0 %v2081_v12 }
 0x36a   :  { %v5425_v41 = vpop.f32.mrb[10].mxu1 }
 0x36b   :  { %v6938_v2 = vadd.f32 %v5425_v41, %v6923_v62  ;;  %v909_v3 = vpop.f32.mrb[11].mxu1 }
 0x36c   :  { %v6941_v5 = vadd.f32 %v909_v3, %v6925_v0 }
 0x36d   :  { %v2090_v6 = vsel %vm2080_vm2, %v6938_v2, -inf }
 0x36e   :  { %2091 = vmax.xlane.f32.xlu0 %v2090_v6  ;;  %v2087_v7 = vsel %vm2080_vm2, %v6941_v5, -inf }
 0x372   :  { %2088 = vmax.xlane.f32.xlu0 %v2087_v7  ;;  %v5432_v8 = vpop.f32.mrb[16].mxu0 }
 0x373   :  { %v6948_v9 = vadd.f32 %v5432_v8, %v6923_v62  ;;  %v992_v10 = vpop.f32.mrb[17].mxu0 }
 0x374   :  { %v6951_v13 = vadd.f32 %v992_v10, %v6925_v0 }
 0x375   :  { %v2096_v18 = vsel %vm2080_vm2, %v6948_v9, -inf }
 0x376   :  { %2097 = vmax.xlane.f32.xlu1 %v2096_v18  ;;  %v2093_v19 = vsel %vm2080_vm2, %v6951_v13, -inf }
 0x377   :  { %2094 = vmax.xlane.f32.xlu0 %v2093_v19 }
 0x37a   :  { %v5439_v20 = vpop.f32.mrb[12].mxu1 }
 0x37b   :  { %v6958_v21 = vadd.f32 %v5439_v20, %v6923_v62  ;;  %v1075_v22 = vpop.f32.mrb[13].mxu1 }
 0x37c   :  { %v6961_v23 = vadd.f32 %v1075_v22, %v6925_v0 }
 0x37d   :  { %v2102_v26 = vsel %vm2080_vm2, %v6958_v21, -inf }
 0x37e   :  { %2103 = vmax.xlane.f32.xlu1 %v2102_v26  ;;  %v2099_v27 = vsel %vm2080_vm2, %v6961_v23, -inf }
 0x37f   :  { %2100 = vmax.xlane.f32.xlu0 %v2099_v27 }
 0x3d8   :  { %v5446_v28 = vpop.f32.mrb[18].mxu0 }
 0x3d9   :  { %v6968_v31 = vadd.f32 %v5446_v28, %v6923_v62  ;;  %v1158_v36 = vpop.f32.mrb[19].mxu0 }
 0x3da   :  { %v6971_v37 = vadd.f32 %v1158_v36, %v6925_v0 }
 0x3db   :  { %v2108_v38 = vsel %vm2080_vm2, %v6968_v31, -inf }
 0x3dc   :  { %2109 = vmax.xlane.f32.xlu1 %v2108_v38  ;;  %v2105_v16 = vsel %vm2080_vm2, %v6971_v37, -inf }
 0x3dd   :  { %2106 = vmax.xlane.f32.xlu0 %v2105_v16 }
 0x3e1   :  { %v5453_v39 = vpop.f32.mrb[14].mxu1 }
 0x3e2   :  { %v6980_v43 = vadd.f32 %v5453_v39, %v6923_v62  ;;  %v1241_v44 = vpop.f32.mrb[15].mxu1 }
 0x3e3   :  { %v6985_v46 = vadd.f32 %v1241_v44, %v6925_v0 }
 0x3e4   :  { %v2114_v47 = vsel %vm2080_vm2, %v6980_v43, -inf }
 0x3e5   :  { %2115 = vmax.xlane.f32.xlu1 %v2114_v47  ;;  %v2111_v48 = vsel %vm2080_vm2, %v6985_v46, -inf  ;;  %v5918_v47 = vunpack.i.h.bf16 %v6982_v45 }
 0x3e6   :  { %2112 = vmax.xlane.f32.xlu0 %v2111_v48  ;;  %v5917_v48 = vunpack.i.l.bf16 %v6982_v45 }
 0x3ed   :  { %v5460_v50 = vpop.f32.mrb[20].mxu0 }
 0x3ee   :  { %v6998_v52 = vadd.f32 %v5460_v50, %v6923_v62  ;;  %v1324_v53 = vpop.f32.mrb[21].mxu0 }
 0x3ef   :  { %v7003_v54 = vadd.f32 %v1324_v53, %v6925_v0 }
 0x3f0   :  { %v2120_v55 = vsel %vm2080_vm2, %v6998_v52, -inf }
 0x3f1   :  { %v5467_v56 = vpop.f32.mrb[16].mxu1  ;;  %2121 = vmax.xlane.f32.xlu1 %v2120_v55  ;;  %v2117_v57 = vsel %vm2080_vm2, %v7003_v54, -inf }
 0x3f2   :  { %v7010_v25 = vadd.f32 %v5467_v56, %v6923_v62  ;;  %v2086_v32 = vpop.xlane.xlu1 %2085  ;;  %v1407_v58 = vpop.f32.mrb[17].mxu1  ;;  %2118 = vmax.xlane.f32.xlu0 %v2117_v57 }
 0x3f3   :  { %v2178_v59 = vsub.f32 %v6928_v4, %v2086_v32  ;;  %v7014_v60 = vadd.f32 %v1407_v58, %v6925_v0  ;;  %v2083_v61 = vpop.xlane.xlu0 %2082 }
 0x3f4   :  { %v2177_v33 = vsub.f32 %v6931_v1, %v2083_v61  ;;  %v2126_v15 = vsel %vm2080_vm2, %v7010_v25, -inf }
 0x3f5   :  { %v2211_v40 = vmul.f32 1.442695, %v2178_v59  ;;  %2127 = vmax.xlane.f32.xlu1 %v2126_v15  ;;  %v5474_v12 = vpop.f32.mrb[22].mxu0  ;;  %v2123_v41 = vsel %vm2080_vm2, %v7014_v60, -inf }
 0x3f6   :  { %v2209_v3 = vmul.f32 1.442695, %v2177_v33  ;;  %v7022_v6 = vadd.f32 %v5474_v12, %v6923_v62  ;;  %v1490_v4 = vpop.f32.mrb[23].mxu0  ;;  %2124 = vmax.xlane.f32.xlu0 %v2123_v41 }
 0x3f7   :  { %v7025_v7 = vadd.f32 %v1490_v4, %v6925_v0 }
 0x3f8   :  { %6170 = vpow2.f32 %v2209_v3  ;;  %v2132_v1 = vsel %vm2080_vm2, %v7022_v6, -inf }
 0x3f9   :  { %6172 = vpow2.f32 %v2211_v40  ;;  %v5481_v8 = vpop.f32.mrb[18].mxu1  ;;  %2133 = vmax.xlane.f32.xlu1 %v2132_v1  ;;  %v2129_v10 = vsel %vm2080_vm2, %v7025_v7, -inf  ;;  %v5772_v40 = vpack.c.bf16 %v5918_v47, %v5917_v48 }
 0x3fa   :  { %v7032_v18 = vadd.f32 %v5481_v8, %v6923_v62  ;;  %v1573_v19 = vpop.f32.mrb[19].mxu1  ;;  %2130 = vmax.xlane.f32.xlu0 %v2129_v10 }
 0x3fb   :  { %v7035_v20 = vadd.f32 %v1573_v19, %v6925_v0  ;;  %v2092_v22 = vpop.xlane.xlu0 %2091 }
 0x3fc   :  { %v2138_v26 = vsel %vm2080_vm2, %v7032_v18, -inf  ;;  %v2180_v27 = vsub.f32 %v6938_v2, %v2092_v22 }
 0x3fd   :  { %2139 = vmax.xlane.f32.xlu1 %v2138_v26  ;;  %v5488_v28 = vpop.f32.mrb[24].mxu0  ;;  %v2135_v36 = vsel %vm2080_vm2, %v7035_v20, -inf }
 0x3fe   :  { %v7043_v38 = vadd.f32 %v5488_v28, %v6923_v62  ;;  %v1656_v16 = vpop.f32.mrb[25].mxu0  ;;  %2136 = vmax.xlane.f32.xlu0 %v2135_v36  ;;  %v2215_v53 = vmul.f32 1.442695, %v2180_v27  ;;  %v5923_v36 = vunpack.i.h.bf16 %v6977_v42 }
 0x3ff   :  { %v2089_v39 = vpop.xlane.xlu0 %2088  ;;  %v7046_v44 = vadd.f32 %v1656_v16, %v6925_v0  ;;  %v5922_v16 = vunpack.i.l.bf16 %v6977_v42  ;;  %v5928_v42 = vunpack.i.h.bf16 %v6991_v49 }
 0x400   :  { %v2179_v2 = vsub.f32 %v6941_v5, %v2089_v39  ;;  %v2144_v50 = vsel %vm2080_vm2, %v7043_v38, -inf }
 0x401   :  { %v5495_v55 = vpop.f32.mrb[20].mxu1  ;;  %2145 = vmax.xlane.f32.xlu1 %v2144_v50  ;;  %v2141_v56 = vsel %vm2080_vm2, %v7046_v44, -inf }
 0x402   :  { %v7055_v57 = vpop.eup %6170  ;;  %v2213_v32 = vmul.f32 1.442695, %v2179_v2  ;;  %v7058_v58 = vadd.f32 %v5495_v55, %v6923_v62  ;;  %v1739_v59 = vpop.f32.mrb[21].mxu1  ;;  %2142 = vmax.xlane.f32.xlu0 %v2141_v56 }
 0x403   :  { %v7060_v45 = vpop.eup %6172  ;;  %v2098_v5 = vpop.xlane.xlu1 %2097  ;;  %v7063_v61 = vadd.f32 %v1739_v59, %v6925_v0  ;;  %5528 = vmatprep.mubr.msk.f32.mxu0 %vm2080_vm2, %v7055_v57 }
 0x404   :  { %6174 = vpow2.f32 %v2213_v32  ;;  %v2182_v33 = vsub.f32 %v6948_v9, %v2098_v5  ;;  %v2095_v15 = vpop.xlane.xlu0 %2094  ;;  %5529 = vmatmul.mubr.msk.f32.vlgmr.msra.gmra.mrb[30].mxu0 %vm2080_vm2, %v7060_v45  ;;  %v2150_v12 = vsel %vm2080_vm2, %v7058_v58, -inf  ;;  %v5927_v32 = vunpack.i.l.bf16 %v6991_v49 }
 0x405   :  { %6176 = vpow2.f32 %v2215_v53  ;;  %v2181_v41 = vsub.f32 %v6951_v13, %v2095_v15  ;;  %5767 = vmatpush3.bf16.msra.mxu0 %v6779_v35  ;;  %2151 = vmax.xlane.f32.xlu1 %v2150_v12  ;;  %v5502_v3 = vpop.f32.mrb[26].mxu0  ;;  %v2147_v4 = vsel %vm2080_vm2, %v7063_v61, -inf }
 0x406   :  { %v2219_v1 = vmul.f32 1.442695, %v2182_v33  ;;  %5773 = vmatprep.subr.bf16.mxu0 %v5772_v40  ;;  %v7077_v9 = vadd.f32 %v5502_v3, %v6923_v62  ;;  %v1822_v8 = vpop.f32.mrb[27].mxu0  ;;  %2148 = vmax.xlane.f32.xlu0 %v2147_v4  ;;  %v5780_v49 = vpack.c.bf16 %v5928_v42, %v5927_v32  ;;  %v5933_v3 = vunpack.i.h.bf16 %v6995_v51 }
 0x407   :  { %v2217_v10 = vmul.f32 1.442695, %v2181_v41  ;;  %v7080_v19 = vadd.f32 %v1822_v8, %v6925_v0  ;;  %v5932_v4 = vunpack.i.l.bf16 %v6995_v51 }
 0x408   :  { %v2156_v13 = vsel %vm2080_vm2, %v7077_v9, -inf }
 0x409   :  { %6178 = vpow2.f32 %v2217_v10  ;;  %v5509_v35 = vpop.f32.mrb[22].mxu1  ;;  %2157 = vmax.xlane.f32.xlu1 %v2156_v13  ;;  %v2153_v22 = vsel %vm2080_vm2, %v7080_v19, -inf }
 0x40a   :  { %6180 = vpow2.f32 %v2219_v1  ;;  %v7087_v26 = vadd.f32 %v5509_v35, %v6923_v62  ;;  %v1905_v27 = vpop.f32.mrb[23].mxu1  ;;  %2154 = vmax.xlane.f32.xlu0 %v2153_v22  ;;  %v7132_v35 = vpack.c.bf16 %v5933_v3, %v5932_v4 }
 0x40b   :  { %v2104_v28 = vpop.xlane.xlu1 %2103  ;;  %v7114_v12 = vadd.f32 %v1905_v27, %v6925_v0 }
 0x40c   :  { %v2184_v39 = vsub.f32 %v6958_v21, %v2104_v28  ;;  %v2101_v47 = vpop.xlane.xlu0 %2100  ;;  %v2162_v48 = vsel %vm2080_vm2, %v7087_v26, -inf  ;;  %v5776_v21 = vpack.c.bf16 %v5923_v36, %v5922_v16 }
 0x40d   :  { %v2183_v2 = vsub.f32 %v6961_v23, %v2101_v47  ;;  %2163 = vmax.xlane.f32.xlu1 %v2162_v48  ;;  %v2159_v41 = vsel %vm2080_vm2, %v7114_v12, -inf }
 0x40e   :  { %v7095_v50 = vpop.eup %6174  ;;  %v2223_v53 = vmul.f32 1.442695, %v2184_v39 }
 0x40f   :  { %v7097_v55 = vpop.eup %6176  ;;  %v2221_v56 = vmul.f32 1.442695, %v2183_v2  ;;  %5535 = vmatprep.mubr.msk.f32.mxu1 %vm2080_vm2, %v7095_v50 }
 0x410   :  { %5536 = vmatmul.mubr.msk.f32.vlgmr.msra.gmra.mrb[26].mxu1 %vm2080_vm2, %v7097_v55 }
 0x411   :  { %6182 = vpow2.f32 %v2221_v56  ;;  %5771 = vmatpush3.bf16.msra.mxu1 %v6771_v30  ;;  %v5516_v23 = vpop.f32.mrb[28].mxu0 }
 0x412   :  { %6184 = vpow2.f32 %v2223_v53  ;;  %5777 = vmatprep.subr.bf16.mxu1 %v5776_v21  ;;  %v7107_v59 = vadd.f32 %v5516_v23, %v6923_v62  ;;  %v1988_v5 = vpop.f32.mrb[29].mxu0 }
 0x413   :  { %v7109_v33 = vpop.eup %6178  ;;  %v7146_v51 = vadd.f32 %v1988_v5, %v6925_v0  ;;  %v5943_v5 = vunpack.i.h.bf16 %v7000_v17 }
 0x414   :  { %v7111_v15 = vpop.eup %6180  ;;  %5542 = vmatprep.mubr.msk.f32.mxu0 %vm2080_vm2, %v7109_v33  ;;  %v2168_v30 = vsel %vm2080_vm2, %v7107_v59, -inf }
 0x415   :  { %5543 = vmatmul.mubr.msk.f32.vlgmr.msra.gmra.mrb[32].mxu0 %vm2080_vm2, %v7111_v15  ;;  %2169 = vmax.xlane.f32.xlu0 %v2168_v30  ;;  %v2165_v27 = vsel %vm2080_vm2, %v7146_v51, -inf }
 0x416   :  { %5775 = vmatpush3.bf16.msra.mxu0 %v5772_v40 }
 0x417   :  { %5781 = vmatprep.subr.bf16.mxu0 %v5780_v49 }
 0x419   :  { %v5523_v1 = vpop.f32.mrb[24].mxu1  ;;  %2160 = vmax.xlane.f32.xlu0 %v2159_v41 }
 0x41a   :  { %v2071_v8 = vpop.f32.mrb[25].mxu1  ;;  %v7149_v40 = vadd.f32 %v5523_v1, %v6923_v62 }
 0x41b   :  { %v7126_v10 = vpop.eup %6182  ;;  %v7152_v22 = vadd.f32 %v2071_v8, %v6925_v0 }
 0x41c   :  { %v7128_v13 = vpop.eup %6184  ;;  %5549 = vmatprep.mubr.msk.f32.mxu1 %vm2080_vm2, %v7126_v10 }
 0x41d   :  { %5550 = vmatmul.mubr.msk.f32.vlgmr.msra.gmra.mrb[28].mxu1 %vm2080_vm2, %v7128_v13 }
 0x41e   :  { %5779 = vmatpush3.bf16.msra.mxu1 %v5776_v21  ;;  %5950 = vrot.lane.b32.xlu1 %v6769_v29, %s6490_s1  ;;  %v5937_v21 = vunpack.i.l.bf16 %v6993_v24 }
 0x41f   :  { %5785 = vmatprep.subr.bf16.mxu1 %v7132_v35 }
 0x422   :  { %5955 = vrot.lane.b32.xlu1 %v6752_v14, %s6502_s3  ;;  %v2174_v14 = vsel %vm2080_vm2, %v7149_v40, -inf }
 0x426   :  { %5960 = vrot.lane.b32.xlu1 %v6746_v11, %s6502_s3  ;;  %v2171_v11 = vsel %vm2080_vm2, %v7152_v22, -inf }
 0x42f   :  { %5945 = vrot.lane.b32.xlu0 %v6777_v34, %s6490_s1 }
 0x44a   :  { %2166 = vmax.xlane.f32.xlu1 %v2165_v27 }
 0x44e   :  { %2175 = vmax.xlane.f32.xlu1 %v2174_v14  ;;  %2172 = vmax.xlane.f32.xlu0 %v2171_v11 }
 0x45f   :  { %5970 = vrot.lane.b32.xlu1 %v6769_v29, %s6502_s3 }
 0x464   :  { %5965 = vrot.lane.b32.xlu0 %v6777_v34, %s6502_s3  ;;  %v5938_v34 = vunpack.i.h.bf16 %v6993_v24  ;;  %v5942_v24 = vunpack.i.l.bf16 %v7000_v17 }
 0x466   :  { %v5788_v42 = vpack.c.bf16 %v5938_v34, %v5937_v21  ;;  %v5792_v14 = vpack.c.bf16 %v5943_v5, %v5942_v24 }
 0x469   :  { %v2110_v62 = vpop.xlane.xlu1 %2109 }
 0x46a   :  { %v2186_v0 = vsub.f32 %v6968_v31, %v2110_v62  ;;  %v2107_v28 = vpop.xlane.xlu0 %2106 }
 0x46b   :  { %v2185_v36 = vsub.f32 %v6971_v37, %v2107_v28 }
 0x46c   :  { %v2227_v16 = vmul.f32 1.442695, %v2186_v0 }
 0x46d   :  { %v2225_v39 = vmul.f32 1.442695, %v2185_v36 }
 0x46f   :  { %6186 = vpow2.f32 %v2225_v39 }
 0x470   :  { %6188 = vpow2.f32 %v2227_v16 }
 0x472   :  { %v2116_v47 = vpop.xlane.xlu1 %2115 }
 0x473   :  { %v2188_v48 = vsub.f32 %v6980_v43, %v2116_v47  ;;  %v2113_v2 = vpop.xlane.xlu0 %2112 }
 0x474   :  { %v2187_v53 = vsub.f32 %v6985_v46, %v2113_v2 }
 0x475   :  { %v2231_v29 = vmul.f32 1.442695, %v2188_v48 }
 0x476   :  { %v2229_v56 = vmul.f32 1.442695, %v2187_v53 }
 0x478   :  { %6190 = vpow2.f32 %v2229_v56 }
 0x479   :  { %v6187_v31 = vpop.eup %6186  ;;  %6192 = vpow2.f32 %v2231_v29 }
 0x47a   :  { %v6189_v37 = vpop.eup %6188  ;;  %5556 = vmatprep.mubr.msk.f32.mxu0 %vm2080_vm2, %v6187_v31  ;;  %v2297_v8 = vsel %vm2080_vm2, %v6187_v31, 0.0 }
 0x47b   :  { %5557 = vmatmul.mubr.msk.f32.vlgmr.msra.gmra.mrb[34].mxu0 %vm2080_vm2, %v6189_v37  ;;  %v2300_v1 = vsel %vm2080_vm2, %v6189_v37, 0.0 }
 0x47c   :  { %5783 = vmatpush3.bf16.msra.mxu0 %v5780_v49 }
 0x47d   :  { %5789 = vmatprep.subr.bf16.mxu0 %v5788_v42 }
 0x47e   :  { %v2122_v43 = vpop.xlane.xlu1 %2121 }
 0x47f   :  { %v2190_v46 = vsub.f32 %v6998_v52, %v2122_v43  ;;  %v2119_v32 = vpop.xlane.xlu0 %2118 }
 0x480   :  { %v2189_v23 = vsub.f32 %v7003_v54, %v2119_v32 }
 0x481   :  { %v2235_v30 = vmul.f32 1.442695, %v2190_v46 }
 0x482   :  { %v6191_v41 = vpop.eup %6190  ;;  %v2233_v3 = vmul.f32 1.442695, %v2189_v23  ;;  %v2128_v4 = vpop.xlane.xlu1 %2127 }
 0x483   :  { %v6193_v49 = vpop.eup %6192  ;;  %6194 = vpow2.f32 %v2235_v30  ;;  %v2192_v27 = vsub.f32 %v7010_v25, %v2128_v4  ;;  %2301 = vadd.xlane.f32.xlu1 %v2300_v1  ;;  %2298 = vadd.xlane.f32.xlu0 %v2297_v8  ;;  %v2125_v52 = vpop.xlane.xlu0 %2124  ;;  %v2303_v47 = vsel %vm2080_vm2, %v6191_v41, 0.0 }
 0x484   :  { %6196 = vpow2.f32 %v2233_v3  ;;  %5563 = vmatprep.mubr.msk.f32.mxu1 %vm2080_vm2, %v6191_v41  ;;  %v2191_v17 = vsub.f32 %v7014_v60, %v2125_v52  ;;  %v2306_v0 = vsel %vm2080_vm2, %v6193_v49, 0.0 }
 0x485   :  { %v2239_v54 = vmul.f32 1.442695, %v2192_v27  ;;  %5564 = vmatmul.mubr.msk.f32.vlgmr.msra.gmra.mrb[30].mxu1 %vm2080_vm2, %v6193_v49 }
 0x486   :  { %v2237_v11 = vmul.f32 1.442695, %v2191_v17  ;;  %5787 = vmatpush3.bf16.msra.mxu1 %v7132_v35  ;;  %v2134_v62 = vpop.xlane.xlu1 %2133 }
 0x487   :  { %5793 = vmatprep.subr.bf16.mxu1 %v5792_v14  ;;  %v2194_v25 = vsub.f32 %v7022_v6, %v2134_v62  ;;  %2307 = vadd.xlane.f32.xlu0 %v2306_v0  ;;  %v2131_v28 = vpop.xlane.xlu0 %2130 }
 0x488   :  { %6198 = vpow2.f32 %v2237_v11  ;;  %v2193_v36 = vsub.f32 %v7025_v7, %v2131_v28 }
 0x489   :  { %6200 = vpow2.f32 %v2239_v54  ;;  %v2243_v60 = vmul.f32 1.442695, %v2194_v25 }
 0x48a   :  { %v2241_v16 = vmul.f32 1.442695, %v2193_v36  ;;  %v2140_v39 = vpop.xlane.xlu1 %2139 }
 0x48b   :  { %6202 = vpow2.f32 %v2243_v60  ;;  %v2196_v35 = vsub.f32 %v7032_v18, %v2140_v39  ;;  %2304 = vadd.xlane.f32.xlu0 %v2303_v47  ;;  %v2137_v48 = vpop.xlane.xlu0 %2136 }
 0x48c   :  { %6204 = vpow2.f32 %v2241_v16  ;;  %v2195_v2 = vsub.f32 %v7035_v20, %v2137_v48 }
 0x48d   :  { %v6195_v6 = vpop.eup %6194  ;;  %v2247_v53 = vmul.f32 1.442695, %v2196_v35 }
 0x48e   :  { %v6197_v29 = vpop.eup %6196  ;;  %v2245_v56 = vmul.f32 1.442695, %v2195_v2  ;;  %v2146_v34 = vpop.xlane.xlu1 %2145  ;;  %v2312_v7 = vsel %vm2080_vm2, %v6195_v6, 0.0 }
 0x48f   :  { %2313 = vadd.xlane.f32.xlu1 %v2312_v7  ;;  %5570 = vmatprep.mubr.msk.f32.mxu0 %vm2080_vm2, %v6197_v29  ;;  %v2143_v21 = vpop.xlane.xlu0 %2142  ;;  %v2309_v31 = vsel %vm2080_vm2, %v6197_v29, 0.0  ;;  %v2198_v8 = vsub.f32 %v7043_v38, %v2146_v34 }
 0x490   :  { %6206 = vpow2.f32 %v2245_v56  ;;  %v2197_v18 = vsub.f32 %v7046_v44, %v2143_v21  ;;  %5571 = vmatmul.mubr.msk.f32.vlgmr.msra.gmra.mrb[36].mxu0 %vm2080_vm2, %v6195_v6  ;;  %2310 = vadd.xlane.f32.xlu0 %v2309_v31 }
 0x491   :  { %6208 = vpow2.f32 %v2247_v53  ;;  %5791 = vmatpush3.bf16.msra.mxu0 %v5788_v42  ;;  %v2251_v38 = vmul.f32 1.442695, %v2198_v8 }
 0x492   :  { %v6199_v20 = vpop.eup %6198  ;;  %v2249_v37 = vmul.f32 1.442695, %v2197_v18  ;;  %v2152_v43 = vpop.xlane.xlu1 %2151 }
 0x493   :  { %v6201_v46 = vpop.eup %6200  ;;  %v2200_v32 = vsub.f32 %v7058_v58, %v2152_v43  ;;  %5577 = vmatprep.mubr.msk.f32.mxu1 %vm2080_vm2, %v6199_v20  ;;  %v2149_v23 = vpop.xlane.xlu0 %2148 }
 0x494   :  { %6210 = vpow2.f32 %v2249_v37  ;;  %v2199_v5 = vsub.f32 %v7063_v61, %v2149_v23  ;;  %5578 = vmatmul.mubr.msk.f32.vlgmr.msra.gmra.mrb[32].mxu1 %vm2080_vm2, %v6201_v46 }
 0x495   :  { %v6203_v44 = vpop.eup %6202  ;;  %5795 = vmatpush3.bf16.msra.mxu1 %v5792_v14  ;;  %v2255_v30 = vmul.f32 1.442695, %v2200_v32 }
 0x496   :  { %v6205_v24 = vpop.eup %6204  ;;  %v2253_v41 = vmul.f32 1.442695, %v2199_v5  ;;  %v2158_v42 = vpop.xlane.xlu1 %2157  ;;  %v2324_v3 = vsel %vm2080_vm2, %v6203_v44, 0.0 }
 0x497   :  { %v2202_v4 = vsub.f32 %v7077_v9, %v2158_v42  ;;  %2325 = vadd.xlane.f32.xlu1 %v2324_v3  ;;  %5584 = vmatprep.mubr.msk.f32.mxu0 %vm2080_vm2, %v6205_v24  ;;  %v2155_v58 = vpop.xlane.xlu0 %2154  ;;  %v2321_v1 = vsel %vm2080_vm2, %v6205_v24, 0.0  ;;  %v2318_v9 = vsel %vm2080_vm2, %v6201_v46, 0.0 }
 0x498   :  { %6212 = vpow2.f32 %v2253_v41  ;;  %v2201_v61 = vsub.f32 %v7080_v19, %v2155_v58  ;;  %5585 = vmatmul.mubr.msk.f32.vlgmr.msra.gmra.mrb[38].mxu0 %vm2080_vm2, %v6203_v44  ;;  %2322 = vadd.xlane.f32.xlu0 %v2321_v1  ;;  %v2315_v19 = vsel %vm2080_vm2, %v6199_v20, 0.0 }
 0x499   :  { %v2259_v49 = vmul.f32 1.442695, %v2202_v4  ;;  %6214 = vpow2.f32 %v2255_v30 }
 0x49a   :  { %v6207_v27 = vpop.eup %6206  ;;  %v2257_v52 = vmul.f32 1.442695, %v2201_v61  ;;  %v2164_v17 = vpop.xlane.xlu1 %2163 }
 0x49b   :  { %v6209_v54 = vpop.eup %6208  ;;  %6216 = vpow2.f32 %v2259_v49  ;;  %v2204_v14 = vsub.f32 %v7087_v26, %v2164_v17  ;;  %2319 = vadd.xlane.f32.xlu1 %v2318_v9  ;;  %5591 = vmatprep.mubr.msk.f32.mxu1 %vm2080_vm2, %v6207_v27  ;;  %v2327_v26 = vsel %vm2080_vm2, %v6207_v27, 0.0 }
 0x49c   :  { %6218 = vpow2.f32 %v2257_v52  ;;  %2316 = vadd.xlane.f32.xlu0 %v2315_v19  ;;  %5592 = vmatmul.mubr.msk.f32.vlgmr.msra.gmra.mrb[34].mxu1 %vm2080_vm2, %v6209_v54  ;;  %v2330_v25 = vsel %vm2080_vm2, %v6209_v54, 0.0 }
 0x49d   :  { %v2263_v11 = vmul.f32 1.442695, %v2204_v14 }
 0x49e   :  { %v7210_v62 = vpop.eup %6210  ;;  %v5951_v0 = vpop.permute.xlu1 %5950 }
 0x49f   :  { %6220 = vpow2.f32 %v2263_v11  ;;  %v5953_v28 = vunpack.i.h.bf16 %v5951_v0  ;;  %v5952_v36 = vunpack.i.l.bf16 %v5951_v0  ;;  %2331 = vadd.xlane.f32.xlu1 %v2330_v25  ;;  %5598 = vmatprep.mubr.msk.f32.mxu0 %vm2080_vm2, %v7210_v62  ;;  %v2333_v61 = vsel %vm2080_vm2, %v7210_v62, 0.0 }
 0x4a0   :  { %2328 = vadd.xlane.f32.xlu0 %v2327_v26  ;;  %6222 = vpow2.f32 %v2251_v38 }
 0x4a1   :  { %v5800_v60 = vpack.c.bf16 %v5953_v28, %v5952_v36 }
 0x4a2   :  { %v6213_v16 = vpop.eup %6212  ;;  %v5956_v39 = vpop.permute.xlu1 %5955 }
 0x4a3   :  { %v2170_v47 = vpop.xlane.xlu0 %2169  ;;  %5801 = vmatprep.subr.bf16.mxu1 %v5800_v60  ;;  %5605 = vmatprep.mubr.msk.f32.mxu1 %vm2080_vm2, %v6213_v16  ;;  %v6215_v48 = vpop.eup %6214  ;;  %v5958_v43 = vunpack.i.h.bf16 %v5956_v39  ;;  %v5957_v5 = vunpack.i.l.bf16 %v5956_v39  ;;  %v2339_v8 = vsel %vm2080_vm2, %v6213_v16, 0.0 }
 0x4a4   :  { %v2206_v35 = vsub.f32 %v7107_v59, %v2170_v47  ;;  %5803 = vmatpush3.bf16.msra.mxu1 %v5800_v60  ;;  %v2342_v42 = vsel %vm2080_vm2, %v6215_v48, 0.0 }
 0x4a5   :  { %v6217_v2 = vpop.eup %6216  ;;  %v5804_v41 = vpack.c.bf16 %v5958_v43, %v5957_v5 }
 0x4a6   :  { %v2267_v6 = vmul.f32 1.442695, %v2206_v35  ;;  %v6219_v53 = vpop.eup %6218  ;;  %v5961_v29 = vpop.permute.xlu1 %5960  ;;  %v2348_v34 = vsel %vm2080_vm2, %v6217_v2, 0.0 }
 0x4a7   :  { %v2161_v56 = vpop.xlane.xlu0 %2160  ;;  %v5963_v7 = vunpack.i.h.bf16 %v5961_v29  ;;  %v5962_v21 = vunpack.i.l.bf16 %v5961_v29  ;;  %2349 = vadd.xlane.f32.xlu1 %v2348_v34  ;;  %5606 = vmatmul.mubr.msk.f32.vlgmr.msra.gmra.mrb[36].mxu1 %vm2080_vm2, %v6215_v48  ;;  %v2345_v59 = vsel %vm2080_vm2, %v6219_v53, 0.0 }
 0x4a8   :  { %v2203_v31 = vsub.f32 %v7114_v12, %v2161_v56  ;;  %6224 = vpow2.f32 %v2267_v6  ;;  %2346 = vadd.xlane.f32.xlu0 %v2345_v59  ;;  %v2276_v56 = vsel %vm2080_vm2, %v7060_v45, 0.0  ;;  %v2279_v59 = vsel %vm2080_vm2, %v7095_v50, 0.0 }
 0x4a9   :  { %v6221_v18 = vpop.eup %6220  ;;  %v5808_v20 = vpack.c.bf16 %v5963_v7, %v5962_v21  ;;  %v2273_v7 = vsel %vm2080_vm2, %v7055_v57, 0.0  ;;  %v2288_v45 = vsel %vm2080_vm2, %v7111_v15, 0.0  ;;  %v2294_v57 = vsel %vm2080_vm2, %v7128_v13, 0.0 }
 0x4aa   :  { %v2261_v37 = vmul.f32 1.442695, %v2203_v31  ;;  %v2354_v32 = vsel %vm2080_vm2, %v6221_v18, 0.0  ;;  %v6223_v23 = vpop.eup %6222  ;;  %v2282_v31 = vsel %vm2080_vm2, %v7097_v55, 0.0  ;;  %v2291_v55 = vsel %vm2080_vm2, %v7126_v10, 0.0 }
 0x4ab   :  { %v5946_v46 = vpop.permute.xlu0 %5945  ;;  %2355 = vadd.xlane.f32.xlu1 %v2354_v32  ;;  %5809 = vmatprep.subr.bf16.mxu1 %v5808_v20  ;;  %v2336_v30 = vsel %vm2080_vm2, %v6223_v23, 0.0 }
 0x4ac   :  { %6226 = vpow2.f32 %v2261_v37  ;;  %v5948_v44 = vunpack.i.h.bf16 %v5946_v46  ;;  %v5947_v24 = vunpack.i.l.bf16 %v5946_v46  ;;  %5811 = vmatpush3.bf16.msra.mxu1 %v5808_v20 }
 0x4ae   :  { %v5796_v12 = vpack.c.bf16 %v5948_v44, %v5947_v24 }
 0x4af   :  { %2337 = vadd.xlane.f32.xlu1 %v2336_v30 }
 0x4b0   :  { %5797 = vmatprep.subr.bf16.mxu0 %v5796_v12 }
 0x4b1   :  { %5799 = vmatpush3.bf16.msra.mxu0 %v5796_v12 }
 0x4b2   :  { %5805 = vmatprep.subr.bf16.mxu0 %v5804_v41  ;;  %v6225_v3 = vpop.eup %6224 }
 0x4b3   :  { %2343 = vadd.xlane.f32.xlu1 %v2342_v42  ;;  %v2360_v58 = vsel %vm2080_vm2, %v6225_v3, 0.0 }
 0x4b4   :  { %5599 = vmatmul.mubr.msk.f32.vlgmr.msra.gmra.mrb[40].mxu0 %vm2080_vm2, %v6223_v23 }
 0x4b5   :  { %5807 = vmatpush3.bf16.msra.mxu0 %v5804_v41  ;;  %5612 = vmatprep.mubr.msk.f32.mxu0 %vm2080_vm2, %v6219_v53 }
 0x4b6   :  { %v6227_v4 = vpop.eup %6226 }
 0x4b7   :  { %5619 = vmatprep.mubr.msk.f32.mxu1 %vm2080_vm2, %v6227_v4  ;;  %v2351_v1 = vsel %vm2080_vm2, %v6227_v4, 0.0  ;;  %2361 = vadd.xlane.f32.xlu1 %v2360_v58 }
 0x4b8   :  { %5620 = vmatmul.mubr.msk.f32.vlgmr.msra.gmra.mrb[38].mxu1 %vm2080_vm2, %v6221_v18  ;;  %2352 = vadd.xlane.f32.xlu0 %v2351_v1  ;;  %v2285_v18 = vsel %vm2080_vm2, %v7109_v33, 0.0 }
 0x4b9   :  { %5613 = vmatmul.mubr.msk.f32.vlgmr.msra.gmra.mrb[42].mxu0 %vm2080_vm2, %v6217_v2 }
 0x4bc   :  { %2334 = vadd.xlane.f32.xlu0 %v2333_v61 }
 0x4c0   :  { %2340 = vadd.xlane.f32.xlu0 %v2339_v8 }
 0x4d7   :  { %v7235_v49 = vpop.f32.mrb[30].mxu0  ;;  %v2167_v27 = vpop.xlane.xlu1 %2166 }
 0x4d8   :  { %v2205_v52 = vsub.f32 %v7146_v51, %v2167_v27  ;;  %v7238_v17 = vpop.f32.mrb[31].mxu0 }
 0x4da   :  { %v2265_v9 = vmul.f32 1.442695, %v2205_v52 }
 0x4db   :  { %v2176_v54 = vpop.xlane.xlu1 %2175  ;;  %v2173_v14 = vpop.xlane.xlu0 %2172 }
 0x4dc   :  { %6228 = vpow2.f32 %v2265_v9  ;;  %v2208_v19 = vsub.f32 %v7149_v40, %v2176_v54  ;;  %v2207_v38 = vsub.f32 %v7152_v22, %v2173_v14 }
 0x4de   :  { %v2271_v11 = vmul.f32 1.442695, %v2208_v19  ;;  %v2269_v62 = vmul.f32 1.442695, %v2207_v38 }
 0x4df   :  { %v5971_v0 = vpop.permute.xlu1 %5970  ;;  %v5966_v25 = vpop.permute.xlu0 %5965 }
 0x4e0   :  { %6230 = vpow2.f32 %v2271_v11  ;;  %v5973_v28 = vunpack.i.h.bf16 %v5971_v0  ;;  %v5972_v36 = vunpack.i.l.bf16 %v5971_v0  ;;  %v5968_v26 = vunpack.i.h.bf16 %v5966_v25 }
 0x4e1   :  { %6232 = vpow2.f32 %v2269_v62  ;;  %v5967_v51 = vunpack.i.l.bf16 %v5966_v25 }
 0x4e2   :  { %v5816_v60 = vpack.c.bf16 %v5973_v28, %v5972_v36 }
 0x4e3   :  { %v5812_v16 = vpack.c.bf16 %v5968_v26, %v5967_v51  ;;  %v7242_v39 = vpop.f32.mrb[26].mxu1 }
 0x4e4   :  { %v7244_v47 = vpop.f32.mrb[27].mxu1  ;;  %5817 = vmatprep.subr.bf16.mxu1 %v5816_v60 }
 0x4e5   :  { %5813 = vmatprep.subr.bf16.mxu0 %v5812_v16  ;;  %5819 = vmatpush3.bf16.msra.mxu1 %v5816_v60 }
 0x4e6   :  { %v6229_v40 = vpop.eup %6228  ;;  %5815 = vmatpush3.bf16.msra.mxu0 %v5812_v16 }
 0x4e7   :  { %5626 = vmatprep.mubr.msk.f32.mxu0 %vm2080_vm2, %v6229_v40  ;;  %v2357_v22 = vsel %vm2080_vm2, %v6229_v40, 0.0 }
 0x4e8   :  { %v7248_v35 = vpop.f32.mrb[32].mxu0  ;;  %2358 = vadd.xlane.f32.xlu0 %v2357_v22 }
 0x4e9   :  { %v7250_v48 = vpop.f32.mrb[33].mxu0  ;;  %5627 = vmatmul.mubr.msk.f32.vlgmr.msra.gmra.mrb[44].mxu0 %vm2080_vm2, %v6225_v3 }
 0x4ea   :  { %v6231_v2 = vpop.eup %6230 }
 0x4eb   :  { %v6233_v6 = vpop.eup %6232  ;;  %v2366_v53 = vsel %vm2080_vm2, %v6231_v2, 0.0 }
 0x4ec   :  { %5633 = vmatprep.mubr.msk.f32.mxu1 %vm2080_vm2, %v6233_v6  ;;  %2367 = vadd.xlane.f32.xlu1 %v2366_v53  ;;  %v2363_v29 = vsel %vm2080_vm2, %v6233_v6, 0.0  ;;  %v6066_v53 = vld [vmem:[#allocation8] sm:$0xff]  }
 0x4ed   :  { %5634 = vmatmul.mubr.msk.f32.vlgmr.msra.gmra.mrb[40].mxu1 %vm2080_vm2, %v6231_v2  ;;  %2364 = vadd.xlane.f32.xlu0 %v2363_v29  ;;  %v6067_v29 = vld [vmem:[#allocation8 + $0x8] sm:$0xff]  }
 0x4ee   :  { %4367 = vmatprep.mubr.bf16.mxu1 %v6500_v63  ;;  %5636 = vmatprep.subr.bf16.mxu0 %v6066_v53 }
 0x4ef   :  { %5637 = vmatpush3.bf16.msra.mxu0 %v6066_v53 }
 0x4f0   :  { %v7260_v34 = vpop.f32.mrb[28].mxu1  ;;  %2277 = vadd.xlane.f32.xlu1 %v2276_v56  ;;  %5638 = vmatprep.subr.bf16.mxu0 %v6067_v29 }
 0x4f1   :  { %v7264_v21 = vpop.f32.mrb[29].mxu1  ;;  %2274 = vadd.xlane.f32.xlu0 %v2273_v7 }
 0x4f3   :  { %5639 = vmatpush3.bf16.msra.mxu0 %v6067_v29 }
 0x4f4   :  { %2283 = vadd.xlane.f32.xlu1 %v2282_v31 }
 0x4f5   :  { %2280 = vadd.xlane.f32.xlu0 %v2279_v59 }
 0x4f8   :  { %2289 = vadd.xlane.f32.xlu1 %v2288_v45 }
 0x4f9   :  { %2286 = vadd.xlane.f32.xlu0 %v2285_v18 }
 0x4fc   :  { %2295 = vadd.xlane.f32.xlu1 %v2294_v57 }
 0x4fd   :  { %2292 = vadd.xlane.f32.xlu0 %v2291_v55 }
 0x510   :  { %v2299_v20 = vpop.xlane.xlu0 %2298  ;;  %v2302_v50 = vpop.xlane.xlu1 %2301 }
 0x511   :  { %6234 = vrcp.f32 %v2302_v50 }
 0x512   :  { %6236 = vrcp.f32 %v2299_v20  ;;  %v6068_v20 = vld [vmem:[#allocation8 + $0x10] sm:$0xff]  }
 0x513   :  { %5640 = vmatprep.subr.bf16.mxu0 %v6068_v20 }
 0x514   :  { %v2308_v37 = vpop.xlane.xlu0 %2307  ;;  %5641 = vmatpush3.bf16.msra.mxu0 %v6068_v20 }
 0x515   :  { %6238 = vrcp.f32 %v2308_v37 }
 0x518   :  { %v2305_v43 = vpop.xlane.xlu0 %2304 }
 0x519   :  { %6240 = vrcp.f32 %v2305_v43 }
 0x51b   :  { %v6235_v23 = vpop.eup %6234 }
 0x51c   :  { %v2314_v15 = vpop.xlane.xlu1 %2313  ;;  %v6237_v44 = vpop.eup %6236 }
 0x51d   :  { %v2311_v46 = vpop.xlane.xlu0 %2310  ;;  %6242 = vrcp.f32 %v2314_v15 }
 0x51e   :  { %6244 = vrcp.f32 %v2311_v46 }
 0x51f   :  { %v6239_v3 = vpop.eup %6238 }
 0x523   :  { %v6241_v58 = vpop.eup %6240 }
 0x524   :  { %v2326_v32 = vpop.xlane.xlu1 %2325 }
 0x525   :  { %v2323_v33 = vpop.xlane.xlu0 %2322 }
 0x527   :  { %v6243_v38 = vpop.eup %6242 }
 0x528   :  { %v2320_v10 = vpop.xlane.xlu1 %2319  ;;  %v6245_v62 = vpop.eup %6244 }
 0x529   :  { %v2317_v41 = vpop.xlane.xlu0 %2316  ;;  %6246 = vrcp.f32 %v2320_v10 }
 0x52a   :  { %6248 = vrcp.f32 %v2317_v41 }
 0x52b   :  { %6250 = vrcp.f32 %v2326_v32 }
 0x52c   :  { %v2332_v42 = vpop.xlane.xlu1 %2331  ;;  %6252 = vrcp.f32 %v2323_v33 }
 0x52d   :  { %v2329_v8 = vpop.xlane.xlu0 %2328  ;;  %6254 = vrcp.f32 %v2332_v42 }
 0x52e   :  { %6256 = vrcp.f32 %v2329_v8 }
 0x533   :  { %v6247_v36 = vpop.eup %6246 }
 0x534   :  { %v7279_v52 = vpop.xlane.xlu1 %2349  ;;  %v6249_v16 = vpop.eup %6248 }
 0x535   :  { %v7281_v54 = vpop.xlane.xlu0 %2346  ;;  %v6251_v56 = vpop.eup %6250 }
 0x536   :  { %v6253_v59 = vpop.eup %6252 }
 0x537   :  { %v6255_v50 = vpop.eup %6254 }
 0x538   :  { %v7284_v14 = vpop.xlane.xlu1 %2355  ;;  %v6257_v46 = vpop.eup %6256 }
 0x53c   :  { %v2338_v26 = vpop.xlane.xlu1 %2337 }
 0x540   :  { %v2344_v57 = vpop.xlane.xlu1 %2343 }
 0x541   :  { %6258 = vrcp.f32 %v2344_v57 }
 0x545   :  { %v7286_v19 = vpop.xlane.xlu0 %2352 }
 0x549   :  { %v2335_v40 = vpop.xlane.xlu0 %2334 }
 0x54d   :  { %v2341_v37 = vpop.xlane.xlu0 %2340 }
 0x54e   :  { %v5558_v5 = vpop.f32.mrb[34].mxu0  ;;  %6260 = vrcp.f32 %v2341_v37 }
 0x54f   :  { %v3706_v13 = vmul.f32 %v6235_v23, %v5558_v5  ;;  %v2765_v24 = vpop.f32.mrb[35].mxu0  ;;  %v6069_v5 = vld [vmem:[#allocation8 + $0x18] sm:$0xff]   ;;  %6262 = vrcp.f32 %v2338_v26 }
 0x550   :  { %v3705_v12 = vmul.f32 %v6237_v44, %v2765_v24  ;;  %5642 = vmatprep.subr.bf16.mxu0 %v6069_v5  ;;  %v6071_v24 = vld [vmem:[#allocation8 + $0x28] sm:$0xff]   ;;  %6264 = vrcp.f32 %v2335_v40 }
 0x551   :  { %5643 = vmatpush3.bf16.msra.mxu0 %v6069_v5  ;;  %6266 = vrcp.f32 %v7279_v52 }
 0x552   :  { %v5974_v30 = vpack.i.bf16 %v3706_v13, %v3705_v12  ;;  %v6070_v13 = vld [vmem:[#allocation8 + $0x20] sm:$0xff]   ;;  %v6259_v12 = vpop.eup %6258  ;;  %6268 = vrcp.f32 %v7284_v14 }
 0x553   :  { %5644 = vmatprep.subr.bf16.mxu0 %v6070_v13  ;;  %6270 = vrcp.f32 %v7286_v19 }
 0x554   :  { %5975 = vrot.lane.b32.xlu0 %v5974_v30, %s6502_s3  ;;  %6272 = vrcp.f32 %v7281_v54 }
 0x555   :  { %5645 = vmatpush3.bf16.msra.mxu0 %v6070_v13 }
 0x556   :  { %5646 = vmatprep.subr.bf16.mxu0 %v6071_v24 }
 0x558   :  { %v5565_v4 = vpop.f32.mrb[30].mxu1  ;;  %v6261_v30 = vpop.eup %6260 }
 0x559   :  { %v3708_v1 = vmul.f32 %v6239_v3, %v5565_v4  ;;  %v2846_v61 = vpop.f32.mrb[31].mxu1  ;;  %v6072_v4 = vld [vmem:[#allocation8 + $0x30] sm:$0xff]   ;;  %5647 = vmatpush3.bf16.msra.mxu0 %v6071_v24 }
 0x55a   :  { %v3707_v27 = vmul.f32 %v6241_v58, %v2846_v61  ;;  %5648 = vmatprep.subr.bf16.mxu0 %v6072_v4  ;;  %v6263_v61 = vpop.eup %6262 }
 0x55c   :  { %v5979_v9 = vpack.i.bf16 %v3708_v1, %v3707_v27  ;;  %v6073_v1 = vld [vmem:[#allocation8 + $0x38] sm:$0xff]   ;;  %v6265_v27 = vpop.eup %6264 }
 0x55d   :  { %5649 = vmatpush3.bf16.msra.mxu0 %v6072_v4 }
 0x55e   :  { %5980 = vrot.lane.b32.xlu1 %v5979_v9, %s6502_s3  ;;  %5650 = vmatprep.subr.bf16.mxu0 %v6073_v1 }
 0x561   :  { %5651 = vmatpush3.bf16.msra.mxu0 %v6073_v1 }
 0x563   :  { %v5572_v11 = vpop.f32.mrb[36].mxu0 }
 0x564   :  { %v7288_v0 = vmul.f32 %v6243_v38, %v5572_v11  ;;  %v2927_v25 = vpop.f32.mrb[37].mxu0 }
 0x565   :  { %v7290_v28 = vmul.f32 %v6245_v62, %v2927_v25  ;;  %v6267_v62 = vpop.eup %6266 }
 0x566   :  { %v6269_v52 = vpop.eup %6268 }
 0x567   :  { %v6004_v51 = vpack.i.bf16 %v7288_v0, %v7290_v28  ;;  %v5579_v60 = vpop.f32.mrb[32].mxu1 }
 0x568   :  { %v7294_v22 = vmul.f32 %v6247_v36, %v5579_v60  ;;  %v3008_v2 = vpop.f32.mrb[33].mxu1  ;;  %v6271_v36 = vpop.eup %6270 }
 0x569   :  { %v7296_v6 = vmul.f32 %v6249_v16, %v3008_v2  ;;  %v6273_v16 = vpop.eup %6272 }
 0x56b   :  { %v6009_v7 = vpack.i.bf16 %v7294_v22, %v7296_v6  ;;  %v5586_v31 = vpop.f32.mrb[38].mxu0 }
 0x56c   :  { %v3714_v45 = vmul.f32 %v6251_v56, %v5586_v31  ;;  %v3089_v18 = vpop.f32.mrb[39].mxu0 }
 0x56d   :  { %v3713_v55 = vmul.f32 %v6253_v59, %v3089_v18  ;;  %v2362_v59 = vpop.xlane.xlu1 %2361 }
 0x56e   :  { %6274 = vrcp.f32 %v2362_v59 }
 0x56f   :  { %v5984_v43 = vpack.i.bf16 %v3714_v45, %v3713_v55  ;;  %v5593_v15 = vpop.f32.mrb[34].mxu1 }
 0x570   :  { %v3716_v32 = vmul.f32 %v6255_v50, %v5593_v15  ;;  %v3170_v23 = vpop.f32.mrb[35].mxu1 }
 0x571   :  { %v3715_v33 = vmul.f32 %v6257_v46, %v3170_v23  ;;  %5985 = vrot.lane.b32.xlu1 %v5984_v43, %s6490_s1 }
 0x573   :  { %v5989_v44 = vpack.i.bf16 %v3716_v32, %v3715_v33 }
 0x575   :  { %5990 = vrot.lane.b32.xlu1 %v5989_v44, %s6490_s1  ;;  %v2359_v31 = vpop.xlane.xlu0 %2358 }
 0x576   :  { %6276 = vrcp.f32 %v2359_v31 }
 0x578   :  { %v6275_v57 = vpop.eup %6274 }
 0x579   :  { %v2368_v45 = vpop.xlane.xlu1 %2367 }
 0x57a   :  { %v5607_v10 = vpop.f32.mrb[36].mxu1  ;;  %v2365_v18 = vpop.xlane.xlu0 %2364  ;;  %6278 = vrcp.f32 %v2368_v45 }
 0x57b   :  { %v3720_v41 = vmul.f32 %v6259_v12, %v5607_v10  ;;  %v3332_v42 = vpop.f32.mrb[37].mxu1  ;;  %6280 = vrcp.f32 %v2365_v18 }
 0x57c   :  { %v3719_v3 = vmul.f32 %v6261_v30, %v3332_v42 }
 0x57d   :  { %v2278_v32 = vpop.xlane.xlu1 %2277 }
 0x57e   :  { %v6019_v58 = vpack.i.bf16 %v3720_v41, %v3719_v3  ;;  %v2275_v33 = vpop.xlane.xlu0 %2274  ;;  %6282 = vrcp.f32 %v2278_v32 }
 0x57f   :  { %6284 = vrcp.f32 %v2275_v33 }
 0x580   :  { %v6277_v6 = vpop.eup %6276 }
 0x581   :  { %v2284_v23 = vpop.xlane.xlu1 %2283 }
 0x582   :  { %v2281_v44 = vpop.xlane.xlu0 %2280  ;;  %6286 = vrcp.f32 %v2284_v23 }
 0x583   :  { %6288 = vrcp.f32 %v2281_v44 }
 0x584   :  { %v6279_v0 = vpop.eup %6278 }
 0x585   :  { %v6281_v37 = vpop.eup %6280  ;;  %v2290_v5 = vpop.xlane.xlu1 %2289 }
 0x586   :  { %v2287_v24 = vpop.xlane.xlu0 %2286  ;;  %6290 = vrcp.f32 %v2290_v5 }
 0x587   :  { %v5600_v8 = vpop.f32.mrb[40].mxu0  ;;  %6292 = vrcp.f32 %v2287_v24 }
 0x588   :  { %v3718_v9 = vmul.f32 %v6263_v61, %v5600_v8  ;;  %v3251_v38 = vpop.f32.mrb[41].mxu0  ;;  %v6283_v41 = vpop.eup %6282 }
 0x589   :  { %v3717_v11 = vmul.f32 %v6265_v27, %v3251_v38  ;;  %v2296_v13 = vpop.xlane.xlu1 %2295  ;;  %v6285_v3 = vpop.eup %6284 }
 0x58a   :  { %v2293_v10 = vpop.xlane.xlu0 %2292  ;;  %v3697_v38 = vmul.f32 %v6285_v3, %v7238_v17  ;;  %6294 = vrcp.f32 %v2296_v13 }
 0x58b   :  { %v6014_v25 = vpack.i.bf16 %v3718_v9, %v3717_v11  ;;  %v5621_v14 = vpop.f32.mrb[38].mxu1  ;;  %v3698_v11 = vmul.f32 %v6283_v41, %v7235_v49  ;;  %6296 = vrcp.f32 %v2293_v10 }
 0x58c   :  { %v5614_v26 = vpop.f32.mrb[42].mxu0  ;;  %v3724_v19 = vmul.f32 %v6269_v52, %v5621_v14  ;;  %v3494_v60 = vpop.f32.mrb[39].mxu1 }
 0x58d   :  { %v3722_v54 = vmul.f32 %v6267_v62, %v5614_v26  ;;  %v3413_v40 = vpop.f32.mrb[43].mxu0  ;;  %v3723_v2 = vmul.f32 %v6271_v36, %v3494_v60  ;;  %v6287_v4 = vpop.eup %6286 }
 0x58e   :  { %v3721_v53 = vmul.f32 %v6273_v16, %v3413_v40  ;;  %v6289_v1 = vpop.eup %6288 }
 0x58f   :  { %v5999_v29 = vpack.i.bf16 %v3724_v19, %v3723_v2  ;;  %v3699_v14 = vmul.f32 %v6289_v1, %v7244_v47 }
 0x590   :  { %v5994_v56 = vpack.i.bf16 %v3722_v54, %v3721_v53 }
 0x591   :  { %6000 = vrot.lane.b32.xlu1 %v5999_v29, %s6501_s2 }
 0x592   :  { %5995 = vrot.lane.b32.xlu0 %v5994_v56, %s6501_s2 }
 0x595   :  { %6010 = vrot.lane.b32.xlu1 %v6009_v7, %s6502_s3 }
 0x596   :  { %6005 = vrot.lane.b32.xlu0 %v6004_v51, %s6502_s3 }
 0x599   :  { %6020 = vrot.lane.b32.xlu1 %v6019_v58, %s6490_s1 }
 0x59a   :  { %6015 = vrot.lane.b32.xlu0 %v6014_v25, %s6490_s1  ;;  %v3700_v25 = vmul.f32 %v6287_v4, %v7242_v39 }
 0x5bc   :  { %v5628_v22 = vpop.f32.mrb[44].mxu0 }
 0x5bd   :  { %v3726_v7 = vmul.f32 %v6275_v57, %v5628_v22  ;;  %v3575_v55 = vpop.f32.mrb[45].mxu0 }
 0x5be   :  { %v3725_v20 = vmul.f32 %v6277_v6, %v3575_v55 }
 0x5c0   :  { %v6024_v28 = vpack.i.bf16 %v3726_v7, %v3725_v20  ;;  %v5635_v51 = vpop.f32.mrb[40].mxu1  ;;  %v6291_v20 = vpop.eup %6290 }
 0x5c1   :  { %v3728_v50 = vmul.f32 %v6279_v0, %v5635_v51  ;;  %v3656_v43 = vpop.f32.mrb[41].mxu1  ;;  %v3702_v32 = vmul.f32 %v6291_v20, %v7248_v35 }
 0x5c2   :  { %v3727_v15 = vmul.f32 %v6281_v37, %v3656_v43  ;;  %6025 = vrot.lane.b32.xlu0 %v6024_v28, %s6501_s2  ;;  %v6293_v28 = vpop.eup %6292 }
 0x5c4   :  { %v6029_v46 = vpack.i.bf16 %v3728_v50, %v3727_v15  ;;  %v6295_v15 = vpop.eup %6294 }
 0x5c5   :  { %v6297_v33 = vpop.eup %6296 }
 0x5c6   :  { %6030 = vrot.lane.b32.xlu1 %v6029_v46, %s6501_s2  ;;  %v5976_v42 = vpop.permute.xlu0 %5975  ;;  %v3701_v46 = vmul.f32 %v6293_v28, %v7250_v48  ;;  %v3704_v48 = vmul.f32 %v6295_v15, %v7260_v34  ;;  %v3703_v35 = vmul.f32 %v6297_v33, %v7264_v21  ;;  %v6319_v28 = vld [vmem:[#allocation2 + $0x28] sm:$0xff] }
 0x5c7   :  { %v5978_v61 = vunpack.i.h.bf16 %v5976_v42  ;;  %v5977_v8 = vunpack.i.l.bf16 %v5976_v42  ;;  %v6079_v33 = vld [vmem:[#allocation10 + $0xc] ss:$16 sps:$4 sm:$0xff]  }
 0x5c8   :  { %4408 = vmatprep.subr.bf16.mxu0 %v6079_v33 }
 0x5c9   :  { %v3826_v19 = vsel %vm751_vm0, %v3698_v11, %v5978_v61  ;;  %v3825_v60 = vsel %vm751_vm0, %v3697_v38, %v5977_v8 }
 0x5d0   :  { %v5981_v12 = vpop.permute.xlu1 %5980 }
 0x5d1   :  { %v5983_v27 = vunpack.i.h.bf16 %v5981_v12  ;;  %v5982_v9 = vunpack.i.l.bf16 %v5981_v12 }
 0x5d3   :  { %v3828_v54 = vsel %vm751_vm0, %v3700_v25, %v5983_v27  ;;  %v3827_v17 = vsel %vm751_vm0, %v3699_v14, %v5982_v9  ;;  %v5080_v14 = vld [vmem:[%s7599_s6] ss:$0 sm:$0xff] }
 0x5e3   :  { %v5986_v30 = vpop.permute.xlu1 %5985 }
 0x5e4   :  { %v5988_v36 = vunpack.i.h.bf16 %v5986_v30  ;;  %v5987_v26 = vunpack.i.l.bf16 %v5986_v30 }
 0x5e6   :  { %v3834_v56 = vsel %vm3833_vm3, %v3825_v60, %v5987_v26  ;;  %v3835_v31 = vsel %vm3833_vm3, %v3826_v19, %v5988_v36 }
 0x5e7   :  { %v5991_v58 = vpop.permute.xlu1 %5990 }
 0x5e8   :  { %v5993_v62 = vunpack.i.h.bf16 %v5991_v58  ;;  %v5992_v52 = vunpack.i.l.bf16 %v5991_v58 }
 0x5ea   :  { %v3837_v39 = vsel %vm3833_vm3, %v3828_v54, %v5993_v62  ;;  %v3836_v47 = vsel %vm3833_vm3, %v3827_v17, %v5992_v52  ;;  %v6314_v17 = vld [vmem:[#allocation2] sm:$0xff] }
 0x603   :  { %v6001_v16 = vpop.permute.xlu1 %6000 }
 0x604   :  { %v6003_v49 = vunpack.i.h.bf16 %v6001_v16  ;;  %v6002_v40 = vunpack.i.l.bf16 %v6001_v16  ;;  %v5996_v2 = vpop.permute.xlu0 %5995 }
 0x605   :  { %v5998_v53 = vunpack.i.h.bf16 %v5996_v2  ;;  %v5997_v29 = vunpack.i.l.bf16 %v5996_v2  ;;  %v6315_v2 = vld [vmem:[#allocation2 + $0x8] sm:$0xff] }
 0x606   :  { %v3846_v59 = vsel %vm3842_vm4, %v3837_v39, %v6003_v49  ;;  %v3845_v45 = vsel %vm3842_vm4, %v3836_v47, %v6002_v40  ;;  %v6316_v47 = vld [vmem:[#allocation2 + $0x10] sm:$0xff] }
 0x607   :  { %v3852_v18 = vpack.c.bf16 %v3846_v59, %v3845_v45  ;;  %v3843_v57 = vsel %vm3842_vm4, %v3834_v56, %v5997_v29  ;;  %v3844_v22 = vsel %vm3842_vm4, %v3835_v31, %v5998_v53  ;;  %v6011_v55 = vpop.permute.xlu1 %6010  ;;  %v6317_v56 = vld [vmem:[#allocation2 + $0x18] sm:$0xff] }
 0x608   :  { %v3851_v6 = vpack.c.bf16 %v3844_v22, %v3843_v57  ;;  %v6006_v7 = vpop.permute.xlu0 %6005  ;;  %v6013_v5 = vunpack.i.h.bf16 %v6011_v55  ;;  %v6012_v44 = vunpack.i.l.bf16 %v6011_v55 }
 0x609   :  { %v6008_v51 = vunpack.i.h.bf16 %v6006_v7  ;;  %v6007_v37 = vunpack.i.l.bf16 %v6006_v7  ;;  %v6318_v7 = vld [vmem:[#allocation2 + $0x20] sm:$0xff] }
 0x60a   :  { %5652 = vmatprep.mubr.bf16.mxu0 %v3851_v6  ;;  %v3832_v27 = vsel %vm751_vm0, %v3704_v48, %v6013_v5  ;;  %v3831_v9 = vsel %vm751_vm0, %v3703_v35, %v6012_v44  ;;  %v6082_v5 = vld [vmem:[#allocation10 + $0x24] ss:$16 sps:$4 sm:$0xff]   ;;  %v6085_v44 = vld [vmem:[#allocation10 + $0x2c] ss:$16 sps:$4 sm:$0xff]  }
 0x60b   :  { %5653 = vmatmul.mubr.bf16.vlgmr.msra.gmra.mrb[48].mxu0 %v3852_v18  ;;  %v6021_v23 = vpop.permute.xlu1 %6020  ;;  %v3830_v24 = vsel %vm751_vm0, %v3702_v32, %v6008_v51  ;;  %v3829_v12 = vsel %vm751_vm0, %v3701_v46, %v6007_v37  ;;  %v6320_v37 = vld [vmem:[#allocation2 + $0x30] sm:$0xff] }
 0x60c   :  { %v6016_v0 = vpop.permute.xlu0 %6015  ;;  %v6023_v41 = vunpack.i.h.bf16 %v6021_v23  ;;  %v6022_v42 = vunpack.i.l.bf16 %v6021_v23  ;;  %v6074_v46 = vld [vmem:[#allocation10] ss:$16 sps:$4 sm:$0xff]   ;;  %v6076_v32 = vld [vmem:[#allocation10 + $0x4] ss:$16 sps:$4 sm:$0xff]   ;;  %v6077_v23 = vld [vmem:[#allocation10 + $0x8] ss:$16 sps:$4 sm:$0xff]  }
 0x60d   :  { %v6018_v50 = vunpack.i.h.bf16 %v6016_v0  ;;  %v6017_v43 = vunpack.i.l.bf16 %v6016_v0  ;;  %4335 = vmatprep.subr.bf16.mxu1 %v6076_v32  ;;  %4409 = vmatpush1.bf16.msra.mxu0 %v6077_v23 }
 0x60e   :  { %v3841_v62 = vsel %vm3833_vm3, %v3832_v27, %v6023_v41  ;;  %v3840_v52 = vsel %vm3833_vm3, %v3831_v9, %v6022_v42  ;;  %4336 = vmatpush1.bf16.msra.mxu1 %v6074_v46  ;;  %4410 = vmatprep.subr.bf16.mxu0 %v6085_v44 }
 0x60f   :  { %v3838_v3 = vsel %vm3833_vm3, %v3829_v12, %v6017_v43  ;;  %v3839_v4 = vsel %vm3833_vm3, %v3830_v24, %v6018_v50  ;;  %v6321_v43 = vld [vmem:[#allocation2 + $0x38] sm:$0xff]  ;;  %4337 = vmatprep.subr.bf16.mxu1 %v6082_v5 }
 0x610   :  { %v6083_v24 = vld [vmem:[#allocation10 + $0x28] ss:$16 sps:$4 sm:$0xff]  }
 0x611   :  { %4411 = vmatpush1.bf16.msra.mxu0 %v6083_v24 }
 0x634   :  { %v6026_v13 = vpop.permute.xlu0 %6025 }
 0x635   :  { %v6028_v10 = vunpack.i.h.bf16 %v6026_v13  ;;  %v6027_v30 = vunpack.i.l.bf16 %v6026_v13  ;;  %v6080_v13 = vld [vmem:[#allocation10 + $0x20] ss:$16 sps:$4 sm:$0xff]  }
 0x636   :  { %4338 = vmatpush1.bf16.msra.mxu1 %v6080_v13 }
 0x637   :  { %v3847_v58 = vsel %vm3842_vm4, %v3838_v3, %v6027_v30  ;;  %v3848_v1 = vsel %vm3842_vm4, %v3839_v4, %v6028_v10 }
 0x638   :  { %v6031_v61 = vpop.permute.xlu1 %6030  ;;  %v3853_v8 = vpack.c.bf16 %v3848_v1, %v3847_v58 }
 0x639   :  { %v6033_v38 = vunpack.i.h.bf16 %v6031_v61  ;;  %v6032_v11 = vunpack.i.l.bf16 %v6031_v61 }
 0x63a   :  { %5656 = vmatprep.mubr.bf16.mxu0 %v3853_v8 }
 0x63b   :  { %v3849_v34 = vsel %vm3842_vm4, %v3840_v52, %v6032_v11  ;;  %v3850_v21 = vsel %vm3842_vm4, %v3841_v62, %v6033_v38  ;;  %v6088_v11 = vld [vmem:[#allocation10 + $0x44] ss:$16 sps:$4 sm:$0xff]   ;;  %v6091_v62 = vld [vmem:[#allocation10 + $0x4c] ss:$16 sps:$4 sm:$0xff]   ;;  %v6086_v52 = vld [vmem:[#allocation10 + $0x40] ss:$16 sps:$4 sm:$0xff]  }
 0x63c   :  { %v3854_v25 = vpack.c.bf16 %v3850_v21, %v3849_v34  ;;  %v6089_v34 = vld [vmem:[#allocation10 + $0x48] ss:$16 sps:$4 sm:$0xff]   ;;  %4339 = vmatprep.subr.bf16.mxu1 %v6088_v11  ;;  %4412 = vmatprep.subr.bf16.mxu0 %v6091_v62  ;;  %v6094_v21 = vld [vmem:[#allocation10 + $0x64] ss:$16 sps:$4 sm:$0xff]  }
 0x63d   :  { %4340 = vmatpush1.bf16.msra.mxu1 %v6086_v52  ;;  %4413 = vmatpush1.bf16.msra.mxu0 %v6089_v34 }
 0x63e   :  { %5657 = vmatmul.mubr.bf16.gmra.mrb[52].mxu0 %v3854_v25  ;;  %v6097_v25 = vld [vmem:[#allocation10 + $0x6c] ss:$16 sps:$4 sm:$0xff]   ;;  %4341 = vmatprep.subr.bf16.mxu1 %v6094_v21  ;;  %v7426_v21 = vld [vmem:[%s7600_s7] ss:$0 sm:$0xff] }
 0x63f   :  { %4440 = vmatprep.mubr.bf16.mxu0 %v6500_v63  ;;  %4414 = vmatprep.subr.bf16.mxu0 %v6097_v25 }
 0x6de   :  { %v5654_v36 = vpop.f32.mrb[48].mxu0 }
 0x6df   :  { %v3960_v26 = vpop.f32.mrb[49].mxu0  ;;  %v3969_v54 = vadd.f32 %v5654_v36, %v5080_v14  ;;  %v6095_v36 = vld [vmem:[#allocation10 + $0x68] ss:$16 sps:$4 sm:$0xff]  }
 0x6e0   :  { %v3961_v19 = vadd.f32 %v5080_v14, %v3960_v26  ;;  %v5655_v60 = vpop.f32.mrb[50].mxu0  ;;  %4415 = vmatpush1.bf16.msra.mxu0 %v6095_v36  ;;  %v6100_v26 = vld [vmem:[#allocation10 + $0x84] ss:$16 sps:$4 sm:$0xff]  }
 0x6e1   :  { %v3963_v16 = vpop.f32.mrb[51].mxu0  ;;  %v7361_v53 = vadd.f32 %v6316_v47, %v3969_v54  ;;  %v3972_v29 = vadd.f32 %v5655_v60, %v5080_v14  ;;  %v6098_v60 = vld [vmem:[#allocation10 + $0x80] ss:$16 sps:$4 sm:$0xff]   ;;  %v6106_v54 = vld [vmem:[#allocation10 + $0xa4] ss:$16 sps:$4 sm:$0xff]  }
 0x6e2   :  { %v7356_v49 = vadd.f32 %v6314_v17, %v3961_v19  ;;  %v3964_v40 = vadd.f32 %v5080_v14, %v3963_v16  ;;  %v6103_v19 = vld [vmem:[#allocation10 + $0x8c] ss:$16 sps:$4 sm:$0xff]   ;;  %v6101_v16 = vld [vmem:[#allocation10 + $0x88] ss:$16 sps:$4 sm:$0xff]   ;;  %v6112_v47 = vld [vmem:[#allocation10 + $0xc4] ss:$16 sps:$4 sm:$0xff]  }
 0x6e3   :  { %v7365_v31 = vadd.f32 %v6317_v56, %v3972_v29  ;;  %4416 = vmatprep.subr.bf16.mxu0 %v6103_v19  ;;  %v6109_v17 = vld [vmem:[#allocation10 + $0xac] ss:$16 sps:$4 sm:$0xff]   ;;  %v6110_v56 = vld [vmem:[#allocation10 + $0xc0] ss:$16 sps:$4 sm:$0xff]  }
 0x6e4   :  { %v7358_v39 = vadd.f32 %v6315_v2, %v3964_v40  ;;  %3999 = vadd.xlane.f32.xlu0 %v7356_v49  ;;  %4417 = vmatpush1.bf16.msra.mxu0 %v6101_v16  ;;  %v6104_v40 = vld [vmem:[#allocation10 + $0xa0] ss:$16 sps:$4 sm:$0xff]   ;;  %v6107_v2 = vld [vmem:[#allocation10 + $0xa8] ss:$16 sps:$4 sm:$0xff]   ;;  %v6115_v29 = vld [vmem:[#allocation10 + $0xcc] ss:$16 sps:$4 sm:$0xff]  }
 0x6e5   :  { %4418 = vmatprep.subr.bf16.mxu0 %v6109_v17 }
 0x6e6   :  { %4001 = vadd.xlane.f32.xlu1 %v7358_v39 }
 0x6e8   :  { %4003 = vadd.xlane.f32.xlu0 %v7361_v53  ;;  %4419 = vmatpush1.bf16.msra.mxu0 %v6107_v2 }
 0x6e9   :  { %4420 = vmatprep.subr.bf16.mxu0 %v6115_v29  ;;  %v7441_v29 = vld [vmem:[#allocation11 + $0x80] sm:$0xff]  }
 0x6ec   :  { %4005 = vadd.xlane.f32.xlu0 %v7365_v31 }
 0x711   :  { %v5658_v59 = vpop.f32.mrb[52].mxu0 }
 0x712   :  { %v3976_v45 = vpop.f32.mrb[53].mxu0  ;;  %v3985_v6 = vadd.f32 %v5658_v59, %v5080_v14  ;;  %v6113_v59 = vld [vmem:[#allocation10 + $0xc8] ss:$16 sps:$4 sm:$0xff]  }
 0x713   :  { %v3977_v18 = vadd.f32 %v5080_v14, %v3976_v45  ;;  %v5659_v57 = vpop.f32.mrb[54].mxu0  ;;  %v6118_v45 = vld [vmem:[#allocation10 + $0xe4] ss:$16 sps:$4 sm:$0xff]   ;;  %4421 = vmatpush1.bf16.msra.mxu0 %v6113_v59  ;;  %v7443_v59 = vld [vmem:[#allocation11 + $0xc8] sm:$0xff]  }
 0x714   :  { %v3979_v22 = vpop.f32.mrb[55].mxu0  ;;  %v3988_v0 = vadd.f32 %v5659_v57, %v5080_v14  ;;  %v7373_v50 = vadd.f32 %v6320_v37, %v3985_v6  ;;  %v6116_v57 = vld [vmem:[#allocation10 + $0xe0] ss:$16 sps:$4 sm:$0xff]  }
 0x715   :  { %v7368_v55 = vadd.f32 %v6318_v7, %v3977_v18  ;;  %v3980_v20 = vadd.f32 %v5080_v14, %v3979_v22  ;;  %v6092_v14 = vld [vmem:[#allocation10 + $0x60] ss:$16 sps:$4 sm:$0xff]   ;;  %v6121_v18 = vld [vmem:[#allocation10 + $0xec] ss:$16 sps:$4 sm:$0xff]   ;;  %v6119_v22 = vld [vmem:[#allocation10 + $0xe8] ss:$16 sps:$4 sm:$0xff]  }
 0x716   :  { %v7376_v15 = vadd.f32 %v6321_v43, %v3988_v0  ;;  %4342 = vmatpush1.bf16.msra.mxu1 %v6092_v14  ;;  %4422 = vmatprep.subr.bf16.mxu0 %v6121_v18 }
 0x717   :  { %v7370_v51 = vadd.f32 %v6319_v28, %v3980_v20  ;;  %4007 = vadd.xlane.f32.xlu0 %v7368_v55  ;;  %4343 = vmatprep.subr.bf16.mxu1 %v6100_v26 }
 0x718   :  { %4423 = vmatpush1.bf16.msra.mxu0 %v6119_v22  ;;  %v6130_v22 = vld [vmem:[#allocation11 + $0x50] sm:$0xff]  }
 0x719   :  { %4009 = vadd.xlane.f32.xlu1 %v7370_v51 }
 0x71a   :  { %4344 = vmatpush1.bf16.msra.mxu1 %v6098_v60  ;;  %v7434_v60 = vld [vmem:[%s7601_s8] ss:$0 sm:$0xff] }
 0x71b   :  { %4011 = vadd.xlane.f32.xlu0 %v7373_v50  ;;  %4345 = vmatprep.subr.bf16.mxu1 %v6106_v54 }
 0x71d   :  { %4013 = vadd.xlane.f32.xlu1 %v7376_v15 }
 0x71e   :  { %4346 = vmatpush1.bf16.msra.mxu1 %v6104_v40 }
 0x71f   :  { %4347 = vmatprep.subr.bf16.mxu1 %v6112_v47  ;;  %v6124_v47 = vld [vmem:[#allocation11] sm:$0xff]  }
 0x722   :  { %4348 = vmatpush1.bf16.msra.mxu1 %v6110_v56  ;;  %v6126_v56 = vld [vmem:[#allocation11 + $0x48] sm:$0xff]  }
 0x723   :  { %4349 = vmatprep.subr.bf16.mxu1 %v6118_v45 }
 0x726   :  { %4350 = vmatpush1.bf16.msra.mxu1 %v6116_v57  ;;  %v7451_v57 = vld [vmem:[#allocation11 + $0x88] sm:$0xff]  }
 0x771   :  { %v4000_v12 = vpop.xlane.xlu0 %3999 }
 0x772   :  { %v4015_v10 = vmul.f32 0.0078125, %v4000_v12 }
 0x773   :  { %v4002_v30 = vpop.xlane.xlu1 %4001 }
 0x774   :  { %v7381_v41 = vsub.f32 %v7356_v49, %v4015_v10  ;;  %v4016_v42 = vmul.f32 0.0078125, %v4002_v30  ;;  %v6122_v10 = vld [vmem:[#allocation11 + $0x40] sm:$0xff]  }
 0x775   :  { %v4004_v3 = vpop.xlane.xlu0 %4003  ;;  %v7420_v30 = vld [vmem:[#allocation11 + $0xc0] sm:$0xff]   ;;  %5308 = vmatprep.subr.bf16.mxu1 %v6122_v10 }
 0x776   :  { %v7384_v4 = vsub.f32 %v7358_v39, %v4016_v42  ;;  %v4017_v48 = vmul.f32 0.0078125, %v4004_v3  ;;  %v4031_v35 = vmul.f32 %v7381_v41, %v7381_v41  ;;  %5348 = vmatprep.subr.bf16.mxu0 %v7420_v30  ;;  %v7472_v10 = vld [vmem:[#allocation11 + $0xa0] sm:$0xff]  }
 0x778   :  { %v7389_v58 = vsub.f32 %v7361_v53, %v4017_v48  ;;  %4039 = vadd.xlane.f32.xlu0 %v4031_v35  ;;  %v4032_v1 = vmul.f32 %v7384_v4, %v7384_v4 }
 0x779   :  { %v4006_v61 = vpop.xlane.xlu0 %4005 }
 0x77a   :  { %v4018_v8 = vmul.f32 0.0078125, %v4006_v61  ;;  %4041 = vadd.xlane.f32.xlu1 %v4032_v1  ;;  %v4033_v27 = vmul.f32 %v7389_v58, %v7389_v58 }
 0x77c   :  { %v7396_v9 = vsub.f32 %v7365_v31, %v4018_v8  ;;  %4043 = vadd.xlane.f32.xlu0 %v4033_v27 }
 0x77e   :  { %v4034_v38 = vmul.f32 %v7396_v9, %v7396_v9 }
 0x780   :  { %4045 = vadd.xlane.f32.xlu1 %v4034_v38 }
 0x7a4   :  { %v4008_v6 = vpop.xlane.xlu0 %4007 }
 0x7a5   :  { %v4019_v7 = vmul.f32 0.0078125, %v4008_v6  ;;  %v7454_v6 = vld [vmem:[#allocation11 + $0xd0] sm:$0xff]  }
 0x7a6   :  { %v4010_v20 = vpop.xlane.xlu1 %4009 }
 0x7a7   :  { %v7401_v0 = vsub.f32 %v7368_v55, %v4019_v7  ;;  %v4020_v28 = vmul.f32 0.0078125, %v4010_v20 }
 0x7a8   :  { %v4012_v37 = vpop.xlane.xlu0 %4011 }
 0x7a9   :  { %v7404_v43 = vsub.f32 %v7370_v51, %v4020_v28  ;;  %v4021_v46 = vmul.f32 0.0078125, %v4012_v37  ;;  %v4035_v32 = vmul.f32 %v7401_v0, %v7401_v0  ;;  %v6132_v28 = vld [vmem:[#allocation11 + $0x10] sm:$0xff]  }
 0x7aa   :  { %v4014_v23 = vpop.xlane.xlu1 %4013  ;;  %v7458_v37 = vld [vmem:[#allocation11 + $0x90] sm:$0xff]  }
 0x7ab   :  { %v7409_v33 = vsub.f32 %v7373_v50, %v4021_v46  ;;  %v4022_v5 = vmul.f32 0.0078125, %v4014_v23  ;;  %4047 = vadd.xlane.f32.xlu0 %v4035_v32  ;;  %v4036_v44 = vmul.f32 %v7404_v43, %v7404_v43  ;;  %v6134_v46 = vld [vmem:[#allocation11 + $0x58] sm:$0xff]  }
 0x7ac   :  { %v7461_v32 = vld [vmem:[#allocation11 + $0xd8] sm:$0xff]  }
 0x7ad   :  { %v7414_v13 = vsub.f32 %v7376_v15, %v4022_v5  ;;  %4049 = vadd.xlane.f32.xlu1 %v4036_v44  ;;  %v4037_v24 = vmul.f32 %v7409_v33, %v7409_v33  ;;  %v6136_v23 = vld [vmem:[#allocation11 + $0x18] sm:$0xff]   ;;  %v6138_v44 = vld [vmem:[#allocation11 + $0x60] sm:$0xff]  }
 0x7ae   :  { %v7466_v5 = vld [vmem:[#allocation11 + $0x98] sm:$0xff]  }
 0x7af   :  { %4051 = vadd.xlane.f32.xlu0 %v4037_v24  ;;  %v4038_v12 = vmul.f32 %v7414_v13, %v7414_v13  ;;  %v7469_v24 = vld [vmem:[#allocation11 + $0xe0] sm:$0xff]  }
 0x7b1   :  { %4053 = vadd.xlane.f32.xlu1 %v4038_v12  ;;  %v6140_v12 = vld [vmem:[#allocation11 + $0x20] sm:$0xff]  }
 0x805   :  { %v4040_v42 = vpop.xlane.xlu0 %4039 }
 0x806   :  { %v4055_v3 = vmul.f32 0.0078125, %v4040_v42  ;;  %v6142_v42 = vld [vmem:[#allocation11 + $0x68] sm:$0xff]  }
 0x807   :  { %v4042_v48 = vpop.xlane.xlu1 %4041 }
 0x808   :  { %v4063_v35 = vadd.f32 1e-05, %v4055_v3  ;;  %v4056_v1 = vmul.f32 0.0078125, %v4042_v48  ;;  %v7475_v3 = vld [vmem:[#allocation11 + $0xe8] sm:$0xff]  }
 0x809   :  { %v4044_v61 = vpop.xlane.xlu0 %4043 }
 0x80a   :  { %6298 = vrsqrt.f32 %v4063_v35  ;;  %v4064_v8 = vadd.f32 1e-05, %v4056_v1  ;;  %v4057_v27 = vmul.f32 0.0078125, %v4044_v61 }
 0x80c   :  { %6300 = vrsqrt.f32 %v4064_v8  ;;  %v4065_v38 = vadd.f32 1e-05, %v4057_v27 }
 0x80d   :  { %v4046_v11 = vpop.xlane.xlu1 %4045 }
 0x80e   :  { %6302 = vrsqrt.f32 %v4065_v38  ;;  %v4058_v62 = vmul.f32 0.0078125, %v4046_v11 }
 0x810   :  { %v4066_v52 = vadd.f32 1e-05, %v4058_v62 }
 0x812   :  { %6304 = vrsqrt.f32 %v4066_v52 }
 0x814   :  { %v6299_v34 = vpop.eup %6298 }
 0x815   :  { %v4079_v25 = vmul.f32 %v6299_v34, %v7381_v41 }
 0x816   :  { %v6301_v14 = vpop.eup %6300 }
 0x817   :  { %v4080_v36 = vmul.f32 %v6301_v14, %v7384_v4  ;;  %v4094_v26 = vmul.f32 %v7426_v21, %v4079_v25 }
 0x818   :  { %v6303_v19 = vpop.eup %6302 }
 0x819   :  { %v4095_v16 = vmul.f32 %v7426_v21, %v4080_v36  ;;  %v4109_v54 = vadd.f32 %v7434_v60, %v4094_v26  ;;  %v4081_v40 = vmul.f32 %v6303_v19, %v7389_v58 }
 0x81b   :  { %v4110_v17 = vadd.f32 %v7434_v60, %v4095_v16  ;;  %v4096_v45 = vmul.f32 %v7426_v21, %v4081_v40 }
 0x81c   :  { %v6305_v41 = vpop.eup %6304 }
 0x81d   :  { %v4117_v2 = vpack.c.bf16 %v4110_v17, %v4109_v54  ;;  %v4082_v4 = vmul.f32 %v6305_v41, %v7396_v9  ;;  %v6128_v9 = vld [vmem:[#allocation11 + $0x8] sm:$0xff]   ;;  %v4111_v7 = vadd.f32 %v7434_v60, %v4096_v45 }
 0x81f   :  { %4368 = vmatmul.mubr.bf16.vlgmr.msra.gmra.mrb[44].mxu1 %v4117_v2  ;;  %4441 = vmatmul.mubr.bf16.vlgmr.msra.gmra.mrb[56].mxu0 %v4117_v2  ;;  %v4097_v18 = vmul.f32 %v7426_v21, %v4082_v4 }
 0x820   :  { %4377 = vmatprep.mubr.bf16.mxu1 %v6500_v63  ;;  %4450 = vmatprep.mubr.bf16.mxu0 %v6500_v63 }
 0x821   :  { %v4112_v58 = vadd.f32 %v7434_v60, %v4097_v18  ;;  %5309 = vmatpush3.bf16.msra.mxu1 %v6124_v47  ;;  %5349 = vmatpush3.bf16.msra.mxu0 %v7441_v29 }
 0x822   :  { %5310 = vmatprep.subr.bf16.mxu1 %v6126_v56  ;;  %5350 = vmatprep.subr.bf16.mxu0 %v7443_v59 }
 0x823   :  { %v4118_v20 = vpack.c.bf16 %v4112_v58, %v4111_v7  ;;  %v7498_v7 = vld [vmem:[#allocation11 + $0xb0] sm:$0xff]  }
 0x825   :  { %5311 = vmatpush3.bf16.msra.mxu1 %v6128_v9  ;;  %5351 = vmatpush3.bf16.msra.mxu0 %v7451_v57  ;;  %v6146_v9 = vld [vmem:[#allocation11 + $0x70] sm:$0xff]  }
 0x826   :  { %5312 = vmatprep.subr.bf16.mxu1 %v6130_v22  ;;  %5352 = vmatprep.subr.bf16.mxu0 %v7454_v6  ;;  %v7496_v22 = vld [vmem:[#allocation11 + $0xf0] sm:$0xff]  }
 0x827   :  { %4378 = vmatmul.mubr.bf16.gmra.mrb[48].mxu1 %v4118_v20  ;;  %4451 = vmatmul.mubr.bf16.gmra.mrb[60].mxu0 %v4118_v20  ;;  %v6152_v20 = vld [vmem:[#allocation11 + $0x38] sm:$0xff]  }
 0x828   :  { %4387 = vmatprep.mubr.bf16.mxu1 %v6500_v63  ;;  %4460 = vmatprep.mubr.bf16.mxu0 %v6500_v63 }
 0x829   :  { %5313 = vmatpush3.bf16.msra.mxu1 %v6132_v28  ;;  %5353 = vmatpush3.bf16.msra.mxu0 %v7458_v37  ;;  %v7504_v28 = vld [vmem:[#allocation11 + $0xb8] sm:$0xff]  }
 0x82a   :  { %5314 = vmatprep.subr.bf16.mxu1 %v6134_v46  ;;  %5354 = vmatprep.subr.bf16.mxu0 %v7461_v32  ;;  %v4155_v46 = vlaneseq }
 0x82d   :  { %5315 = vmatpush3.bf16.msra.mxu1 %v6136_v23  ;;  %5355 = vmatpush3.bf16.msra.mxu0 %v7466_v5  ;;  %v4156_v23 = vshrl.u32 %v4155_v46, 7 }
 0x82e   :  { %5316 = vmatprep.subr.bf16.mxu1 %v6138_v44  ;;  %5356 = vmatprep.subr.bf16.mxu0 %v7469_v24 }
 0x82f   :  { %v4157_v44 = vsub.s32 0, %v4156_v23 }
 0x831   :  { %5317 = vmatpush3.bf16.msra.mxu1 %v6140_v12  ;;  %5357 = vmatpush3.bf16.msra.mxu0 %v7472_v10  ;;  %v4165_v12 = vsub.s32 2, %v4156_v23 }
 0x832   :  { %5318 = vmatprep.subr.bf16.mxu1 %v6142_v42  ;;  %5358 = vmatprep.subr.bf16.mxu0 %v7475_v3  ;;  %v4153_v42 = vld [vmem:[%s7603_s10] sm:$0xf] }
 0x838   :  { %v4048_v48 = vpop.xlane.xlu0 %4047 }
 0x839   :  { %v4059_v35 = vmul.f32 0.0078125, %v4048_v48  ;;  %v4161_v48 = vsub.s32 1, %v4156_v23 }
 0x83a   :  { %v4050_v1 = vpop.xlane.xlu1 %4049 }
 0x83b   :  { %v4067_v61 = vadd.f32 1e-05, %v4059_v35  ;;  %v4060_v8 = vmul.f32 0.0078125, %v4050_v1  ;;  %v4169_v35 = vsub.s32 3, %v4156_v23  ;;  %v7512_v1 = vrot.slane %v4153_v42, %v4157_v44 }
 0x83c   :  { %v4052_v27 = vpop.xlane.xlu0 %4051 }
 0x83d   :  { %6306 = vrsqrt.f32 %v4067_v61  ;;  %v4068_v38 = vadd.f32 1e-05, %v4060_v8  ;;  %v4061_v11 = vmul.f32 0.0078125, %v4052_v27  ;;  %v7514_v61 = vrot.slane %v4153_v42, %v4165_v12 }
 0x83e   :  { %v4054_v62 = vpop.xlane.xlu1 %4053  ;;  %v7516_v8 = vrot.slane %v4153_v42, %v4161_v48  ;;  %v7518_v27 = vrot.slane %v4153_v42, %v4169_v35 }
 0x83f   :  { %6308 = vrsqrt.f32 %v4068_v38  ;;  %v4069_v52 = vadd.f32 1e-05, %v4061_v11  ;;  %v4062_v34 = vmul.f32 0.0078125, %v4054_v62 }
 0x841   :  { %6310 = vrsqrt.f32 %v4069_v52  ;;  %v4070_v25 = vadd.f32 1e-05, %v4062_v34 }
 0x843   :  { %6312 = vrsqrt.f32 %v4070_v25 }
 0x847   :  { %v6307_v14 = vpop.eup %6306 }
 0x848   :  { %v4083_v36 = vmul.f32 %v6307_v14, %v7401_v0 }
 0x849   :  { %v6309_v26 = vpop.eup %6308 }
 0x84a   :  { %v4084_v19 = vmul.f32 %v6309_v26, %v7404_v43  ;;  %v4098_v16 = vmul.f32 %v7426_v21, %v4083_v36 }
 0x84b   :  { %v6311_v54 = vpop.eup %6310 }
 0x84c   :  { %v4099_v17 = vmul.f32 %v7426_v21, %v4084_v19  ;;  %v4113_v41 = vadd.f32 %v7434_v60, %v4098_v16  ;;  %v4085_v4 = vmul.f32 %v6311_v54, %v7409_v33  ;;  %v6144_v33 = vld [vmem:[#allocation11 + $0x28] sm:$0xff]  }
 0x84d   :  { %v6313_v40 = vpop.eup %6312  ;;  %5319 = vmatpush3.bf16.msra.mxu1 %v6144_v33 }
 0x84e   :  { %v4114_v2 = vadd.f32 %v7434_v60, %v4099_v17  ;;  %v4086_v47 = vmul.f32 %v6313_v40, %v7414_v13  ;;  %v4100_v43 = vmul.f32 %v7426_v21, %v4085_v4  ;;  %v7493_v13 = vld [vmem:[#allocation11 + $0xa8] sm:$0xff]   ;;  %5320 = vmatprep.subr.bf16.mxu1 %v6146_v9 }
 0x84f   :  { %5359 = vmatpush3.bf16.msra.mxu0 %v7493_v13 }
 0x850   :  { %v4119_v56 = vpack.c.bf16 %v4114_v2, %v4113_v41  ;;  %v4101_v0 = vmul.f32 %v7426_v21, %v4086_v47  ;;  %v4115_v18 = vadd.f32 %v7434_v60, %v4100_v43  ;;  %v6148_v21 = vld [vmem:[#allocation11 + $0x30] sm:$0xff]   ;;  %5360 = vmatprep.subr.bf16.mxu0 %v7496_v22 }
 0x851   :  { %5321 = vmatpush3.bf16.msra.mxu1 %v6148_v21 }
 0x852   :  { %4388 = vmatmul.mubr.bf16.gmra.mrb[52].mxu1 %v4119_v56  ;;  %4461 = vmatmul.mubr.bf16.gmra.mrb[64].mxu0 %v4119_v56  ;;  %v4116_v45 = vadd.f32 %v7434_v60, %v4101_v0  ;;  %v7502_v60 = vld [vmem:[#allocation11 + $0xf8] sm:$0xff]  }
 0x853   :  { %4397 = vmatprep.mubr.bf16.mxu1 %v6500_v63  ;;  %4470 = vmatprep.mubr.bf16.mxu0 %v6500_v63  ;;  %v6150_v63 = vld [vmem:[#allocation11 + $0x78] sm:$0xff]  }
 0x854   :  { %v4120_v58 = vpack.c.bf16 %v4116_v45, %v4115_v18  ;;  %5361 = vmatpush3.bf16.msra.mxu0 %v7498_v7  ;;  %5322 = vmatprep.subr.bf16.mxu1 %v6150_v63 }
 0x855   :  { %5362 = vmatprep.subr.bf16.mxu0 %v7502_v60  ;;  %5323 = vmatpush3.bf16.msra.mxu1 %v6152_v20 }
 0x856   :  { %5820 = vmatprep.subr.bf16.mxu1 %v7420_v30 }
 0x858   :  { %5363 = vmatpush3.bf16.msra.mxu0 %v7504_v28 }
 0x85a   :  { %4398 = vmatmul.mubr.bf16.gmra.mrb[56].mxu1 %v4120_v58  ;;  %4471 = vmatmul.mubr.bf16.gmra.mrb[68].mxu0 %v4120_v58 }
 0x8f2   :  { %v4369_v38 = vpop.f32.mrb[44].mxu1  ;;  %v4442_v30 = vpop.f32.mrb[56].mxu0 }
 0x8f3   :  { %v4370_v11 = vadd.f32 %v4369_v38, %v7512_v1  ;;  %v4443_v62 = vadd.f32 %v4442_v30, %v7514_v61  ;;  %v4371_v52 = vpop.f32.mrb[45].mxu1  ;;  %v4444_v34 = vpop.f32.mrb[57].mxu0 }
 0x8f4   :  { %v4372_v25 = vadd.f32 %v4371_v52, %v7516_v8  ;;  %v4445_v14 = vadd.f32 %v4444_v34, %v7518_v27  ;;  %v4373_v36 = vpop.f32.mrb[46].mxu1  ;;  %v4446_v26 = vpop.f32.mrb[58].mxu0 }
 0x8f5   :  { %v4374_v19 = vadd.f32 %v4373_v36, %v7512_v1  ;;  %v4447_v16 = vadd.f32 %v4446_v26, %v7514_v61  ;;  %v4375_v54 = vpop.f32.mrb[47].mxu1  ;;  %v4448_v17 = vpop.f32.mrb[59].mxu0  ;;  %v4481_v2 = vmax.f32 %v4370_v11, 0.0  ;;  %v4483_v4 = vmax.f32 %v4443_v62, 0.0 }
 0x8f6   :  { %v4376_v40 = vadd.f32 %v4375_v54, %v7516_v8  ;;  %v4449_v41 = vadd.f32 %v4448_v17, %v7518_v27  ;;  %v4482_v0 = vmax.f32 %v4372_v25, 0.0  ;;  %v4484_v43 = vmax.f32 %v4445_v14, 0.0 }
 0x8f7   :  { %v4485_v47 = vmax.f32 %v4374_v19, 0.0  ;;  %v4487_v56 = vmax.f32 %v4447_v16, 0.0 }
 0x8f8   :  { %v4486_v45 = vmax.f32 %v4376_v40, 0.0  ;;  %v4488_v18 = vmax.f32 %v4449_v41, 0.0 }
 0x8f9   :  { %v4513_v58 = vpack.c.bf16 %v4485_v47, %v4481_v2  ;;  %v4515_v33 = vpack.c.bf16 %v4487_v56, %v4483_v4 }
 0x8fa   :  { %v4514_v9 = vpack.c.bf16 %v4486_v45, %v4482_v0  ;;  %v4516_v21 = vpack.c.bf16 %v4488_v18, %v4484_v43  ;;  %v4379_v63 = vpop.f32.mrb[48].mxu1  ;;  %v4452_v20 = vpop.f32.mrb[60].mxu0 }
 0x8fb   :  { %v4380_v46 = vadd.f32 %v4379_v63, %v7512_v1  ;;  %v4453_v23 = vadd.f32 %v4452_v20, %v7514_v61  ;;  %v4381_v44 = vpop.f32.mrb[49].mxu1  ;;  %v4454_v12 = vpop.f32.mrb[61].mxu0 }
 0x8fc   :  { %v4382_v42 = vadd.f32 %v4381_v44, %v7516_v8  ;;  %v4455_v48 = vadd.f32 %v4454_v12, %v7518_v27  ;;  %v4383_v35 = vpop.f32.mrb[50].mxu1  ;;  %v4456_v38 = vpop.f32.mrb[62].mxu0  ;;  %4824 = vmatprep.mubr.bf16.mxu1 %v4514_v9  ;;  %4889 = vmatprep.mubr.bf16.mxu0 %v4516_v21 }
 0x8fd   :  { %v4384_v30 = vadd.f32 %v4383_v35, %v7512_v1  ;;  %v4457_v11 = vadd.f32 %v4456_v38, %v7514_v61  ;;  %v4385_v62 = vpop.f32.mrb[51].mxu1  ;;  %v4458_v52 = vpop.f32.mrb[63].mxu0  ;;  %4825 = vmatmul.mubr.bf16.vlgmr.msra.gmra.mrb[60].mxu1 %v4513_v58  ;;  %4890 = vmatmul.mubr.bf16.vlgmr.msra.gmra.mrb[72].mxu0 %v4515_v33  ;;  %v4489_v14 = vmax.f32 %v4380_v46, 0.0  ;;  %v4491_v36 = vmax.f32 %v4453_v23, 0.0 }
 0x8fe   :  { %v4386_v34 = vadd.f32 %v4385_v62, %v7516_v8  ;;  %v4459_v25 = vadd.f32 %v4458_v52, %v7518_v27  ;;  %5828 = vmatpush3.bf16.msra.mxu1 %v7441_v29  ;;  %v4490_v16 = vmax.f32 %v4382_v42, 0.0  ;;  %v4492_v54 = vmax.f32 %v4455_v48, 0.0 }
 0x8ff   :  { %v4493_v26 = vmax.f32 %v4384_v30, 0.0  ;;  %v4495_v19 = vmax.f32 %v4457_v11, 0.0  ;;  %5821 = vmatprep.subr.bf16.mxu1 %v7443_v59 }
 0x900   :  { %v4494_v17 = vmax.f32 %v4386_v34, 0.0  ;;  %v4496_v40 = vmax.f32 %v4459_v25, 0.0 }
 0x901   :  { %v4517_v41 = vpack.c.bf16 %v4493_v26, %v4489_v14  ;;  %v4519_v2 = vpack.c.bf16 %v4495_v19, %v4491_v36 }
 0x902   :  { %v4518_v4 = vpack.c.bf16 %v4494_v17, %v4490_v16  ;;  %v4520_v47 = vpack.c.bf16 %v4496_v40, %v4492_v54  ;;  %5829 = vmatpush3.bf16.msra.mxu1 %v7451_v57 }
 0x903   :  { %5822 = vmatprep.subr.bf16.mxu1 %v7454_v6 }
 0x904   :  { %4832 = vmatprep.mubr.bf16.mxu1 %v4518_v4  ;;  %4897 = vmatprep.mubr.bf16.mxu0 %v4520_v47 }
 0x905   :  { %4833 = vmatmul.mubr.bf16.gmra.mrb[64].mxu1 %v4517_v41  ;;  %4898 = vmatmul.mubr.bf16.gmra.mrb[76].mxu0 %v4519_v2 }
 0x906   :  { %5830 = vmatpush3.bf16.msra.mxu1 %v7458_v37 }
 0x907   :  { %5823 = vmatprep.subr.bf16.mxu1 %v7461_v32 }
 0x90a   :  { %5831 = vmatpush3.bf16.msra.mxu1 %v7466_v5 }
 0x90b   :  { %5824 = vmatprep.subr.bf16.mxu1 %v7469_v24 }
 0x90e   :  { %5832 = vmatpush3.bf16.msra.mxu1 %v7472_v10 }
 0x90f   :  { %5825 = vmatprep.subr.bf16.mxu1 %v7475_v3 }
 0x912   :  { %5833 = vmatpush3.bf16.msra.mxu1 %v7493_v13 }
 0x913   :  { %5826 = vmatprep.subr.bf16.mxu1 %v7496_v22 }
 0x916   :  { %5834 = vmatpush3.bf16.msra.mxu1 %v7498_v7 }
 0x917   :  { %5827 = vmatprep.subr.bf16.mxu1 %v7502_v60 }
 0x91a   :  { %5835 = vmatpush3.bf16.msra.mxu1 %v7504_v28 }
 0x925   :  { %v4389_v29 = vpop.f32.mrb[52].mxu1  ;;  %v4462_v59 = vpop.f32.mrb[64].mxu0 }
 0x926   :  { %v4390_v57 = vadd.f32 %v4389_v29, %v7512_v1  ;;  %v4463_v6 = vadd.f32 %v4462_v59, %v7514_v61  ;;  %v4391_v37 = vpop.f32.mrb[53].mxu1  ;;  %v4464_v32 = vpop.f32.mrb[65].mxu0 }
 0x927   :  { %v4392_v5 = vadd.f32 %v4391_v37, %v7516_v8  ;;  %v4465_v24 = vadd.f32 %v4464_v32, %v7518_v27  ;;  %v4393_v10 = vpop.f32.mrb[54].mxu1  ;;  %v4466_v3 = vpop.f32.mrb[66].mxu0 }
 0x928   :  { %v4394_v13 = vadd.f32 %v4393_v10, %v7512_v1  ;;  %v4467_v22 = vadd.f32 %v4466_v3, %v7514_v61  ;;  %v4395_v7 = vpop.f32.mrb[55].mxu1  ;;  %v4468_v60 = vpop.f32.mrb[67].mxu0  ;;  %v4497_v0 = vmax.f32 %v4390_v57, 0.0  ;;  %v4499_v43 = vmax.f32 %v4463_v6, 0.0 }
 0x929   :  { %v4396_v28 = vadd.f32 %v4395_v7, %v7516_v8  ;;  %v4469_v56 = vadd.f32 %v4468_v60, %v7518_v27  ;;  %v4498_v58 = vmax.f32 %v4392_v5, 0.0  ;;  %v4500_v33 = vmax.f32 %v4465_v24, 0.0 }
 0x92a   :  { %v4501_v45 = vmax.f32 %v4394_v13, 0.0  ;;  %v4503_v18 = vmax.f32 %v4467_v22, 0.0 }
 0x92b   :  { %v4502_v9 = vmax.f32 %v4396_v28, 0.0  ;;  %v4504_v21 = vmax.f32 %v4469_v56, 0.0 }
 0x92c   :  { %v4521_v63 = vpack.c.bf16 %v4501_v45, %v4497_v0  ;;  %v4523_v20 = vpack.c.bf16 %v4503_v18, %v4499_v43 }
 0x92d   :  { %v4522_v46 = vpack.c.bf16 %v4502_v9, %v4498_v58  ;;  %v4524_v23 = vpack.c.bf16 %v4504_v21, %v4500_v33  ;;  %v4399_v44 = vpop.f32.mrb[56].mxu1  ;;  %v4472_v12 = vpop.f32.mrb[68].mxu0 }
 0x92e   :  { %v4400_v42 = vadd.f32 %v4399_v44, %v7512_v1  ;;  %v4473_v48 = vadd.f32 %v4472_v12, %v7514_v61  ;;  %v4401_v35 = vpop.f32.mrb[57].mxu1  ;;  %v4474_v38 = vpop.f32.mrb[69].mxu0 }
 0x92f   :  { %v4402_v30 = vadd.f32 %v4401_v35, %v7516_v8  ;;  %v4475_v11 = vadd.f32 %v4474_v38, %v7518_v27  ;;  %v4403_v62 = vpop.f32.mrb[58].mxu1  ;;  %v4476_v52 = vpop.f32.mrb[70].mxu0  ;;  %4840 = vmatprep.mubr.bf16.mxu1 %v4522_v46 }
 0x930   :  { %v4404_v34 = vadd.f32 %v4403_v62, %v7512_v1  ;;  %v4477_v25 = vadd.f32 %v4476_v52, %v7514_v61  ;;  %v4405_v14 = vpop.f32.mrb[59].mxu1  ;;  %v4478_v36 = vpop.f32.mrb[71].mxu0  ;;  %4841 = vmatmul.mubr.bf16.gmra.mrb[68].mxu1 %v4521_v63  ;;  %v4505_v16 = vmax.f32 %v4400_v42, 0.0  ;;  %v4507_v54 = vmax.f32 %v4473_v48, 0.0 }
 0x931   :  { %v4406_v26 = vadd.f32 %v4405_v14, %v7516_v8  ;;  %v4479_v19 = vadd.f32 %v4478_v36, %v7518_v27  ;;  %v4506_v41 = vmax.f32 %v4402_v30, 0.0  ;;  %v4508_v2 = vmax.f32 %v4475_v11, 0.0  ;;  %v5123_v27 = vld [vmem:[%s7605_s12] ss:$0 sm:$0xff]  ;;  %s6503_s12 = smov [#allocation13]  }
 0x932   :  { %v4509_v17 = vmax.f32 %v4404_v34, 0.0  ;;  %v4511_v40 = vmax.f32 %v4477_v25, 0.0  ;;  %s4943_s15 = sshll.u32 %s6503_s12, 4  ;;  %s4944_s15 = int_to_ptr.vmem [resolvable:$true] %s4943_s15 }
 0x933   :  { %v4510_v4 = vmax.f32 %v4406_v26, 0.0  ;;  %v4512_v47 = vmax.f32 %v4479_v19, 0.0  ;;  %s6454_s16 = scalar_lea.vmem %s4944_s15, 1024  ;;  %p6459_p7 = scmp.lt.s32.totalorder %s4944_s15, %s4944_s15 }
 0x934   :  { %v4525_v29 = vpack.c.bf16 %v4509_v17, %v4505_v16  ;;  %v4527_v59 = vpack.c.bf16 %v4511_v40, %v4507_v54  ;;  %p6455_p6 = scmp.ne.s32.totalorder %s4944_s15, %s6454_s16  ;;  %p6460_p8 = scmp.lt.s32.totalorder %s6454_s16, %s6454_s16 }
 0x935   :  { %v4526_v1 = vpack.c.bf16 %v4510_v4, %v4506_v41  ;;  %v4528_v57 = vpack.c.bf16 %v4512_v47, %v4508_v2 }
 0x936   :  { %p6461_p9 = por %p6460_p8, %p6459_p7 }
 0x937   :  { %4848 = vmatprep.mubr.bf16.mxu1 %v4526_v1 }
 0x938   :  { %4849 = vmatmul.mubr.bf16.gmra.mrb[72].mxu1 %v4525_v29  ;;  %p6462_p10 = pnand %p6461_p9, %p6455_p6 }
 0x939   :  { %4905 = vmatprep.mubr.bf16.mxu1 %v4524_v23 }
 0x940   :  { %4906 = vmatmul.mubr.bf16.vlgmr.msra.gmra.mrb[76].mxu1 %v4523_v20 }
 0x941   :  { %4913 = vmatprep.mubr.bf16.mxu1 %v4528_v57 }
 0x948   :  { %4914 = vmatmul.mubr.bf16.gmra.mrb[80].mxu1 %v4527_v59 }
 0x9d0   :  { %v5324_v61 = vpop.f32.mrb[60].mxu1  ;;  %v5364_v8 = vpop.f32.mrb[72].mxu0 }
 0x9d1   :  { %v5325_v6 = vpop.f32.mrb[61].mxu1  ;;  %v5365_v37 = vpop.f32.mrb[73].mxu0 }
 0x9d2   :  { %v5326_v32 = vadd.f32 %v5325_v6, %v5324_v61  ;;  %v5366_v5 = vadd.f32 %v5365_v37, %v5364_v8  ;;  %v5327_v24 = vpop.f32.mrb[62].mxu1  ;;  %v5367_v10 = vpop.f32.mrb[74].mxu0 }
 0x9d3   :  { %v5328_v3 = vpop.f32.mrb[63].mxu1  ;;  %v5368_v13 = vpop.f32.mrb[75].mxu0 }
 0x9d4   :  { %v4827_v22 = vadd.f32 %v5326_v32, %v5123_v27  ;;  %v5329_v7 = vadd.f32 %v5328_v3, %v5327_v24  ;;  %v5369_v60 = vadd.f32 %v5368_v13, %v5367_v10 }
 0x9d6   :  { %v4892_v28 = vadd.f32 %v5366_v5, %v4827_v22  ;;  %v4830_v56 = vadd.f32 %v5329_v7, %v5123_v27 }
 0x9d8   :  { %v4922_v0 = vadd.f32 %v4892_v28, %v7356_v49  ;;  %v4895_v43 = vadd.f32 %v5369_v60, %v4830_v56  ;;  %v5330_v45 = vpop.f32.mrb[64].mxu1  ;;  %v5370_v18 = vpop.f32.mrb[76].mxu0 }
 0x9d9   :  { %v5331_v58 = vpop.f32.mrb[65].mxu1  ;;  %v5371_v33 = vpop.f32.mrb[77].mxu0 }
 0x9da   :  { %4930 = vst [vmem:[#allocation13] sm:$0xff] %v4922_v0  ;;  %v4923_v9 = vadd.f32 %v4895_v43, %v7358_v39  ;;  %v5332_v21 = vadd.f32 %v5331_v58, %v5330_v45  ;;  %v5372_v63 = vadd.f32 %v5371_v33, %v5370_v18  ;;  %v5333_v20 = vpop.f32.mrb[66].mxu1  ;;  %v5373_v46 = vpop.f32.mrb[78].mxu0 }
 0x9db   :  { %v5334_v23 = vpop.f32.mrb[67].mxu1  ;;  %v5374_v44 = vpop.f32.mrb[79].mxu0 }
 0x9dc   :  { %4931 = vst [vmem:[#allocation13 + $0x8] sm:$0xff] %v4923_v9  ;;  %v4835_v12 = vadd.f32 %v5332_v21, %v5123_v27  ;;  %v5335_v42 = vadd.f32 %v5334_v23, %v5333_v20  ;;  %v5375_v48 = vadd.f32 %v5374_v44, %v5373_v46 }
 0x9de   :  { %v4900_v35 = vadd.f32 %v5372_v63, %v4835_v12  ;;  %v4838_v49 = vadd.f32 %v5335_v42, %v5123_v27 }
 0x9e0   :  { %v4924_v38 = vadd.f32 %v4900_v35, %v7361_v53  ;;  %v4903_v30 = vadd.f32 %v5375_v48, %v4838_v49 }
 0x9e2   :  { %4932 = vst [vmem:[#allocation13 + $0x10] sm:$0xff] %v4924_v38  ;;  %v4925_v11 = vadd.f32 %v4903_v30, %v7365_v31 }
 0x9e4   :  { %4933 = vst [vmem:[#allocation13 + $0x18] sm:$0xff] %v4925_v11 }
 0xa03   :  { %v5336_v39 = vpop.f32.mrb[68].mxu1 }
 0xa04   :  { %v5337_v62 = vpop.f32.mrb[69].mxu1 }
 0xa05   :  { %v5338_v52 = vadd.f32 %v5337_v62, %v5336_v39  ;;  %v5339_v34 = vpop.f32.mrb[70].mxu1 }
 0xa06   :  { %v5340_v25 = vpop.f32.mrb[71].mxu1 }
 0xa07   :  { %v4843_v14 = vadd.f32 %v5338_v52, %v5123_v27  ;;  %v5341_v36 = vadd.f32 %v5340_v25, %v5339_v34 }
 0xa09   :  { %v4846_v26 = vadd.f32 %v5341_v36, %v5123_v27 }
 0xa0b   :  { %v5342_v19 = vpop.f32.mrb[72].mxu1 }
 0xa0c   :  { %v5343_v16 = vpop.f32.mrb[73].mxu1 }
 0xa0d   :  { %v5344_v54 = vadd.f32 %v5343_v16, %v5342_v19  ;;  %v5345_v17 = vpop.f32.mrb[74].mxu1 }
 0xa0e   :  { %v5346_v40 = vpop.f32.mrb[75].mxu1 }
 0xa0f   :  { %v4851_v41 = vadd.f32 %v5344_v54, %v5123_v27  ;;  %v5347_v53 = vadd.f32 %v5346_v40, %v5345_v17 }
 0xa11   :  { %v4854_v2 = vadd.f32 %v5347_v53, %v5123_v27 }
 0xa13   :  { %v5376_v4 = vpop.f32.mrb[76].mxu1 }
 0xa14   :  { %v5377_v47 = vpop.f32.mrb[77].mxu1 }
 0xa15   :  { %v5378_v31 = vadd.f32 %v5377_v47, %v5376_v4  ;;  %v5379_v29 = vpop.f32.mrb[78].mxu1 }
 0xa16   :  { %v5380_v59 = vpop.f32.mrb[79].mxu1 }
 0xa17   :  { %v4908_v1 = vadd.f32 %v5378_v31, %v4843_v14  ;;  %v5381_v57 = vadd.f32 %v5380_v59, %v5379_v29 }
 0xa19   :  { %v4926_v61 = vadd.f32 %v4908_v1, %v7368_v55  ;;  %v4911_v8 = vadd.f32 %v5381_v57, %v4846_v26 }
 0xa1b   :  { %4934 = vst [vmem:[#allocation13 + $0x20] sm:$0xff] %v4926_v61  ;;  %v4927_v6 = vadd.f32 %v4911_v8, %v7370_v51  ;;  %v5382_v37 = vpop.f32.mrb[80].mxu1 }
 0xa1c   :  { %v5383_v32 = vpop.f32.mrb[81].mxu1 }
 0xa1d   :  { %4935 = vst [vmem:[#allocation13 + $0x28] sm:$0xff] %v4927_v6  ;;  %v5384_v5 = vadd.f32 %v5383_v32, %v5382_v37  ;;  %v5385_v24 = vpop.f32.mrb[82].mxu1 }
 0xa1e   :  { %v5386_v10 = vpop.f32.mrb[83].mxu1 }
 0xa1f   :  { %v4916_v27 = vadd.f32 %v5384_v5, %v4851_v41  ;;  %v5387_v3 = vadd.f32 %v5386_v10, %v5385_v24 }
 0xa21   :  { %v4928_v13 = vadd.f32 %v4916_v27, %v7373_v50  ;;  %v4919_v22 = vadd.f32 %v5387_v3, %v4854_v2 }
 0xa23   :  { %4936 = vst [vmem:[#allocation13 + $0x30] sm:$0xff] %v4928_v13  ;;  %v4929_v55 = vadd.f32 %v4919_v22, %v7376_v15 }
 0xa25   :  { %4937 = vst [vmem:[#allocation13 + $0x38] sm:$0xff] %v4929_v55 }
 0xa26   :  { %6465 = shalt.err (!%p6462_p10)
}
 0xa27   :  { %s6466_s18 = scalar_lea.hbm %s7606_s13, 1024 }
 0xa28   :  { %p6467_p11 = scmp.ne.s32.totalorder %s7606_s13, %s6466_s18  ;;  %p6470_p12 = scmp.lt.u32.totalorder %s6466_s18, %s7606_s13 }
 0xa2a   :  { %p6472_p13 = pnand %p6470_p12, %p6467_p11 }
 0xa2c   :  { %6475 = shalt.err (!%p6472_p13)
}
 0xa2d   :  { %4949 = dma.vmem_to_hbm [thread:$0]  %s4944_s15, 1024, %s7606_s13, [#allocation4], %s6488_s20, %s6488_s20, %s6489_s21  }
 0xa2e   :  { %6484 = dma.done.wait [#allocation4], 1024  }
 0xa2f   :  { %6485 = vsyncadd [#allocation4], 4294966272 }
 0xa30   :  { %4953 = vsyncpa [#allocation3], 1 }
 0xa31   :  { %4954 = vsyncpa [#allocation6], 1 }
 0xa32   :  { %4955 = vsyncpa [#allocation9], 1 }
 0xa33   :  { %4956 = vsyncpa [#allocation12], 1 }
 0xa34   :  { %4957 = vsyncpa [#allocation4], 1 }

</bundles_post_ra>
